<compile_context>
chip_gen: v5e
topology: v5e:2x2
jax: 0.10.0
libtpu: 0.0.40
codegen_flags: <defaults>
</compile_context>

<pallas_src>
import functools

import jax
import jax.numpy as jnp
from jax.experimental import pallas as pl
from jax.experimental.pallas import tpu as pltpu


def _round_up(x, m):
    return (x + m - 1) // m * m


def _pick_tile(dim, candidates, fallback):
    for c in candidates:
        if dim % c == 0:
            return c
    return fallback


# --------------------------------------------------------------------------
# Pallas kernels
# --------------------------------------------------------------------------

def _matmul_bias_act_kernel(a_ref, b_ref, bias_ref, o_ref, acc_ref, *, act, slope):
    """bf16 tiled matmul, fp32 accumulation, fused bias (+ LeakyReLU) epilogue."""
    k = pl.program_id(2)

    @pl.when(k == 0)
    def _():
        acc_ref[...] = jnp.zeros_like(acc_ref)

    acc_ref[...] += jnp.dot(a_ref[...], b_ref[...],
                            preferred_element_type=jnp.float32)

    @pl.when(k == pl.num_programs(2) - 1)
    def _():
        y = acc_ref[...] + bias_ref[...]
        if act == "leaky":
            y = jnp.where(y > 0.0, y, slope * y)
        o_ref[...] = y.astype(o_ref.dtype)


def matmul_bias_act(a, b, bias, *, act=None, slope=0.2, out_dtype=jnp.bfloat16):
    """C = act(A @ B + bias); A cast to bf16, B/bias pre-formatted at init."""
    M, K = a.shape
    Kb, N = b.shape
    assert K == Kb, (K, Kb)

    tm = min(256, _round_up(M, 8))
    Mp = _round_up(M, tm)
    tk = _pick_tile(K, (512, 256, 128), K)   # fallback: whole K in one block
    tn = _pick_tile(N, (256, 128), N)        # fallback: full (lane-masked) width

    a = a.astype(jnp.bfloat16)
    if Mp != M:
        a = jnp.pad(a, ((0, Mp - M), (0, 0)))

    out = pl.pallas_call(
        functools.partial(_matmul_bias_act_kernel, act=act, slope=slope),
        out_shape=jax.ShapeDtypeStruct((Mp, N), out_dtype),
        grid_spec=pltpu.PrefetchScalarGridSpec(
            num_scalar_prefetch=0,
            grid=(Mp // tm, N // tn, K // tk),
            in_specs=[
                pl.BlockSpec((tm, tk), lambda i, j, k: (i, k)),
                pl.BlockSpec((tk, tn), lambda i, j, k: (k, j)),
                pl.BlockSpec((1, tn), lambda i, j, k: (0, j)),
            ],
            out_specs=pl.BlockSpec((tm, tn), lambda i, j, k: (i, j)),
            scratch_shapes=[pltpu.VMEM((tm, tn), jnp.float32)],
        ),
        compiler_params=pltpu.CompilerParams(
            dimension_semantics=("parallel", "parallel", "arbitrary")),
    )(a, b, bias)

    if Mp != M:
        out = out[:M]
    return out


def _in_leaky_kernel(x_ref, o_ref, *, eps, slope):
    """InstanceNorm2d(affine=False) + LeakyReLU over one (sample, channel-block)."""
    x = x_ref[...].astype(jnp.float32)              # (1, H*W, cb)
    mean = jnp.mean(x, axis=1, keepdims=True)
    var = jnp.mean(jnp.square(x - mean), axis=1, keepdims=True)
    y = (x - mean) * jax.lax.rsqrt(var + eps)
    y = jnp.where(y > 0.0, y, slope * y)
    o_ref[...] = y.astype(o_ref.dtype)


def instance_norm_leaky(x_nhwc, eps=1e-5, slope=0.2):
    N, H, W, C = x_nhwc.shape
    cb = 128 if C % 128 == 0 else C                 # channel-tiled stats are exact
    x3 = x_nhwc.reshape(N, H * W, C)
    spec = pl.BlockSpec((1, H * W, cb), lambda i, c: (i, 0, c))
    out = pl.pallas_call(
        functools.partial(_in_leaky_kernel, eps=eps, slope=slope),
        out_shape=jax.ShapeDtypeStruct((N, H * W, C), x_nhwc.dtype),
        grid=(N, C // cb),
        in_specs=[spec],
        out_specs=spec,
        compiler_params=pltpu.CompilerParams(
            dimension_semantics=("parallel", "parallel")),
    )(x3)
    return out.reshape(N, H, W, C)


# --------------------------------------------------------------------------
# Conv wrapper (im2col glue in plain JAX, matmul+epilogue in Pallas)
# --------------------------------------------------------------------------

def conv_nhwc(x, w_mat, bias, *, k, s, pad, act=None, out_dtype=jnp.bfloat16):
    x = x.astype(jnp.bfloat16)                      # halve im2col HBM traffic
    if pad > 0:
        x = jnp.pad(x, ((0, 0), (pad, pad), (pad, pad), (0, 0)))
    N, Hp, Wp, Cin = x.shape
    Ho = (Hp - k) // s + 1
    Wo = (Wp - k) // s + 1
    cols = []
    for ky in range(k):
        for kx in range(k):
            cols.append(x[:, ky:ky + (Ho - 1) * s + 1:s,
                            kx:kx + (Wo - 1) * s + 1:s, :])
    patches = jnp.stack(cols, axis=3).reshape(N * Ho * Wo, k * k * Cin)
    out = matmul_bias_act(patches, w_mat, bias, act=act, out_dtype=out_dtype)
    return out.reshape(N, Ho, Wo, -1)


# --------------------------------------------------------------------------
# Parameters (deterministic synthetic init, PyTorch weight conventions)
# --------------------------------------------------------------------------

def _conv_params(key, cin, cout, k, cout_pad=None):
    kw, kb = jax.random.split(key)
    # PyTorch Conv2d weight layout (Cout, Cin, kh, kw) -> im2col matrix (k*k*Cin, Cout)
    w = jax.random.normal(kw, (cout, cin, k, k), jnp.float32) / jnp.sqrt(k * k * cin)
    b = jax.random.normal(kb, (cout,), jnp.float32) * 0.01
    w_mat = jnp.transpose(w, (2, 3, 1, 0)).reshape(k * k * cin, cout)
    if cout_pad is not None and cout_pad > cout:
        w_mat = jnp.pad(w_mat, ((0, 0), (0, cout_pad - cout)))
        b = jnp.pad(b, (0, cout_pad - cout))
    return w_mat.astype(jnp.bfloat16), b.reshape(1, -1).astype(jnp.float32)


def init_discriminator_params(key, in_nc=3, out_nc=1, dim=64):
    keys = jax.random.split(key, 5)
    p = {}
    p["c1"] = _conv_params(keys[0], in_nc, dim, 4)
    p["c2"] = _conv_params(keys[1], dim, 2 * dim, 4)
    p["c3"] = _conv_params(keys[2], 2 * dim, 4 * dim, 4)
    p["c4"] = _conv_params(keys[3], 4 * dim, 8 * dim, 4)
    # final conv: pad out channels to 128 once (lane-dense stores); sliced later
    p["c5"] = _conv_params(keys[4], 8 * dim, out_nc, 4, cout_pad=128)
    return p


# --------------------------------------------------------------------------
# Discriminator forward
# --------------------------------------------------------------------------

def discriminator_forward(params, x_nchw, out_nc=1):
    # NCHW (PyTorch) -> NHWC (internal, channels on lane axis)
    x = jnp.transpose(x_nchw, (0, 2, 3, 1))

    # L1: Conv(in_nc->64, k4, s2, p1) + LeakyReLU(0.2), no norm -> fused epilogue
    y = conv_nhwc(x, *params["c1"], k=4, s=2, pad=1, act="leaky")

    # L2: Conv(64->128, k4, s2, p1) + IN + LeakyReLU
    y = conv_nhwc(y, *params["c2"], k=4, s=2, pad=1)
    y = instance_norm_leaky(y)

    # L3: Conv(128->256, k4, s2, p1) + IN + LeakyReLU
    y = conv_nhwc(y, *params["c3"], k=4, s=2, pad=1)
    y = instance_norm_leaky(y)

    # L4: Conv(256->512, k4, s1, p1) + IN + LeakyReLU
    y = conv_nhwc(y, *params["c4"], k=4, s=1, pad=1)
    y = instance_norm_leaky(y)

    # L5: Conv(512->out_nc, k4, s1, p1), fp32 logits; padded channels -> slice
    y = conv_nhwc(y, *params["c5"], k=4, s=1, pad=1, act=None,
                  out_dtype=jnp.float32)
    y = y[..., :out_nc]

    # NHWC -> NCHW
    return jnp.transpose(y, (0, 3, 1, 2))


if __name__ == "__main__":
    key = jax.random.PRNGKey(0)
    kp, kx = jax.random.split(key)

    in_nc, out_nc = 3, 1
    params = init_discriminator_params(kp, in_nc=in_nc, out_nc=out_nc)

    # 32x32 is the smallest "small" spatial size for which all five k=4 convs
    # of the PatchGAN discriminator are valid (output patch map = 2x2).
    x = jax.random.normal(kx, (2, in_nc, 32, 32), jnp.float32)

    fwd = jax.jit(functools.partial(discriminator_forward, out_nc=out_nc))
    out = fwd(params, x)
    jax.block_until_ready(out)

    assert out.shape == (2, out_nc, 2, 2), out.shape
    assert bool(jnp.all(jnp.isfinite(out)))
    print("KERNEL_OK")
</pallas_src>

<mosaic_0001>
module attributes {stable_mosaic.version = 11 : i64} {
  func.func @_matmul_bias_act_kernel(%arg0: i32, %arg1: i32, %arg2: i32, %arg3: memref<256x48xbf16, #tpu.memory_space<vmem>>, %arg4: memref<48x64xbf16, #tpu.memory_space<vmem>>, %arg5: memref<1x64xf32, #tpu.memory_space<vmem>>, %arg6: memref<256x64xbf16, #tpu.memory_space<vmem>>, %arg7: memref<256x64xf32, #tpu.memory_space<vmem>>) attributes {dimension_semantics = [#tpu.dimension_semantics<parallel>, #tpu.dimension_semantics<parallel>, #tpu.dimension_semantics<arbitrary>], iteration_bounds = array<i64: 2, 1, 1>, scalar_prefetch = 0 : i64, scratch_operands = 1 : i64, tpu.core_type = #tpu.core_type<tc>, window_params = [{transform_indices = @transform_0, window_bounds = array<i64: 256, 48>}, {transform_indices = @transform_1, window_bounds = array<i64: 48, 64>}, {transform_indices = @transform_2, window_bounds = array<i64: 1, 64>}, {transform_indices = @transform_3, window_bounds = array<i64: 256, 64>}]} {
    %c0_i32 = arith.constant 0 : i32
    %0 = arith.cmpi eq, %arg2, %c0_i32 : i32
    %1 = arith.extui %0 : i1 to i32
    %c0_i32_0 = arith.constant 0 : i32
    %2 = arith.cmpi ne, %1, %c0_i32_0 : i32
    scf.if %2 {
      %cst_10 = arith.constant 0.000000e+00 : f32
      %12 = vector.broadcast %cst_10 : f32 to vector<256x64xf32>
      %c0_11 = arith.constant 0 : index
      %c0_12 = arith.constant 0 : index
      %13 = vector.load %arg7[%c0_11, %c0_12] : memref<256x64xf32, #tpu.memory_space<vmem>>, vector<256x64xf32>
      tpu.vector_store %arg7[%c0_11, %c0_12], %12 {strides = array<i32>} : memref<256x64xf32, #tpu.memory_space<vmem>>, vector<256x64xf32>,
    } else {
    }
    %c0 = arith.constant 0 : index
    %c0_1 = arith.constant 0 : index
    %3 = vector.load %arg7[%c0, %c0_1] : memref<256x64xf32, #tpu.memory_space<vmem>>, vector<256x64xf32>
    %c0_2 = arith.constant 0 : index
    %c0_3 = arith.constant 0 : index
    %4 = vector.load %arg3[%c0_2, %c0_3] : memref<256x48xbf16, #tpu.memory_space<vmem>>, vector<256x48xbf16>
    %c0_4 = arith.constant 0 : index
    %c0_5 = arith.constant 0 : index
    %5 = vector.load %arg4[%c0_4, %c0_5] : memref<48x64xbf16, #tpu.memory_space<vmem>>, vector<48x64xbf16>
    %cst = arith.constant dense<0.000000e+00> : vector<256x64xf32>
    %6 = tpu.matmul %4, %5, %cst {dimension_numbers = #tpu.dot_dimension_numbers<[1], [0], [0], [1], [0, 0, 1, 1], [], []>} : vector<256x48xbf16>, vector<48x64xbf16>, vector<256x64xf32> -> vector<256x64xf32>
    %7 = arith.addf %3, %6 : vector<256x64xf32>
    %c0_6 = arith.constant 0 : index
    %c0_7 = arith.constant 0 : index
    %8 = vector.load %arg7[%c0_6, %c0_7] : memref<256x64xf32, #tpu.memory_space<vmem>>, vector<256x64xf32>
    tpu.vector_store %arg7[%c0_6, %c0_7], %7 {strides = array<i32>} : memref<256x64xf32, #tpu.memory_space<vmem>>, vector<256x64xf32>,
    %c0_i32_8 = arith.constant 0 : i32
    %9 = arith.cmpi eq, %arg2, %c0_i32_8 : i32
    %10 = arith.extui %9 : i1 to i32
    %c0_i32_9 = arith.constant 0 : i32
    %11 = arith.cmpi ne, %10, %c0_i32_9 : i32
    scf.if %11 {
      %c0_10 = arith.constant 0 : index
      %c0_11 = arith.constant 0 : index
      %12 = vector.load %arg7[%c0_10, %c0_11] : memref<256x64xf32, #tpu.memory_space<vmem>>, vector<256x64xf32>
      %c0_12 = arith.constant 0 : index
      %c0_13 = arith.constant 0 : index
      %13 = vector.load %arg5[%c0_12, %c0_13] : memref<1x64xf32, #tpu.memory_space<vmem>>, vector<1x64xf32>
      %14 = vector.broadcast %13 : vector<1x64xf32> to vector<256x64xf32>
      %15 = arith.addf %12, %14 : vector<256x64xf32>
      %cst_14 = arith.constant 0.000000e+00 : f32
      %16 = vector.broadcast %cst_14 : f32 to vector<256x64xf32>
      %17 = arith.cmpf ogt, %15, %16 : vector<256x64xf32>
      %cst_15 = arith.constant 2.000000e-01 : f32
      %18 = vector.broadcast %cst_15 : f32 to vector<256x64xf32>
      %19 = arith.mulf %18, %15 : vector<256x64xf32>
      %20 = arith.select %17, %15, %19 : vector<256x64xi1>, vector<256x64xf32>
      %21 = arith.truncf %20 : vector<256x64xf32> to vector<256x64xbf16>
      %c0_16 = arith.constant 0 : index
      %c0_17 = arith.constant 0 : index
      %22 = vector.load %arg6[%c0_16, %c0_17] : memref<256x64xbf16, #tpu.memory_space<vmem>>, vector<256x64xbf16>
      tpu.vector_store %arg6[%c0_16, %c0_17], %21 {strides = array<i32>} : memref<256x64xbf16, #tpu.memory_space<vmem>>, vector<256x64xbf16>,
    } else {
    }
    return
  }
  func.func @transform_0(%arg0: i32, %arg1: i32, %arg2: i32) -> (i32, i32) {
    %c0_i32 = arith.constant 0 : i32
    return %arg0, %arg2 : i32, i32
  }
  func.func @transform_1(%arg0: i32, %arg1: i32, %arg2: i32) -> (i32, i32) {
    %c0_i32 = arith.constant 0 : i32
    return %arg2, %arg1 : i32, i32
  }
  func.func @transform_2(%arg0: i32, %arg1: i32, %arg2: i32) -> (i32, i32) {
    %c0_i32 = arith.constant 0 : i32
    %c0_i32_0 = arith.constant 0 : i32
    return %c0_i32, %arg1 : i32, i32
  }
  func.func @transform_3(%arg0: i32, %arg1: i32, %arg2: i32) -> (i32, i32) {
    %c0_i32 = arith.constant 0 : i32
    return %arg0, %arg1 : i32, i32
  }
}

module attributes {stable_mosaic.version = 11 : i64} {
  func.func @_matmul_bias_act_kernel(%arg0: i32, %arg1: i32, %arg2: i32, %arg3: memref<128x512xbf16, #tpu.memory_space<vmem>>, %arg4: memref<512x128xbf16, #tpu.memory_space<vmem>>, %arg5: memref<1x128xf32, #tpu.memory_space<vmem>>, %arg6: memref<128x128xbf16, #tpu.memory_space<vmem>>, %arg7: memref<128x128xf32, #tpu.memory_space<vmem>>) attributes {dimension_semantics = [#tpu.dimension_semantics<parallel>, #tpu.dimension_semantics<parallel>, #tpu.dimension_semantics<arbitrary>], iteration_bounds = array<i64: 1, 1, 2>, scalar_prefetch = 0 : i64, scratch_operands = 1 : i64, tpu.core_type = #tpu.core_type<tc>, window_params = [{transform_indices = @transform_0, window_bounds = array<i64: 128, 512>}, {transform_indices = @transform_1, window_bounds = array<i64: 512, 128>}, {transform_indices = @transform_2, window_bounds = array<i64: 1, 128>}, {transform_indices = @transform_3, window_bounds = array<i64: 128, 128>}]} {
    %c0_i32 = arith.constant 0 : i32
    %0 = arith.cmpi eq, %arg2, %c0_i32 : i32
    %1 = arith.extui %0 : i1 to i32
    %c0_i32_0 = arith.constant 0 : i32
    %2 = arith.cmpi ne, %1, %c0_i32_0 : i32
    scf.if %2 {
      %cst_9 = arith.constant 0.000000e+00 : f32
      %12 = vector.broadcast %cst_9 : f32 to vector<128x128xf32>
      %c0_10 = arith.constant 0 : index
      %c0_11 = arith.constant 0 : index
      %13 = vector.load %arg7[%c0_10, %c0_11] : memref<128x128xf32, #tpu.memory_space<vmem>>, vector<128x128xf32>
      tpu.vector_store %arg7[%c0_10, %c0_11], %12 {strides = array<i32>} : memref<128x128xf32, #tpu.memory_space<vmem>>, vector<128x128xf32>,
    } else {
    }
    %c0 = arith.constant 0 : index
    %c0_1 = arith.constant 0 : index
    %3 = vector.load %arg7[%c0, %c0_1] : memref<128x128xf32, #tpu.memory_space<vmem>>, vector<128x128xf32>
    %c0_2 = arith.constant 0 : index
    %c0_3 = arith.constant 0 : index
    %4 = vector.load %arg3[%c0_2, %c0_3] : memref<128x512xbf16, #tpu.memory_space<vmem>>, vector<128x512xbf16>
    %c0_4 = arith.constant 0 : index
    %c0_5 = arith.constant 0 : index
    %5 = vector.load %arg4[%c0_4, %c0_5] : memref<512x128xbf16, #tpu.memory_space<vmem>>, vector<512x128xbf16>
    %cst = arith.constant dense<0.000000e+00> : vector<128x128xf32>
    %6 = tpu.matmul %4, %5, %cst {dimension_numbers = #tpu.dot_dimension_numbers<[1], [0], [0], [1], [0, 0, 1, 1], [], []>} : vector<128x512xbf16>, vector<512x128xbf16>, vector<128x128xf32> -> vector<128x128xf32>
    %7 = arith.addf %3, %6 : vector<128x128xf32>
    %c0_6 = arith.constant 0 : index
    %c0_7 = arith.constant 0 : index
    %8 = vector.load %arg7[%c0_6, %c0_7] : memref<128x128xf32, #tpu.memory_space<vmem>>, vector<128x128xf32>
    tpu.vector_store %arg7[%c0_6, %c0_7], %7 {strides = array<i32>} : memref<128x128xf32, #tpu.memory_space<vmem>>, vector<128x128xf32>,
    %c1_i32 = arith.constant 1 : i32
    %9 = arith.cmpi eq, %arg2, %c1_i32 : i32
    %10 = arith.extui %9 : i1 to i32
    %c0_i32_8 = arith.constant 0 : i32
    %11 = arith.cmpi ne, %10, %c0_i32_8 : i32
    scf.if %11 {
      %c0_9 = arith.constant 0 : index
      %c0_10 = arith.constant 0 : index
      %12 = vector.load %arg7[%c0_9, %c0_10] : memref<128x128xf32, #tpu.memory_space<vmem>>, vector<128x128xf32>
      %c0_11 = arith.constant 0 : index
      %c0_12 = arith.constant 0 : index
      %13 = vector.load %arg5[%c0_11, %c0_12] : memref<1x128xf32, #tpu.memory_space<vmem>>, vector<1x128xf32>
      %14 = vector.broadcast %13 : vector<1x128xf32> to vector<128x128xf32>
      %15 = arith.addf %12, %14 : vector<128x128xf32>
      %16 = arith.truncf %15 : vector<128x128xf32> to vector<128x128xbf16>
      %c0_13 = arith.constant 0 : index
      %c0_14 = arith.constant 0 : index
      %17 = vector.load %arg6[%c0_13, %c0_14] : memref<128x128xbf16, #tpu.memory_space<vmem>>, vector<128x128xbf16>
      tpu.vector_store %arg6[%c0_13, %c0_14], %16 {strides = array<i32>} : memref<128x128xbf16, #tpu.memory_space<vmem>>, vector<128x128xbf16>,
    } else {
    }
    return
  }
  func.func @transform_0(%arg0: i32, %arg1: i32, %arg2: i32) -> (i32, i32) {
    %c0_i32 = arith.constant 0 : i32
    return %arg0, %arg2 : i32, i32
  }
  func.func @transform_1(%arg0: i32, %arg1: i32, %arg2: i32) -> (i32, i32) {
    %c0_i32 = arith.constant 0 : i32
    return %arg2, %arg1 : i32, i32
  }
  func.func @transform_2(%arg0: i32, %arg1: i32, %arg2: i32) -> (i32, i32) {
    %c0_i32 = arith.constant 0 : i32
    %c0_i32_0 = arith.constant 0 : i32
    return %c0_i32, %arg1 : i32, i32
  }
  func.func @transform_3(%arg0: i32, %arg1: i32, %arg2: i32) -> (i32, i32) {
    %c0_i32 = arith.constant 0 : i32
    return %arg0, %arg1 : i32, i32
  }
}

module attributes {stable_mosaic.version = 11 : i64} {
  func.func @_in_leaky_kernel(%arg0: i32, %arg1: i32, %arg2: memref<1x64x128xbf16, #tpu.memory_space<vmem>>, %arg3: memref<1x64x128xbf16, #tpu.memory_space<vmem>>) attributes {dimension_semantics = [#tpu.dimension_semantics<parallel>, #tpu.dimension_semantics<parallel>], iteration_bounds = array<i64: 2, 1>, scalar_prefetch = 0 : i64, scratch_operands = 0 : i64, tpu.core_type = #tpu.core_type<tc>, window_params = [{transform_indices = @transform_0, window_bounds = array<i64: 1, 64, 128>}, {transform_indices = @transform_1, window_bounds = array<i64: 1, 64, 128>}]} {
    %c0 = arith.constant 0 : index
    %c0_0 = arith.constant 0 : index
    %c0_1 = arith.constant 0 : index
    %0 = vector.load %arg2[%c0, %c0_0, %c0_1] : memref<1x64x128xbf16, #tpu.memory_space<vmem>>, vector<1x64x128xbf16>
    %1 = arith.extf %0 : vector<1x64x128xbf16> to vector<1x64x128xf32>
    %cst = arith.constant dense<0.000000e+00> : vector<1x128xf32>
    %2 = vector.multi_reduction <add>, %1, %cst [1] : vector<1x64x128xf32> to vector<1x128xf32>
    %3 = vector.shape_cast %2 : vector<1x128xf32> to vector<1x1x128xf32>
    %cst_2 = arith.constant 6.400000e+01 : f32
    %4 = vector.broadcast %cst_2 : f32 to vector<1x1x128xf32>
    %5 = arith.divf %3, %4 : vector<1x1x128xf32>
    %6 = vector.broadcast %5 : vector<1x1x128xf32> to vector<1x64x128xf32>
    %7 = arith.subf %1, %6 : vector<1x64x128xf32>
    %8 = arith.mulf %7, %7 : vector<1x64x128xf32>
    %cst_3 = arith.constant dense<0.000000e+00> : vector<1x128xf32>
    %9 = vector.multi_reduction <add>, %8, %cst_3 [1] : vector<1x64x128xf32> to vector<1x128xf32>
    %10 = vector.shape_cast %9 : vector<1x128xf32> to vector<1x1x128xf32>
    %cst_4 = arith.constant 6.400000e+01 : f32
    %11 = vector.broadcast %cst_4 : f32 to vector<1x1x128xf32>
    %12 = arith.divf %10, %11 : vector<1x1x128xf32>
    %13 = vector.broadcast %5 : vector<1x1x128xf32> to vector<1x64x128xf32>
    %14 = arith.subf %1, %13 : vector<1x64x128xf32>
    %cst_5 = arith.constant 9.99999974E-6 : f32
    %15 = vector.broadcast %cst_5 : f32 to vector<1x1x128xf32>
    %16 = arith.addf %12, %15 : vector<1x1x128xf32>
    %17 = math.rsqrt %16 : vector<1x1x128xf32>
    %18 = vector.broadcast %17 : vector<1x1x128xf32> to vector<1x64x128xf32>
    %19 = arith.mulf %14, %18 : vector<1x64x128xf32>
    %cst_6 = arith.constant 0.000000e+00 : f32
    %20 = vector.broadcast %cst_6 : f32 to vector<1x64x128xf32>
    %21 = arith.cmpf ogt, %19, %20 : vector<1x64x128xf32>
    %cst_7 = arith.constant 2.000000e-01 : f32
    %22 = vector.broadcast %cst_7 : f32 to vector<1x64x128xf32>
    %23 = arith.mulf %22, %19 : vector<1x64x128xf32>
    %24 = arith.select %21, %19, %23 : vector<1x64x128xi1>, vector<1x64x128xf32>
    %25 = arith.truncf %24 : vector<1x64x128xf32> to vector<1x64x128xbf16>
    %c0_8 = arith.constant 0 : index
    %c0_9 = arith.constant 0 : index
    %c0_10 = arith.constant 0 : index
    %26 = vector.load %arg3[%c0_8, %c0_9, %c0_10] : memref<1x64x128xbf16, #tpu.memory_space<vmem>>, vector<1x64x128xbf16>
    tpu.vector_store %arg3[%c0_8, %c0_9, %c0_10], %25 {strides = array<i32>} : memref<1x64x128xbf16, #tpu.memory_space<vmem>>, vector<1x64x128xbf16>,
    return
  }
  func.func @transform_0(%arg0: i32, %arg1: i32) -> (i32, i32, i32) {
    %c0_i32 = arith.constant 0 : i32
    %c0_i32_0 = arith.constant 0 : i32
    return %arg0, %c0_i32, %arg1 : i32, i32, i32
  }
  func.func @transform_1(%arg0: i32, %arg1: i32) -> (i32, i32, i32) {
    %c0_i32 = arith.constant 0 : i32
    %c0_i32_0 = arith.constant 0 : i32
    return %arg0, %c0_i32, %arg1 : i32, i32, i32
  }
}

module attributes {stable_mosaic.version = 11 : i64} {
  func.func @_matmul_bias_act_kernel(%arg0: i32, %arg1: i32, %arg2: i32, %arg3: memref<32x512xbf16, #tpu.memory_space<vmem>>, %arg4: memref<512x256xbf16, #tpu.memory_space<vmem>>, %arg5: memref<1x256xf32, #tpu.memory_space<vmem>>, %arg6: memref<32x256xbf16, #tpu.memory_space<vmem>>, %arg7: memref<32x256xf32, #tpu.memory_space<vmem>>) attributes {dimension_semantics = [#tpu.dimension_semantics<parallel>, #tpu.dimension_semantics<parallel>, #tpu.dimension_semantics<arbitrary>], iteration_bounds = array<i64: 1, 1, 4>, scalar_prefetch = 0 : i64, scratch_operands = 1 : i64, tpu.core_type = #tpu.core_type<tc>, window_params = [{transform_indices = @transform_0, window_bounds = array<i64: 32, 512>}, {transform_indices = @transform_1, window_bounds = array<i64: 512, 256>}, {transform_indices = @transform_2, window_bounds = array<i64: 1, 256>}, {transform_indices = @transform_3, window_bounds = array<i64: 32, 256>}]} {
    %c0_i32 = arith.constant 0 : i32
    %0 = arith.cmpi eq, %arg2, %c0_i32 : i32
    %1 = arith.extui %0 : i1 to i32
    %c0_i32_0 = arith.constant 0 : i32
    %2 = arith.cmpi ne, %1, %c0_i32_0 : i32
    scf.if %2 {
      %cst_9 = arith.constant 0.000000e+00 : f32
      %12 = vector.broadcast %cst_9 : f32 to vector<32x256xf32>
      %c0_10 = arith.constant 0 : index
      %c0_11 = arith.constant 0 : index
      %13 = vector.load %arg7[%c0_10, %c0_11] : memref<32x256xf32, #tpu.memory_space<vmem>>, vector<32x256xf32>
      tpu.vector_store %arg7[%c0_10, %c0_11], %12 {strides = array<i32>} : memref<32x256xf32, #tpu.memory_space<vmem>>, vector<32x256xf32>,
    } else {
    }
    %c0 = arith.constant 0 : index
    %c0_1 = arith.constant 0 : index
    %3 = vector.load %arg7[%c0, %c0_1] : memref<32x256xf32, #tpu.memory_space<vmem>>, vector<32x256xf32>
    %c0_2 = arith.constant 0 : index
    %c0_3 = arith.constant 0 : index
    %4 = vector.load %arg3[%c0_2, %c0_3] : memref<32x512xbf16, #tpu.memory_space<vmem>>, vector<32x512xbf16>
    %c0_4 = arith.constant 0 : index
    %c0_5 = arith.constant 0 : index
    %5 = vector.load %arg4[%c0_4, %c0_5] : memref<512x256xbf16, #tpu.memory_space<vmem>>, vector<512x256xbf16>
    %cst = arith.constant dense<0.000000e+00> : vector<32x256xf32>
    %6 = tpu.matmul %4, %5, %cst {dimension_numbers = #tpu.dot_dimension_numbers<[1], [0], [0], [1], [0, 0, 1, 1], [], []>} : vector<32x512xbf16>, vector<512x256xbf16>, vector<32x256xf32> -> vector<32x256xf32>
    %7 = arith.addf %3, %6 : vector<32x256xf32>
    %c0_6 = arith.constant 0 : index
    %c0_7 = arith.constant 0 : index
    %8 = vector.load %arg7[%c0_6, %c0_7] : memref<32x256xf32, #tpu.memory_space<vmem>>, vector<32x256xf32>
    tpu.vector_store %arg7[%c0_6, %c0_7], %7 {strides = array<i32>} : memref<32x256xf32, #tpu.memory_space<vmem>>, vector<32x256xf32>,
    %c3_i32 = arith.constant 3 : i32
    %9 = arith.cmpi eq, %arg2, %c3_i32 : i32
    %10 = arith.extui %9 : i1 to i32
    %c0_i32_8 = arith.constant 0 : i32
    %11 = arith.cmpi ne, %10, %c0_i32_8 : i32
    scf.if %11 {
      %c0_9 = arith.constant 0 : index
      %c0_10 = arith.constant 0 : index
      %12 = vector.load %arg7[%c0_9, %c0_10] : memref<32x256xf32, #tpu.memory_space<vmem>>, vector<32x256xf32>
      %c0_11 = arith.constant 0 : index
      %c0_12 = arith.constant 0 : index
      %13 = vector.load %arg5[%c0_11, %c0_12] : memref<1x256xf32, #tpu.memory_space<vmem>>, vector<1x256xf32>
      %14 = vector.broadcast %13 : vector<1x256xf32> to vector<32x256xf32>
      %15 = arith.addf %12, %14 : vector<32x256xf32>
      %16 = arith.truncf %15 : vector<32x256xf32> to vector<32x256xbf16>
      %c0_13 = arith.constant 0 : index
      %c0_14 = arith.constant 0 : index
      %17 = vector.load %arg6[%c0_13, %c0_14] : memref<32x256xbf16, #tpu.memory_space<vmem>>, vector<32x256xbf16>
      tpu.vector_store %arg6[%c0_13, %c0_14], %16 {strides = array<i32>} : memref<32x256xbf16, #tpu.memory_space<vmem>>, vector<32x256xbf16>,
    } else {
    }
    return
  }
  func.func @transform_0(%arg0: i32, %arg1: i32, %arg2: i32) -> (i32, i32) {
    %c0_i32 = arith.constant 0 : i32
    return %arg0, %arg2 : i32, i32
  }
  func.func @transform_1(%arg0: i32, %arg1: i32, %arg2: i32) -> (i32, i32) {
    %c0_i32 = arith.constant 0 : i32
    return %arg2, %arg1 : i32, i32
  }
  func.func @transform_2(%arg0: i32, %arg1: i32, %arg2: i32) -> (i32, i32) {
    %c0_i32 = arith.constant 0 : i32
    %c0_i32_0 = arith.constant 0 : i32
    return %c0_i32, %arg1 : i32, i32
  }
  func.func @transform_3(%arg0: i32, %arg1: i32, %arg2: i32) -> (i32, i32) {
    %c0_i32 = arith.constant 0 : i32
    return %arg0, %arg1 : i32, i32
  }
}

module attributes {stable_mosaic.version = 11 : i64} {
  func.func @_in_leaky_kernel(%arg0: i32, %arg1: i32, %arg2: memref<1x16x128xbf16, #tpu.memory_space<vmem>>, %arg3: memref<1x16x128xbf16, #tpu.memory_space<vmem>>) attributes {dimension_semantics = [#tpu.dimension_semantics<parallel>, #tpu.dimension_semantics<parallel>], iteration_bounds = array<i64: 2, 2>, scalar_prefetch = 0 : i64, scratch_operands = 0 : i64, tpu.core_type = #tpu.core_type<tc>, window_params = [{transform_indices = @transform_0, window_bounds = array<i64: 1, 16, 128>}, {transform_indices = @transform_1, window_bounds = array<i64: 1, 16, 128>}]} {
    %c0 = arith.constant 0 : index
    %c0_0 = arith.constant 0 : index
    %c0_1 = arith.constant 0 : index
    %0 = vector.load %arg2[%c0, %c0_0, %c0_1] : memref<1x16x128xbf16, #tpu.memory_space<vmem>>, vector<1x16x128xbf16>
    %1 = arith.extf %0 : vector<1x16x128xbf16> to vector<1x16x128xf32>
    %cst = arith.constant dense<0.000000e+00> : vector<1x128xf32>
    %2 = vector.multi_reduction <add>, %1, %cst [1] : vector<1x16x128xf32> to vector<1x128xf32>
    %3 = vector.shape_cast %2 : vector<1x128xf32> to vector<1x1x128xf32>
    %cst_2 = arith.constant 1.600000e+01 : f32
    %4 = vector.broadcast %cst_2 : f32 to vector<1x1x128xf32>
    %5 = arith.divf %3, %4 : vector<1x1x128xf32>
    %6 = vector.broadcast %5 : vector<1x1x128xf32> to vector<1x16x128xf32>
    %7 = arith.subf %1, %6 : vector<1x16x128xf32>
    %8 = arith.mulf %7, %7 : vector<1x16x128xf32>
    %cst_3 = arith.constant dense<0.000000e+00> : vector<1x128xf32>
    %9 = vector.multi_reduction <add>, %8, %cst_3 [1] : vector<1x16x128xf32> to vector<1x128xf32>
    %10 = vector.shape_cast %9 : vector<1x128xf32> to vector<1x1x128xf32>
    %cst_4 = arith.constant 1.600000e+01 : f32
    %11 = vector.broadcast %cst_4 : f32 to vector<1x1x128xf32>
    %12 = arith.divf %10, %11 : vector<1x1x128xf32>
    %13 = vector.broadcast %5 : vector<1x1x128xf32> to vector<1x16x128xf32>
    %14 = arith.subf %1, %13 : vector<1x16x128xf32>
    %cst_5 = arith.constant 9.99999974E-6 : f32
    %15 = vector.broadcast %cst_5 : f32 to vector<1x1x128xf32>
    %16 = arith.addf %12, %15 : vector<1x1x128xf32>
    %17 = math.rsqrt %16 : vector<1x1x128xf32>
    %18 = vector.broadcast %17 : vector<1x1x128xf32> to vector<1x16x128xf32>
    %19 = arith.mulf %14, %18 : vector<1x16x128xf32>
    %cst_6 = arith.constant 0.000000e+00 : f32
    %20 = vector.broadcast %cst_6 : f32 to vector<1x16x128xf32>
    %21 = arith.cmpf ogt, %19, %20 : vector<1x16x128xf32>
    %cst_7 = arith.constant 2.000000e-01 : f32
    %22 = vector.broadcast %cst_7 : f32 to vector<1x16x128xf32>
    %23 = arith.mulf %22, %19 : vector<1x16x128xf32>
    %24 = arith.select %21, %19, %23 : vector<1x16x128xi1>, vector<1x16x128xf32>
    %25 = arith.truncf %24 : vector<1x16x128xf32> to vector<1x16x128xbf16>
    %c0_8 = arith.constant 0 : index
    %c0_9 = arith.constant 0 : index
    %c0_10 = arith.constant 0 : index
    %26 = vector.load %arg3[%c0_8, %c0_9, %c0_10] : memref<1x16x128xbf16, #tpu.memory_space<vmem>>, vector<1x16x128xbf16>
    tpu.vector_store %arg3[%c0_8, %c0_9, %c0_10], %25 {strides = array<i32>} : memref<1x16x128xbf16, #tpu.memory_space<vmem>>, vector<1x16x128xbf16>,
    return
  }
  func.func @transform_0(%arg0: i32, %arg1: i32) -> (i32, i32, i32) {
    %c0_i32 = arith.constant 0 : i32
    %c0_i32_0 = arith.constant 0 : i32
    return %arg0, %c0_i32, %arg1 : i32, i32, i32
  }
  func.func @transform_1(%arg0: i32, %arg1: i32) -> (i32, i32, i32) {
    %c0_i32 = arith.constant 0 : i32
    %c0_i32_0 = arith.constant 0 : i32
    return %arg0, %c0_i32, %arg1 : i32, i32, i32
  }
}

module attributes {stable_mosaic.version = 11 : i64} {
  func.func @_in_leaky_kernel(%arg0: i32, %arg1: i32, %arg2: memref<1x9x128xbf16, #tpu.memory_space<vmem>>, %arg3: memref<1x9x128xbf16, #tpu.memory_space<vmem>>) attributes {dimension_semantics = [#tpu.dimension_semantics<parallel>, #tpu.dimension_semantics<parallel>], iteration_bounds = array<i64: 2, 4>, scalar_prefetch = 0 : i64, scratch_operands = 0 : i64, tpu.core_type = #tpu.core_type<tc>, window_params = [{transform_indices = @transform_0, window_bounds = array<i64: 1, 9, 128>}, {transform_indices = @transform_1, window_bounds = array<i64: 1, 9, 128>}]} {
    %c0 = arith.constant 0 : index
    %c0_0 = arith.constant 0 : index
    %c0_1 = arith.constant 0 : index
    %0 = vector.load %arg2[%c0, %c0_0, %c0_1] : memref<1x9x128xbf16, #tpu.memory_space<vmem>>, vector<1x9x128xbf16>
    %1 = arith.extf %0 : vector<1x9x128xbf16> to vector<1x9x128xf32>
    %cst = arith.constant dense<0.000000e+00> : vector<1x128xf32>
    %2 = vector.multi_reduction <add>, %1, %cst [1] : vector<1x9x128xf32> to vector<1x128xf32>
    %3 = vector.shape_cast %2 : vector<1x128xf32> to vector<1x1x128xf32>
    %cst_2 = arith.constant 9.000000e+00 : f32
    %4 = vector.broadcast %cst_2 : f32 to vector<1x1x128xf32>
    %5 = arith.divf %3, %4 : vector<1x1x128xf32>
    %6 = vector.broadcast %5 : vector<1x1x128xf32> to vector<1x9x128xf32>
    %7 = arith.subf %1, %6 : vector<1x9x128xf32>
    %8 = arith.mulf %7, %7 : vector<1x9x128xf32>
    %cst_3 = arith.constant dense<0.000000e+00> : vector<1x128xf32>
    %9 = vector.multi_reduction <add>, %8, %cst_3 [1] : vector<1x9x128xf32> to vector<1x128xf32>
    %10 = vector.shape_cast %9 : vector<1x128xf32> to vector<1x1x128xf32>
    %cst_4 = arith.constant 9.000000e+00 : f32
    %11 = vector.broadcast %cst_4 : f32 to vector<1x1x128xf32>
    %12 = arith.divf %10, %11 : vector<1x1x128xf32>
    %13 = vector.broadcast %5 : vector<1x1x128xf32> to vector<1x9x128xf32>
    %14 = arith.subf %1, %13 : vector<1x9x128xf32>
    %cst_5 = arith.constant 9.99999974E-6 : f32
    %15 = vector.broadcast %cst_5 : f32 to vector<1x1x128xf32>
    %16 = arith.addf %12, %15 : vector<1x1x128xf32>
    %17 = math.rsqrt %16 : vector<1x1x128xf32>
    %18 = vector.broadcast %17 : vector<1x1x128xf32> to vector<1x9x128xf32>
    %19 = arith.mulf %14, %18 : vector<1x9x128xf32>
    %cst_6 = arith.constant 0.000000e+00 : f32
    %20 = vector.broadcast %cst_6 : f32 to vector<1x9x128xf32>
    %21 = arith.cmpf ogt, %19, %20 : vector<1x9x128xf32>
    %cst_7 = arith.constant 2.000000e-01 : f32
    %22 = vector.broadcast %cst_7 : f32 to vector<1x9x128xf32>
    %23 = arith.mulf %22, %19 : vector<1x9x128xf32>
    %24 = arith.select %21, %19, %23 : vector<1x9x128xi1>, vector<1x9x128xf32>
    %25 = arith.truncf %24 : vector<1x9x128xf32> to vector<1x9x128xbf16>
    %c0_8 = arith.constant 0 : index
    %c0_9 = arith.constant 0 : index
    %c0_10 = arith.constant 0 : index
    %26 = vector.load %arg3[%c0_8, %c0_9, %c0_10] : memref<1x9x128xbf16, #tpu.memory_space<vmem>>, vector<1x9x128xbf16>
    tpu.vector_store %arg3[%c0_8, %c0_9, %c0_10], %25 {strides = array<i32>} : memref<1x9x128xbf16, #tpu.memory_space<vmem>>, vector<1x9x128xbf16>,
    return
  }
  func.func @transform_0(%arg0: i32, %arg1: i32) -> (i32, i32, i32) {
    %c0_i32 = arith.constant 0 : i32
    %c0_i32_0 = arith.constant 0 : i32
    return %arg0, %c0_i32, %arg1 : i32, i32, i32
  }
  func.func @transform_1(%arg0: i32, %arg1: i32) -> (i32, i32, i32) {
    %c0_i32 = arith.constant 0 : i32
    %c0_i32_0 = arith.constant 0 : i32
    return %arg0, %c0_i32, %arg1 : i32, i32, i32
  }
}

module attributes {stable_mosaic.version = 11 : i64} {
  func.func @_matmul_bias_act_kernel(%arg0: i32, %arg1: i32, %arg2: i32, %arg3: memref<24x512xbf16, #tpu.memory_space<vmem>>, %arg4: memref<512x256xbf16, #tpu.memory_space<vmem>>, %arg5: memref<1x256xf32, #tpu.memory_space<vmem>>, %arg6: memref<24x256xbf16, #tpu.memory_space<vmem>>, %arg7: memref<24x256xf32, #tpu.memory_space<vmem>>) attributes {dimension_semantics = [#tpu.dimension_semantics<parallel>, #tpu.dimension_semantics<parallel>, #tpu.dimension_semantics<arbitrary>], iteration_bounds = array<i64: 1, 2, 8>, scalar_prefetch = 0 : i64, scratch_operands = 1 : i64, tpu.core_type = #tpu.core_type<tc>, window_params = [{transform_indices = @transform_0, window_bounds = array<i64: 24, 512>}, {transform_indices = @transform_1, window_bounds = array<i64: 512, 256>}, {transform_indices = @transform_2, window_bounds = array<i64: 1, 256>}, {transform_indices = @transform_3, window_bounds = array<i64: 24, 256>}]} {
    %c0_i32 = arith.constant 0 : i32
    %0 = arith.cmpi eq, %arg2, %c0_i32 : i32
    %1 = arith.extui %0 : i1 to i32
    %c0_i32_0 = arith.constant 0 : i32
    %2 = arith.cmpi ne, %1, %c0_i32_0 : i32
    scf.if %2 {
      %cst_9 = arith.constant 0.000000e+00 : f32
      %12 = vector.broadcast %cst_9 : f32 to vector<24x256xf32>
      %c0_10 = arith.constant 0 : index
      %c0_11 = arith.constant 0 : index
      %13 = vector.load %arg7[%c0_10, %c0_11] : memref<24x256xf32, #tpu.memory_space<vmem>>, vector<24x256xf32>
      tpu.vector_store %arg7[%c0_10, %c0_11], %12 {strides = array<i32>} : memref<24x256xf32, #tpu.memory_space<vmem>>, vector<24x256xf32>,
    } else {
    }
    %c0 = arith.constant 0 : index
    %c0_1 = arith.constant 0 : index
    %3 = vector.load %arg7[%c0, %c0_1] : memref<24x256xf32, #tpu.memory_space<vmem>>, vector<24x256xf32>
    %c0_2 = arith.constant 0 : index
    %c0_3 = arith.constant 0 : index
    %4 = vector.load %arg3[%c0_2, %c0_3] : memref<24x512xbf16, #tpu.memory_space<vmem>>, vector<24x512xbf16>
    %c0_4 = arith.constant 0 : index
    %c0_5 = arith.constant 0 : index
    %5 = vector.load %arg4[%c0_4, %c0_5] : memref<512x256xbf16, #tpu.memory_space<vmem>>, vector<512x256xbf16>
    %cst = arith.constant dense<0.000000e+00> : vector<24x256xf32>
    %6 = tpu.matmul %4, %5, %cst {dimension_numbers = #tpu.dot_dimension_numbers<[1], [0], [0], [1], [0, 0, 1, 1], [], []>} : vector<24x512xbf16>, vector<512x256xbf16>, vector<24x256xf32> -> vector<24x256xf32>
    %7 = arith.addf %3, %6 : vector<24x256xf32>
    %c0_6 = arith.constant 0 : index
    %c0_7 = arith.constant 0 : index
    %8 = vector.load %arg7[%c0_6, %c0_7] : memref<24x256xf32, #tpu.memory_space<vmem>>, vector<24x256xf32>
    tpu.vector_store %arg7[%c0_6, %c0_7], %7 {strides = array<i32>} : memref<24x256xf32, #tpu.memory_space<vmem>>, vector<24x256xf32>,
    %c7_i32 = arith.constant 7 : i32
    %9 = arith.cmpi eq, %arg2, %c7_i32 : i32
    %10 = arith.extui %9 : i1 to i32
    %c0_i32_8 = arith.constant 0 : i32
    %11 = arith.cmpi ne, %10, %c0_i32_8 : i32
    scf.if %11 {
      %c0_9 = arith.constant 0 : index
      %c0_10 = arith.constant 0 : index
      %12 = vector.load %arg7[%c0_9, %c0_10] : memref<24x256xf32, #tpu.memory_space<vmem>>, vector<24x256xf32>
      %c0_11 = arith.constant 0 : index
      %c0_12 = arith.constant 0 : index
      %13 = vector.load %arg5[%c0_11, %c0_12] : memref<1x256xf32, #tpu.memory_space<vmem>>, vector<1x256xf32>
      %14 = vector.broadcast %13 : vector<1x256xf32> to vector<24x256xf32>
      %15 = arith.addf %12, %14 : vector<24x256xf32>
      %16 = arith.truncf %15 : vector<24x256xf32> to vector<24x256xbf16>
      %c0_13 = arith.constant 0 : index
      %c0_14 = arith.constant 0 : index
      %17 = vector.load %arg6[%c0_13, %c0_14] : memref<24x256xbf16, #tpu.memory_space<vmem>>, vector<24x256xbf16>
      tpu.vector_store %arg6[%c0_13, %c0_14], %16 {strides = array<i32>} : memref<24x256xbf16, #tpu.memory_space<vmem>>, vector<24x256xbf16>,
    } else {
    }
    return
  }
  func.func @transform_0(%arg0: i32, %arg1: i32, %arg2: i32) -> (i32, i32) {
    %c0_i32 = arith.constant 0 : i32
    return %arg0, %arg2 : i32, i32
  }
  func.func @transform_1(%arg0: i32, %arg1: i32, %arg2: i32) -> (i32, i32) {
    %c0_i32 = arith.constant 0 : i32
    return %arg2, %arg1 : i32, i32
  }
  func.func @transform_2(%arg0: i32, %arg1: i32, %arg2: i32) -> (i32, i32) {
    %c0_i32 = arith.constant 0 : i32
    %c0_i32_0 = arith.constant 0 : i32
    return %c0_i32, %arg1 : i32, i32
  }
  func.func @transform_3(%arg0: i32, %arg1: i32, %arg2: i32) -> (i32, i32) {
    %c0_i32 = arith.constant 0 : i32
    return %arg0, %arg1 : i32, i32
  }
}

module attributes {stable_mosaic.version = 11 : i64} {
  func.func @_matmul_bias_act_kernel(%arg0: i32, %arg1: i32, %arg2: i32, %arg3: memref<8x512xbf16, #tpu.memory_space<vmem>>, %arg4: memref<512x128xbf16, #tpu.memory_space<vmem>>, %arg5: memref<1x128xf32, #tpu.memory_space<vmem>>, %arg6: memref<8x128xf32, #tpu.memory_space<vmem>>, %arg7: memref<8x128xf32, #tpu.memory_space<vmem>>) attributes {dimension_semantics = [#tpu.dimension_semantics<parallel>, #tpu.dimension_semantics<parallel>, #tpu.dimension_semantics<arbitrary>], iteration_bounds = array<i64: 1, 1, 16>, scalar_prefetch = 0 : i64, scratch_operands = 1 : i64, tpu.core_type = #tpu.core_type<tc>, window_params = [{transform_indices = @transform_0, window_bounds = array<i64: 8, 512>}, {transform_indices = @transform_1, window_bounds = array<i64: 512, 128>}, {transform_indices = @transform_2, window_bounds = array<i64: 1, 128>}, {transform_indices = @transform_3, window_bounds = array<i64: 8, 128>}]} {
    %c0_i32 = arith.constant 0 : i32
    %0 = arith.cmpi eq, %arg2, %c0_i32 : i32
    %1 = arith.extui %0 : i1 to i32
    %c0_i32_0 = arith.constant 0 : i32
    %2 = arith.cmpi ne, %1, %c0_i32_0 : i32
    scf.if %2 {
      %cst_9 = arith.constant 0.000000e+00 : f32
      %12 = vector.broadcast %cst_9 : f32 to vector<8x128xf32>
      %c0_10 = arith.constant 0 : index
      %c0_11 = arith.constant 0 : index
      %13 = vector.load %arg7[%c0_10, %c0_11] : memref<8x128xf32, #tpu.memory_space<vmem>>, vector<8x128xf32>
      tpu.vector_store %arg7[%c0_10, %c0_11], %12 {strides = array<i32>} : memref<8x128xf32, #tpu.memory_space<vmem>>, vector<8x128xf32>,
    } else {
    }
    %c0 = arith.constant 0 : index
    %c0_1 = arith.constant 0 : index
    %3 = vector.load %arg7[%c0, %c0_1] : memref<8x128xf32, #tpu.memory_space<vmem>>, vector<8x128xf32>
    %c0_2 = arith.constant 0 : index
    %c0_3 = arith.constant 0 : index
    %4 = vector.load %arg3[%c0_2, %c0_3] : memref<8x512xbf16, #tpu.memory_space<vmem>>, vector<8x512xbf16>
    %c0_4 = arith.constant 0 : index
    %c0_5 = arith.constant 0 : index
    %5 = vector.load %arg4[%c0_4, %c0_5] : memref<512x128xbf16, #tpu.memory_space<vmem>>, vector<512x128xbf16>
    %cst = arith.constant dense<0.000000e+00> : vector<8x128xf32>
    %6 = tpu.matmul %4, %5, %cst {dimension_numbers = #tpu.dot_dimension_numbers<[1], [0], [0], [1], [0, 0, 1, 1], [], []>} : vector<8x512xbf16>, vector<512x128xbf16>, vector<8x128xf32> -> vector<8x128xf32>
    %7 = arith.addf %3, %6 : vector<8x128xf32>
    %c0_6 = arith.constant 0 : index
    %c0_7 = arith.constant 0 : index
    %8 = vector.load %arg7[%c0_6, %c0_7] : memref<8x128xf32, #tpu.memory_space<vmem>>, vector<8x128xf32>
    tpu.vector_store %arg7[%c0_6, %c0_7], %7 {strides = array<i32>} : memref<8x128xf32, #tpu.memory_space<vmem>>, vector<8x128xf32>,
    %c15_i32 = arith.constant 15 : i32
    %9 = arith.cmpi eq, %arg2, %c15_i32 : i32
    %10 = arith.extui %9 : i1 to i32
    %c0_i32_8 = arith.constant 0 : i32
    %11 = arith.cmpi ne, %10, %c0_i32_8 : i32
    scf.if %11 {
      %c0_9 = arith.constant 0 : index
      %c0_10 = arith.constant 0 : index
      %12 = vector.load %arg7[%c0_9, %c0_10] : memref<8x128xf32, #tpu.memory_space<vmem>>, vector<8x128xf32>
      %c0_11 = arith.constant 0 : index
      %c0_12 = arith.constant 0 : index
      %13 = vector.load %arg5[%c0_11, %c0_12] : memref<1x128xf32, #tpu.memory_space<vmem>>, vector<1x128xf32>
      %14 = vector.broadcast %13 : vector<1x128xf32> to vector<8x128xf32>
      %15 = arith.addf %12, %14 : vector<8x128xf32>
      %c0_13 = arith.constant 0 : index
      %c0_14 = arith.constant 0 : index
      %16 = vector.load %arg6[%c0_13, %c0_14] : memref<8x128xf32, #tpu.memory_space<vmem>>, vector<8x128xf32>
      tpu.vector_store %arg6[%c0_13, %c0_14], %15 {strides = array<i32>} : memref<8x128xf32, #tpu.memory_space<vmem>>, vector<8x128xf32>,
    } else {
    }
    return
  }
  func.func @transform_0(%arg0: i32, %arg1: i32, %arg2: i32) -> (i32, i32) {
    %c0_i32 = arith.constant 0 : i32
    return %arg0, %arg2 : i32, i32
  }
  func.func @transform_1(%arg0: i32, %arg1: i32, %arg2: i32) -> (i32, i32) {
    %c0_i32 = arith.constant 0 : i32
    return %arg2, %arg1 : i32, i32
  }
  func.func @transform_2(%arg0: i32, %arg1: i32, %arg2: i32) -> (i32, i32) {
    %c0_i32 = arith.constant 0 : i32
    %c0_i32_0 = arith.constant 0 : i32
    return %c0_i32, %arg1 : i32, i32
  }
  func.func @transform_3(%arg0: i32, %arg1: i32, %arg2: i32) -> (i32, i32) {
    %c0_i32 = arith.constant 0 : i32
    return %arg0, %arg1 : i32, i32
  }
}

</mosaic_0001>

<bundles_post_ra>
// kernel: discriminator_forward.8
= control target key start
LH: loop header
LB: loop body
LE: loop exit
PB: predicated region body
PF: predicated region fallthrough
CT: control target
= control target key end

     0   :  { %8 = vsyncpa [#allocation4], 0  ;;  %s1582_s0 = inlined_call_operand.vmem [shape: bf16[512,48], index: 0, kind: input, shape index: {}]   ;;  %s1583_s1 = inlined_call_operand.hbm [shape: bf16[48,64], index: 1, kind: input, shape index: {}]   ;;  %s1584_s2 = inlined_call_operand.hbm [shape: f32[1,64], index: 2, kind: input, shape index: {}]   ;;  %s1585_s3 = inlined_call_operand.vmem [shape: bf16[512,64], index: 3, kind: output, shape index: {}]  }
   0x1   :  { %9 = vsyncpa [#allocation6], 0  ;;  %s1312_s12 = smov 0   ;;  %s1314_s13 = smov 0  }
   0x2   :  { %s1316_s14 = smov 0  }
   0x3 LB: > { %s1011_s15 = sadd.s32 4294967295, %s1285_s14   ;;  %s34_s16 = sadd.s32 1, %s1281_s13  ;;  %s1285_s14 = sphi %s1316_s14, %s15_s14   ;;  %s1281_s13 = sphi %s1314_s13, %s1589_s13   ;;  %s1277_s12 = sphi %s1312_s12, %s1588_s12  }
   0x4   : > { %p36_p0 = scmp.ge.s32.totalorder %s34_s16, 2  ;;  %p1013_p1 = scmp.ge.s32.totalorder %s1285_s14, 1 }
   0x5   : > { %p149_p2 = scmp.lt.s32.totalorder %s1285_s14, 3  ;;  %p1337_p4 = scmp.eq.s32.totalorder %s1011_s15, 0 }
   0x6   : > { %s1591_s16 = smov (%p36_p0, %s34_s16), 0  ;;  %s164_s21 = sshll.u32 %s1583_s1, 4  ;;  %s165_s21 = int_to_ptr.hbm [resolvable:$true] %s164_s21 }
   0x7   : > { %p1333_p3 = pnand %p1013_p1, %p149_p2  ;;  %s1287_s22 = smov [#allocation3]  }
   0x8   : > { %s166_s23 = sshll.u32 %s1287_s22, 4  ;;  %s180_s26 = sshll.u32 %s1584_s2, 4  ;;  %s167_s23 = int_to_ptr.vmem [resolvable:$true] %s166_s23  ;;  %s181_s26 = int_to_ptr.hbm [resolvable:$true] %s180_s26 }
   0x9   : > { %p1154_p5 = pneg %p1333_p3  ;;  %s1288_s27 = smov 64  }
   0xa   : > { %s1289_s28 = smov 4   ;;  %s1290_s29 = smov [#allocation5]  }
   0xb   : > { %p1155_p6 = pnand %p1337_p4, %p1154_p5  ;;  %s182_s30 = sshll.u32 %s1290_s29, 4  ;;  %s183_s30 = int_to_ptr.vmem [resolvable:$true] %s182_s30 }
   0xc   : > { %207 = sbr.rel (%p1333_p3) target bundleno = 243 (0xf3), region = 32 }
   0xd   : > { %1157 = dma.hbm_to_vmem [thread:$0]  (!%p1155_p6), %s165_s21, 384, %s167_s23, [#allocation4], %s1288_s27, %s1288_s27, %s1289_s28  }
   0xe   : > { %1160 = dma.hbm_to_vmem [thread:$0]  (!%p1155_p6), %s181_s26, 16, %s183_s30, [#allocation6]  }
  0x11   : > { %1268 = dma.done.wait (%p1337_p4), [#allocation4], 384  }
  0x12   : > { %1270 = vsyncadd (%p1337_p4), [#allocation4], 4294966912 }
  0x13   : > { %1272 = dma.done.wait (%p1337_p4), [#allocation6], 16  }
  0x14   : > { %1274 = vsyncadd (%p1337_p4), [#allocation6], 4294967280  ;;  %s1020_s4 = sshll.u32 %s1277_s12, 5  ;;  %v1136_v0 = vld [vmem:[#allocation3 + $0x10] sm:$0xff]  ;;  %v1135_v1 = vld [vmem:[#allocation3 + $0x8] sm:$0xff]  ;;  %vm468_vm0 = vcmask 392192  }
  0x15   : > { %p244_p7 = scmp.lt.s32.totalorder %s1020_s4, 63  ;;  %522 = vmatpush.bf16.msra.mxu0 %v1136_v0  ;;  %1137 = vmatpush.bf16.msra.mxu1 %v1136_v0  ;;  %v1134_v2 = vld [vmem:[#allocation3] sm:$0xff]  ;;  %vm267_vm1 = vcmask 523264   ;;  %v1291_v11 = vmov 0.0   ;;  %v1438_v30 = vld [vmem:[#allocation5] ss:$0 sm:$0xff] }
  0x16   : > { %1138 = vmatpush.bf16.msra.mxu2 %v1136_v0  ;;  %1139 = vmatpush.bf16.msra.mxu3 %v1136_v0  ;;  %268 = vst.msk [vmem:[#allocation2] sm:$0xff] %vm267_vm1, %v1291_v11  ;;  %vm870_vm4 = vcmask 519168  }
  0x17   : > { %s1593_s4 = smov (!%p244_p7, %s1020_s4), 63  ;;  %269 = vst.msk [vmem:[#allocation2 + $0x8] sm:$0xff] %vm267_vm1, %v1291_v11 }
  0x18   : > { %s1021_s5 = sshll.u32 %s1593_s4, 2  ;;  %270 = vst.msk [vmem:[#allocation2 + $0x10] sm:$0xff] %vm267_vm1, %v1291_v11 }
  0x19   : > { %523 = vmatpush.bf16.msra.mxu0 %v1135_v1  ;;  %1140 = vmatpush.bf16.msra.mxu1 %v1135_v1  ;;  %s1370_s8 = scalar_lea.vmem %s1582_s0, %s1021_s5  ;;  %271 = vst.msk [vmem:[#allocation2 + $0x18] sm:$0xff] %vm267_vm1, %v1291_v11  ;;  %s1451_s11 = scalar_lea.vmem %s1585_s3, %s1021_s5 }
  0x1a   : > { %1141 = vmatpush.bf16.msra.mxu2 %v1135_v1  ;;  %1142 = vmatpush.bf16.msra.mxu3 %v1135_v1  ;;  %v1118_v3 = vld [vmem:[%s1370_s8] sm:$0xff]  ;;  %v1119_v7 = vld [vmem:[%s1370_s8 + $0x8] sm:$0xff]  ;;  %272 = vst.msk [vmem:[#allocation2 + $0x20] sm:$0xff] %vm267_vm1, %v1291_v11  ;;  %v1120_v12 = vld [vmem:[%s1370_s8 + $0x10] sm:$0xff] }
  0x1b   : > { %v1122_v4 = vld [vmem:[%s1370_s8 + $0x20] sm:$0xff]  ;;  %v1123_v8 = vld [vmem:[%s1370_s8 + $0x28] sm:$0xff]  ;;  %273 = vst.msk [vmem:[#allocation2 + $0x28] sm:$0xff] %vm267_vm1, %v1291_v11  ;;  %v1124_v13 = vld [vmem:[%s1370_s8 + $0x30] sm:$0xff] }
  0x1c   : > { %v1126_v5 = vld [vmem:[%s1370_s8 + $0x40] sm:$0xff]  ;;  %v1127_v9 = vld [vmem:[%s1370_s8 + $0x48] sm:$0xff]  ;;  %274 = vst.msk [vmem:[#allocation2 + $0x30] sm:$0xff] %vm267_vm1, %v1291_v11  ;;  %v1128_v14 = vld [vmem:[%s1370_s8 + $0x50] sm:$0xff] }
  0x1d   : > { %524 = vmatpush.bf16.msra.mxu0 %v1134_v2  ;;  %1143 = vmatpush.bf16.msra.mxu1 %v1134_v2  ;;  %v1130_v6 = vld [vmem:[%s1370_s8 + $0x60] sm:$0xff]  ;;  %v1131_v10 = vld [vmem:[%s1370_s8 + $0x68] sm:$0xff]  ;;  %275 = vst.msk [vmem:[#allocation2 + $0x38] sm:$0xff] %vm267_vm1, %v1291_v11  ;;  %v1132_v15 = vld [vmem:[%s1370_s8 + $0x70] sm:$0xff] }
  0x1e   : > { %1144 = vmatpush.bf16.msra.mxu2 %v1134_v2  ;;  %1145 = vmatpush.bf16.msra.mxu3 %v1134_v2  ;;  %276 = vst.msk [vmem:[#allocation2 + $0x40] sm:$0xff] %vm267_vm1, %v1291_v11  ;;  %v1121_v16 = vld [vmem:[%s1370_s8 + $0x18] sm:$0xff]  ;;  %v300_v20 = vld [vmem:[#allocation2] sm:$0xff]  ;;  %v301_v28 = vld [vmem:[#allocation2 + $0x8] sm:$0xff] }
  0x1f   : > { %277 = vst.msk [vmem:[#allocation2 + $0x48] sm:$0xff] %vm267_vm1, %v1291_v11  ;;  %v1125_v17 = vld [vmem:[%s1370_s8 + $0x38] sm:$0xff]  ;;  %v302_v50 = vld [vmem:[#allocation2 + $0x10] sm:$0xff] }
  0x20   : > { %1100 = vmatmul.msk.bf16.vlgmr.msra.gmra.mxu0 %vm468_vm0, %v1118_v3  ;;  %1104 = vmatmul.msk.bf16.vlgmr.msra.gmra.mxu1 %vm468_vm0, %v1122_v4  ;;  %278 = vst.msk [vmem:[#allocation2 + $0x50] sm:$0xff] %vm267_vm1, %v1291_v11  ;;  %v1129_v18 = vld [vmem:[%s1370_s8 + $0x58] sm:$0xff] }
  0x21   : > { %1108 = vmatmul.msk.bf16.vlgmr.msra.gmra.mxu2 %vm468_vm0, %v1126_v5  ;;  %1112 = vmatmul.msk.bf16.vlgmr.msra.gmra.mxu3 %vm468_vm0, %v1130_v6  ;;  %279 = vst.msk [vmem:[#allocation2 + $0x58] sm:$0xff] %vm267_vm1, %v1291_v11  ;;  %v1133_v19 = vld [vmem:[%s1370_s8 + $0x78] sm:$0xff] }
  0x22   : > { %280 = vst.msk [vmem:[#allocation2 + $0x60] sm:$0xff] %vm267_vm1, %v1291_v11 }
  0x23   : > { %281 = vst.msk [vmem:[#allocation2 + $0x68] sm:$0xff] %vm267_vm1, %v1291_v11 }
  0x24   : > { %282 = vst.msk [vmem:[#allocation2 + $0x70] sm:$0xff] %vm267_vm1, %v1291_v11 }
  0x25   : > { %283 = vst.msk [vmem:[#allocation2 + $0x78] sm:$0xff] %vm267_vm1, %v1291_v11  ;;  %v308_v21 = vld [vmem:[#allocation2 + $0x40] sm:$0xff] }
  0x26   : > { %284 = vst.msk [vmem:[#allocation2 + $0x80] sm:$0xff] %vm267_vm1, %v1291_v11  ;;  %v309_v29 = vld [vmem:[#allocation2 + $0x48] sm:$0xff] }
  0x27   : > { %285 = vst.msk [vmem:[#allocation2 + $0x88] sm:$0xff] %vm267_vm1, %v1291_v11  ;;  %v310_v55 = vld [vmem:[#allocation2 + $0x50] sm:$0xff] }
  0x28   : > { %286 = vst.msk [vmem:[#allocation2 + $0x90] sm:$0xff] %vm267_vm1, %v1291_v11 }
  0x29   : > { %287 = vst.msk [vmem:[#allocation2 + $0x98] sm:$0xff] %vm267_vm1, %v1291_v11 }
  0x2a   : > { %288 = vst.msk [vmem:[#allocation2 + $0xa0] sm:$0xff] %vm267_vm1, %v1291_v11 }
  0x2b   : > { %289 = vst.msk [vmem:[#allocation2 + $0xa8] sm:$0xff] %vm267_vm1, %v1291_v11 }
  0x2c   : > { %290 = vst.msk [vmem:[#allocation2 + $0xb0] sm:$0xff] %vm267_vm1, %v1291_v11 }
  0x2d   : > { %291 = vst.msk [vmem:[#allocation2 + $0xb8] sm:$0xff] %vm267_vm1, %v1291_v11  ;;  %v316_v26 = vld [vmem:[#allocation2 + $0x80] sm:$0xff] }
  0x2e   : > { %292 = vst.msk [vmem:[#allocation2 + $0xc0] sm:$0xff] %vm267_vm1, %v1291_v11  ;;  %v317_v44 = vld [vmem:[#allocation2 + $0x88] sm:$0xff] }
  0x2f   : > { %293 = vst.msk [vmem:[#allocation2 + $0xc8] sm:$0xff] %vm267_vm1, %v1291_v11 }
  0x30   : > { %1101 = vmatmul.msk.bf16.gmra.mxu0 %vm468_vm0, %v1119_v7  ;;  %1105 = vmatmul.msk.bf16.gmra.mxu1 %vm468_vm0, %v1123_v8  ;;  %294 = vst.msk [vmem:[#allocation2 + $0xd0] sm:$0xff] %vm267_vm1, %v1291_v11 }
  0x31   : > { %1109 = vmatmul.msk.bf16.gmra.mxu2 %vm468_vm0, %v1127_v9  ;;  %1113 = vmatmul.msk.bf16.gmra.mxu3 %vm468_vm0, %v1131_v10  ;;  %295 = vst.msk [vmem:[#allocation2 + $0xd8] sm:$0xff] %vm267_vm1, %v1291_v11  ;;  %v318_v9 = vld [vmem:[#allocation2 + $0x90] sm:$0xff] }
  0x32   : > { %296 = vst.msk [vmem:[#allocation2 + $0xe0] sm:$0xff] %vm267_vm1, %v1291_v11 }
  0x33   : > { %297 = vst.msk [vmem:[#allocation2 + $0xe8] sm:$0xff] %vm267_vm1, %v1291_v11 }
  0x34   : > { %298 = vst.msk [vmem:[#allocation2 + $0xf0] sm:$0xff] %vm267_vm1, %v1291_v11 }
  0x35   : > { %299 = vst.msk [vmem:[#allocation2 + $0xf8] sm:$0xff] %vm267_vm1, %v1291_v11  ;;  %v324_v27 = vld [vmem:[#allocation2 + $0xc0] sm:$0xff] }
  0x36   : > { %v325_v46 = vld [vmem:[#allocation2 + $0xc8] sm:$0xff] }
  0x40   : > { %1102 = vmatmul.msk.bf16.gmra.mxu0 %vm468_vm0, %v1120_v12  ;;  %1106 = vmatmul.msk.bf16.gmra.mxu1 %vm468_vm0, %v1124_v13 }
  0x41   : > { %1110 = vmatmul.msk.bf16.gmra.mxu2 %vm468_vm0, %v1128_v14  ;;  %1114 = vmatmul.msk.bf16.gmra.mxu3 %vm468_vm0, %v1132_v15  ;;  %v326_v14 = vld [vmem:[#allocation2 + $0xd0] sm:$0xff] }
  0x50   : > { %1103 = vmatmul.msk.bf16.gmra.mxu0 %vm468_vm0, %v1121_v16  ;;  %1107 = vmatmul.msk.bf16.gmra.mxu1 %vm468_vm0, %v1125_v17 }
  0x51   : > { %1111 = vmatmul.msk.bf16.gmra.mxu2 %vm468_vm0, %v1129_v18  ;;  %1115 = vmatmul.msk.bf16.gmra.mxu3 %vm468_vm0, %v1133_v19  ;;  %v303_v18 = vld [vmem:[#allocation2 + $0x18] sm:$0xff] }
  0x9d   : > { %v526_v22 = vpop.f32.mrf.mxu0  ;;  %v546_v23 = vpop.f32.mrf.mxu1 }
  0x9e   : > { %v606_v24 = vadd.f32 %v526_v22, %v300_v20  ;;  %v614_v25 = vadd.f32 %v546_v23, %v308_v21 }
  0xa0   : > { %639 = vst.msk [vmem:[#allocation2] sm:$0xff] %vm267_vm1, %v606_v24  ;;  %v311_v24 = vld [vmem:[#allocation2 + $0x58] sm:$0xff] }
  0xa1   : > { %647 = vst.msk [vmem:[#allocation2 + $0x40] sm:$0xff] %vm267_vm1, %v614_v25 }
  0xa4   : > { %v566_v31 = vpop.f32.mrf.mxu2  ;;  %v586_v32 = vpop.f32.mrf.mxu3 }
  0xa5   : > { %v622_v33 = vadd.f32 %v566_v31, %v316_v26  ;;  %v630_v34 = vadd.f32 %v586_v32, %v324_v27  ;;  %v528_v35 = vpop.f32.mrf.mxu0  ;;  %v548_v36 = vpop.f32.mrf.mxu1 }
  0xa6   : > { %v607_v37 = vadd.f32 %v528_v35, %v301_v28  ;;  %v615_v38 = vadd.f32 %v548_v36, %v309_v29  ;;  %v319_v35 = vld [vmem:[#allocation2 + $0x98] sm:$0xff] }
  0xa7   : > { %v674_v39 = vld [vmem:[#allocation2] sm:$0xff]  ;;  %655 = vst.msk [vmem:[#allocation2 + $0x80] sm:$0xff] %vm267_vm1, %v622_v33 }
  0xa8   : > { %v710_v40 = vadd.f32 %v1438_v30, %v674_v39  ;;  %v682_v41 = vld [vmem:[#allocation2 + $0x40] sm:$0xff]  ;;  %663 = vst.msk [vmem:[#allocation2 + $0xc0] sm:$0xff] %vm267_vm1, %v630_v34 }
  0xa9   : > { %v718_v42 = vadd.f32 %v1438_v30, %v682_v41  ;;  %640 = vst.msk [vmem:[#allocation2 + $0x8] sm:$0xff] %vm267_vm1, %v607_v37 }
  0xaa   : > { %vm742_vm2 = vcmp.gt.f32.partialorder %v710_v40, 0.0  ;;  %v774_v43 = vmul.f32 0.2, %v710_v40  ;;  %648 = vst.msk [vmem:[#allocation2 + $0x48] sm:$0xff] %vm267_vm1, %v615_v38 }
  0xab   : > { %vm750_vm3 = vcmp.gt.f32.partialorder %v718_v42, 0.0  ;;  %v782_v45 = vmul.f32 0.2, %v718_v42 }
  0xac   : > { %v806_v47 = vsel %vm742_vm2, %v710_v40, %v774_v43  ;;  %v568_v48 = vpop.f32.mrf.mxu2  ;;  %v588_v49 = vpop.f32.mrf.mxu3 }
  0xad   : > { %v838_v51 = vpack.c.bf16 %v806_v47, %v806_v47  ;;  %v814_v52 = vsel %vm750_vm3, %v718_v42, %v782_v45  ;;  %v623_v53 = vadd.f32 %v568_v48, %v317_v44  ;;  %v531_v54 = vpop.f32.mrf.mxu0  ;;  %v551_v56 = vpop.f32.mrf.mxu1  ;;  %v631_v59 = vadd.f32 %v588_v49, %v325_v46  ;;  %v327_v46 = vld [vmem:[#allocation2 + $0xd8] sm:$0xff] }
  0xae   : > { %v846_v57 = vpack.c.bf16 %v814_v52, %v814_v52  ;;  %v690_v58 = vld [vmem:[#allocation2 + $0x80] sm:$0xff]  ;;  %v608_v62 = vadd.f32 %v531_v54, %v302_v50  ;;  %v616_v1 = vadd.f32 %v551_v56, %v310_v55 }
  0xaf   : > { %871 = vst.msk [vmem:[%s1451_s11] sm:$0xf] %vm870_vm4, %v838_v51  ;;  %v726_v60 = vadd.f32 %v1438_v30, %v690_v58  ;;  %v698_v61 = vld [vmem:[#allocation2 + $0xc0] sm:$0xff] }
  0xb0   : > { %879 = vst.msk [vmem:[%s1451_s11 + $0x20] sm:$0xf] %vm870_vm4, %v846_v57  ;;  %v734_v63 = vadd.f32 %v1438_v30, %v698_v61  ;;  %v675_v0 = vld [vmem:[#allocation2 + $0x8] sm:$0xff]  ;;  %v304_v52 = vld [vmem:[#allocation2 + $0x20] sm:$0xff] }
  0xb1   : > { %vm758_vm5 = vcmp.gt.f32.partialorder %v726_v60, 0.0  ;;  %v790_v2 = vmul.f32 0.2, %v726_v60  ;;  %v711_v3 = vadd.f32 %v1438_v30, %v675_v0  ;;  %v683_v4 = vld [vmem:[#allocation2 + $0x48] sm:$0xff]  ;;  %656 = vst.msk [vmem:[#allocation2 + $0x88] sm:$0xff] %vm267_vm1, %v623_v53  ;;  %v312_v55 = vld [vmem:[#allocation2 + $0x60] sm:$0xff] }
  0xb2   : > { %vm766_vm6 = vcmp.gt.f32.partialorder %v734_v63, 0.0  ;;  %v798_v5 = vmul.f32 0.2, %v734_v63  ;;  %v719_v6 = vadd.f32 %v1438_v30, %v683_v4  ;;  %664 = vst.msk [vmem:[#allocation2 + $0xc8] sm:$0xff] %vm267_vm1, %v631_v59  ;;  %v328_v4 = vld [vmem:[#allocation2 + $0xe0] sm:$0xff] }
  0xb3   : > { %v822_v7 = vsel %vm758_vm5, %v726_v60, %v790_v2  ;;  %vm743_vm7 = vcmp.gt.f32.partialorder %v711_v3, 0.0  ;;  %v775_v8 = vmul.f32 0.2, %v711_v3  ;;  %641 = vst.msk [vmem:[#allocation2 + $0x10] sm:$0xff] %vm267_vm1, %v608_v62 }
  0xb4   : > { %v854_v10 = vpack.c.bf16 %v822_v7, %v822_v7  ;;  %v830_v11 = vsel %vm766_vm6, %v734_v63, %v798_v5  ;;  %vm751_vm8 = vcmp.gt.f32.partialorder %v719_v6, 0.0  ;;  %v783_v12 = vmul.f32 0.2, %v719_v6  ;;  %649 = vst.msk [vmem:[#allocation2 + $0x50] sm:$0xff] %vm267_vm1, %v616_v1  ;;  %v571_v13 = vpop.f32.mrf.mxu2  ;;  %v591_v15 = vpop.f32.mrf.mxu3  ;;  %v320_v1 = vld [vmem:[#allocation2 + $0xa0] sm:$0xff] }
  0xb5   : > { %v862_v16 = vpack.c.bf16 %v830_v11, %v830_v11  ;;  %v807_v17 = vsel %vm743_vm7, %v711_v3, %v775_v8  ;;  %v533_v19 = vpop.f32.mrf.mxu0  ;;  %v553_v20 = vpop.f32.mrf.mxu1  ;;  %v624_v23 = vadd.f32 %v571_v13, %v318_v9  ;;  %v632_v26 = vadd.f32 %v591_v15, %v326_v14 }
  0xb6   : > { %887 = vst.msk [vmem:[%s1451_s11 + $0x40] sm:$0xf] %vm870_vm4, %v854_v10  ;;  %v839_v21 = vpack.c.bf16 %v807_v17, %v807_v17  ;;  %v815_v22 = vsel %vm751_vm8, %v719_v6, %v783_v12  ;;  %v609_v28 = vadd.f32 %v533_v19, %v303_v18  ;;  %v617_v32 = vadd.f32 %v553_v20, %v311_v24  ;;  %v305_v19 = vld [vmem:[#allocation2 + $0x28] sm:$0xff] }
  0xb7   : > { %895 = vst.msk [vmem:[%s1451_s11 + $0x60] sm:$0xf] %vm870_vm4, %v862_v16  ;;  %v847_v25 = vpack.c.bf16 %v815_v22, %v815_v22 }
  0xb8   : > { %872 = vst.msk [vmem:[%s1451_s11 + $0x4] sm:$0xf] %vm870_vm4, %v839_v21  ;;  %v691_v27 = vld [vmem:[#allocation2 + $0x88] sm:$0xff] }
  0xb9   : > { %880 = vst.msk [vmem:[%s1451_s11 + $0x24] sm:$0xf] %vm870_vm4, %v847_v25  ;;  %v727_v29 = vadd.f32 %v1438_v30, %v691_v27  ;;  %v699_v31 = vld [vmem:[#allocation2 + $0xc8] sm:$0xff] }
  0xba   : > { %v735_v33 = vadd.f32 %v1438_v30, %v699_v31  ;;  %v676_v34 = vld [vmem:[#allocation2 + $0x10] sm:$0xff]  ;;  %657 = vst.msk [vmem:[#allocation2 + $0x90] sm:$0xff] %vm267_vm1, %v624_v23  ;;  %v313_v23 = vld [vmem:[#allocation2 + $0x68] sm:$0xff] }
  0xbb   : > { %vm759_vm9 = vcmp.gt.f32.partialorder %v727_v29, 0.0  ;;  %v791_v36 = vmul.f32 0.2, %v727_v29  ;;  %v712_v37 = vadd.f32 %v1438_v30, %v676_v34  ;;  %v684_v38 = vld [vmem:[#allocation2 + $0x50] sm:$0xff]  ;;  %665 = vst.msk [vmem:[#allocation2 + $0xd0] sm:$0xff] %vm267_vm1, %v632_v26  ;;  %v321_v31 = vld [vmem:[#allocation2 + $0xa8] sm:$0xff] }
  0xbc   : > { %vm767_vm10 = vcmp.gt.f32.partialorder %v735_v33, 0.0  ;;  %v799_v39 = vmul.f32 0.2, %v735_v33  ;;  %v720_v40 = vadd.f32 %v1438_v30, %v684_v38  ;;  %642 = vst.msk [vmem:[#allocation2 + $0x18] sm:$0xff] %vm267_vm1, %v609_v28  ;;  %v573_v41 = vpop.f32.mrf.mxu2  ;;  %v593_v42 = vpop.f32.mrf.mxu3 }
  0xbd   : > { %v823_v43 = vsel %vm759_vm9, %v727_v29, %v791_v36  ;;  %vm744_vm11 = vcmp.gt.f32.partialorder %v712_v37, 0.0  ;;  %v776_v44 = vmul.f32 0.2, %v712_v37  ;;  %650 = vst.msk [vmem:[#allocation2 + $0x58] sm:$0xff] %vm267_vm1, %v617_v32  ;;  %v625_v45 = vadd.f32 %v573_v41, %v319_v35  ;;  %v536_v47 = vpop.f32.mrf.mxu0  ;;  %v556_v48 = vpop.f32.mrf.mxu1  ;;  %v329_v35 = vld [vmem:[#allocation2 + $0xe8] sm:$0xff] }
  0xbe   : > { %v855_v49 = vpack.c.bf16 %v823_v43, %v823_v43  ;;  %v831_v50 = vsel %vm767_vm10, %v735_v33, %v799_v39  ;;  %vm752_vm12 = vcmp.gt.f32.partialorder %v720_v40, 0.0  ;;  %v784_v51 = vmul.f32 0.2, %v720_v40 }
  0xbf   : > { %v863_v53 = vpack.c.bf16 %v831_v50, %v831_v50  ;;  %v808_v54 = vsel %vm744_vm11, %v712_v37, %v776_v44  ;;  %658 = vst.msk [vmem:[#allocation2 + $0x98] sm:$0xff] %vm267_vm1, %v625_v45  ;;  %v633_v58 = vadd.f32 %v593_v42, %v327_v46  ;;  %v610_v61 = vadd.f32 %v536_v47, %v304_v52  ;;  %v306_v37 = vld [vmem:[#allocation2 + $0x30] sm:$0xff] }
  0xc0   : > { %888 = vst.msk [vmem:[%s1451_s11 + $0x44] sm:$0xf] %vm870_vm4, %v855_v49  ;;  %v840_v56 = vpack.c.bf16 %v808_v54, %v808_v54  ;;  %v816_v57 = vsel %vm752_vm12, %v720_v40, %v784_v51  ;;  %v618_v0 = vadd.f32 %v556_v48, %v312_v55 }
  0xc1   : > { %896 = vst.msk [vmem:[%s1451_s11 + $0x64] sm:$0xf] %vm870_vm4, %v863_v53  ;;  %v848_v59 = vpack.c.bf16 %v816_v57, %v816_v57  ;;  %v692_v60 = vld [vmem:[#allocation2 + $0x90] sm:$0xff] }
  0xc2   : > { %873 = vst.msk [vmem:[%s1451_s11 + $0x8] sm:$0xf] %vm870_vm4, %v840_v56  ;;  %v728_v62 = vadd.f32 %v1438_v30, %v692_v60  ;;  %v700_v63 = vld [vmem:[#allocation2 + $0xd0] sm:$0xff] }
  0xc3   : > { %881 = vst.msk [vmem:[%s1451_s11 + $0x28] sm:$0xf] %vm870_vm4, %v848_v59  ;;  %v736_v2 = vadd.f32 %v1438_v30, %v700_v63  ;;  %v677_v3 = vld [vmem:[#allocation2 + $0x18] sm:$0xff]  ;;  %v314_v63 = vld [vmem:[#allocation2 + $0x70] sm:$0xff] }
  0xc4   : > { %vm760_vm13 = vcmp.gt.f32.partialorder %v728_v62, 0.0  ;;  %v792_v5 = vmul.f32 0.2, %v728_v62  ;;  %v713_v6 = vadd.f32 %v1438_v30, %v677_v3  ;;  %v685_v7 = vld [vmem:[#allocation2 + $0x58] sm:$0xff]  ;;  %666 = vst.msk [vmem:[#allocation2 + $0xd8] sm:$0xff] %vm267_vm1, %v633_v58  ;;  %v576_v8 = vpop.f32.mrf.mxu2  ;;  %v596_v9 = vpop.f32.mrf.mxu3  ;;  %v322_v3 = vld [vmem:[#allocation2 + $0xb0] sm:$0xff] }
  0xc5   : > { %vm768_vm14 = vcmp.gt.f32.partialorder %v736_v2, 0.0  ;;  %v800_v10 = vmul.f32 0.2, %v736_v2  ;;  %v721_v11 = vadd.f32 %v1438_v30, %v685_v7  ;;  %643 = vst.msk [vmem:[#allocation2 + $0x20] sm:$0xff] %vm267_vm1, %v610_v61  ;;  %v626_v12 = vadd.f32 %v576_v8, %v320_v1  ;;  %v538_v13 = vpop.f32.mrf.mxu0  ;;  %v558_v14 = vpop.f32.mrf.mxu1 }
  0xc6   : > { %v824_v15 = vsel %vm760_vm13, %v728_v62, %v792_v5  ;;  %vm745_vm15 = vcmp.gt.f32.partialorder %v713_v6, 0.0  ;;  %v777_v16 = vmul.f32 0.2, %v713_v6  ;;  %v693_v17 = vld [vmem:[#allocation2 + $0x98] sm:$0xff]  ;;  %651 = vst.msk [vmem:[#allocation2 + $0x60] sm:$0xff] %vm267_vm1, %v618_v0  ;;  %v634_v18 = vadd.f32 %v596_v9, %v328_v4 }
  0xc7   : > { %v856_v20 = vpack.c.bf16 %v824_v15, %v824_v15  ;;  %v832_v21 = vsel %vm768_vm14, %v736_v2, %v800_v10  ;;  %vm753_vm0 = vcmp.gt.f32.partialorder %v721_v11, 0.0  ;;  %v785_v22 = vmul.f32 0.2, %v721_v11  ;;  %659 = vst.msk [vmem:[#allocation2 + $0xa0] sm:$0xff] %vm267_vm1, %v626_v12 }
  0xc8   : > { %v864_v24 = vpack.c.bf16 %v832_v21, %v832_v21  ;;  %v809_v25 = vsel %vm745_vm15, %v713_v6, %v777_v16  ;;  %v729_v26 = vadd.f32 %v1438_v30, %v693_v17  ;;  %667 = vst.msk [vmem:[#allocation2 + $0xe0] sm:$0xff] %vm267_vm1, %v634_v18  ;;  %v611_v29 = vadd.f32 %v538_v13, %v305_v19  ;;  %v330_v6 = vld [vmem:[#allocation2 + $0xf0] sm:$0xff]  ;;  %v307_v13 = vld [vmem:[#allocation2 + $0x38] sm:$0xff] }
  0xc9   : > { %889 = vst.msk [vmem:[%s1451_s11 + $0x48] sm:$0xf] %vm870_vm4, %v856_v20  ;;  %v841_v27 = vpack.c.bf16 %v809_v25, %v809_v25  ;;  %v817_v28 = vsel %vm753_vm0, %v721_v11, %v785_v22  ;;  %v619_v34 = vadd.f32 %v558_v14, %v313_v23  ;;  %v315_v21 = vld [vmem:[#allocation2 + $0x78] sm:$0xff] }
  0xca   : > { %897 = vst.msk [vmem:[%s1451_s11 + $0x68] sm:$0xf] %vm870_vm4, %v864_v24  ;;  %v849_v32 = vpack.c.bf16 %v817_v28, %v817_v28  ;;  %vm761_vm2 = vcmp.gt.f32.partialorder %v729_v26, 0.0  ;;  %v793_v33 = vmul.f32 0.2, %v729_v26 }
  0xcb   : > { %874 = vst.msk [vmem:[%s1451_s11 + $0xc] sm:$0xf] %vm870_vm4, %v841_v27  ;;  %v701_v36 = vld [vmem:[#allocation2 + $0xd8] sm:$0xff] }
  0xcc   : > { %882 = vst.msk [vmem:[%s1451_s11 + $0x2c] sm:$0xf] %vm870_vm4, %v849_v32  ;;  %v825_v38 = vsel %vm761_vm2, %v729_v26, %v793_v33  ;;  %v737_v39 = vadd.f32 %v1438_v30, %v701_v36  ;;  %v678_v40 = vld [vmem:[#allocation2 + $0x20] sm:$0xff]  ;;  %v578_v41 = vpop.f32.mrf.mxu2  ;;  %v598_v42 = vpop.f32.mrf.mxu3 }
  0xcd   : > { %v857_v43 = vpack.c.bf16 %v825_v38, %v825_v38  ;;  %v714_v44 = vadd.f32 %v1438_v30, %v678_v40  ;;  %v686_v45 = vld [vmem:[#allocation2 + $0x60] sm:$0xff]  ;;  %644 = vst.msk [vmem:[#allocation2 + $0x28] sm:$0xff] %vm267_vm1, %v611_v29  ;;  %v627_v46 = vadd.f32 %v578_v41, %v321_v31  ;;  %v635_v47 = vadd.f32 %v598_v42, %v329_v35  ;;  %v541_v48 = vpop.f32.mrf.mxu0  ;;  %v561_v49 = vpop.f32.mrf.mxu1  ;;  %v323_v40 = vld [vmem:[#allocation2 + $0xb8] sm:$0xff] }
  0xce   : > { %vm769_vm3 = vcmp.gt.f32.partialorder %v737_v39, 0.0  ;;  %v801_v50 = vmul.f32 0.2, %v737_v39  ;;  %v722_v51 = vadd.f32 %v1438_v30, %v686_v45  ;;  %v694_v52 = vld [vmem:[#allocation2 + $0xa0] sm:$0xff]  ;;  %652 = vst.msk [vmem:[#allocation2 + $0x68] sm:$0xff] %vm267_vm1, %v619_v34  ;;  %v612_v53 = vadd.f32 %v541_v48, %v306_v37 }
  0xcf   : > { %890 = vst.msk [vmem:[%s1451_s11 + $0x4c] sm:$0xf] %vm870_vm4, %v857_v43  ;;  %vm746_vm5 = vcmp.gt.f32.partialorder %v714_v44, 0.0  ;;  %v778_v54 = vmul.f32 0.2, %v714_v44  ;;  %v730_v55 = vadd.f32 %v1438_v30, %v694_v52  ;;  %v702_v56 = vld [vmem:[#allocation2 + $0xe0] sm:$0xff]  ;;  %v620_v10 = vadd.f32 %v561_v49, %v314_v63 }
  0xd0   : > { %v833_v57 = vsel %vm769_vm3, %v737_v39, %v801_v50  ;;  %vm754_vm6 = vcmp.gt.f32.partialorder %v722_v51, 0.0  ;;  %v786_v58 = vmul.f32 0.2, %v722_v51  ;;  %v738_v59 = vadd.f32 %v1438_v30, %v702_v56  ;;  %660 = vst.msk [vmem:[#allocation2 + $0xa8] sm:$0xff] %vm267_vm1, %v627_v46  ;;  %v331_v43 = vld [vmem:[#allocation2 + $0xf8] sm:$0xff] }
  0xd1   : > { %v865_v60 = vpack.c.bf16 %v833_v57, %v833_v57  ;;  %v810_v61 = vsel %vm746_vm5, %v714_v44, %v778_v54  ;;  %vm762_vm7 = vcmp.gt.f32.partialorder %v730_v55, 0.0  ;;  %v794_v62 = vmul.f32 0.2, %v730_v55  ;;  %668 = vst.msk [vmem:[#allocation2 + $0xe8] sm:$0xff] %vm267_vm1, %v635_v47 }
  0xd2   : > { %v842_v0 = vpack.c.bf16 %v810_v61, %v810_v61  ;;  %v818_v1 = vsel %vm754_vm6, %v722_v51, %v786_v58  ;;  %vm770_vm8 = vcmp.gt.f32.partialorder %v738_v59, 0.0  ;;  %v802_v2 = vmul.f32 0.2, %v738_v59  ;;  %645 = vst.msk [vmem:[#allocation2 + $0x30] sm:$0xff] %vm267_vm1, %v612_v53 }
  0xd3   : > { %898 = vst.msk [vmem:[%s1451_s11 + $0x6c] sm:$0xf] %vm870_vm4, %v865_v60  ;;  %v850_v4 = vpack.c.bf16 %v818_v1, %v818_v1  ;;  %v826_v5 = vsel %vm762_vm7, %v730_v55, %v794_v62 }
  0xd4   : > { %875 = vst.msk [vmem:[%s1451_s11 + $0x10] sm:$0xf] %vm870_vm4, %v842_v0  ;;  %v858_v7 = vpack.c.bf16 %v826_v5, %v826_v5  ;;  %v834_v8 = vsel %vm770_vm8, %v738_v59, %v802_v2  ;;  %v679_v9 = vld [vmem:[#allocation2 + $0x28] sm:$0xff]  ;;  %v581_v11 = vpop.f32.mrf.mxu2  ;;  %v601_v12 = vpop.f32.mrf.mxu3 }
  0xd5   : > { %883 = vst.msk [vmem:[%s1451_s11 + $0x30] sm:$0xf] %vm870_vm4, %v850_v4  ;;  %v866_v14 = vpack.c.bf16 %v834_v8, %v834_v8  ;;  %v715_v15 = vadd.f32 %v1438_v30, %v679_v9  ;;  %v687_v16 = vld [vmem:[#allocation2 + $0x68] sm:$0xff]  ;;  %v628_v17 = vadd.f32 %v581_v11, %v322_v3  ;;  %v543_v18 = vpop.f32.mrf.mxu0  ;;  %v636_v20 = vadd.f32 %v601_v12, %v330_v6  ;;  %v563_v22 = vpop.f32.mrf.mxu1 }
  0xd6   : > { %891 = vst.msk [vmem:[%s1451_s11 + $0x50] sm:$0xf] %vm870_vm4, %v858_v7  ;;  %v723_v19 = vadd.f32 %v1438_v30, %v687_v16  ;;  %v613_v25 = vadd.f32 %v543_v18, %v307_v13  ;;  %v621_v33 = vadd.f32 %v563_v22, %v315_v21 }
  0xd7   : > { %899 = vst.msk [vmem:[%s1451_s11 + $0x70] sm:$0xf] %vm870_vm4, %v866_v14  ;;  %vm747_vm9 = vcmp.gt.f32.partialorder %v715_v15, 0.0  ;;  %v779_v23 = vmul.f32 0.2, %v715_v15  ;;  %v695_v24 = vld [vmem:[#allocation2 + $0xa8] sm:$0xff] }
  0xd8   : > { %vm755_vm10 = vcmp.gt.f32.partialorder %v723_v19, 0.0  ;;  %v787_v26 = vmul.f32 0.2, %v723_v19  ;;  %v731_v27 = vadd.f32 %v1438_v30, %v695_v24  ;;  %v703_v28 = vld [vmem:[#allocation2 + $0xe8] sm:$0xff]  ;;  %653 = vst.msk [vmem:[#allocation2 + $0x70] sm:$0xff] %vm267_vm1, %v620_v10 }
  0xd9   : > { %v811_v29 = vsel %vm747_vm9, %v715_v15, %v779_v23  ;;  %v739_v31 = vadd.f32 %v1438_v30, %v703_v28  ;;  %v680_v32 = vld [vmem:[#allocation2 + $0x30] sm:$0xff]  ;;  %661 = vst.msk [vmem:[#allocation2 + $0xb0] sm:$0xff] %vm267_vm1, %v628_v17 }
  0xda   : > { %v843_v34 = vpack.c.bf16 %v811_v29, %v811_v29  ;;  %v819_v35 = vsel %vm755_vm10, %v723_v19, %v787_v26  ;;  %vm763_vm11 = vcmp.gt.f32.partialorder %v731_v27, 0.0  ;;  %v795_v36 = vmul.f32 0.2, %v731_v27  ;;  %669 = vst.msk [vmem:[#allocation2 + $0xf0] sm:$0xff] %vm267_vm1, %v636_v20 }
  0xdb   : > { %v851_v37 = vpack.c.bf16 %v819_v35, %v819_v35  ;;  %vm771_vm12 = vcmp.gt.f32.partialorder %v739_v31, 0.0  ;;  %v803_v38 = vmul.f32 0.2, %v739_v31  ;;  %v716_v39 = vadd.f32 %v1438_v30, %v680_v32  ;;  %646 = vst.msk [vmem:[#allocation2 + $0x38] sm:$0xff] %vm267_vm1, %v613_v25 }
  0xdc   : > { %876 = vst.msk [vmem:[%s1451_s11 + $0x14] sm:$0xf] %vm870_vm4, %v843_v34  ;;  %v827_v41 = vsel %vm763_vm11, %v731_v27, %v795_v36  ;;  %v583_v42 = vpop.f32.mrf.mxu2  ;;  %v603_v44 = vpop.f32.mrf.mxu3 }
  0xdd   : > { %884 = vst.msk [vmem:[%s1451_s11 + $0x34] sm:$0xf] %vm870_vm4, %v851_v37  ;;  %v859_v45 = vpack.c.bf16 %v827_v41, %v827_v41  ;;  %v835_v46 = vsel %vm771_vm12, %v739_v31, %v803_v38  ;;  %vm748_vm13 = vcmp.gt.f32.partialorder %v716_v39, 0.0  ;;  %v780_v47 = vmul.f32 0.2, %v716_v39 }
  0xde   : > { %v867_v48 = vpack.c.bf16 %v835_v46, %v835_v46  ;;  %654 = vst.msk [vmem:[#allocation2 + $0x78] sm:$0xff] %vm267_vm1, %v621_v33  ;;  %v629_v49 = vadd.f32 %v583_v42, %v323_v40  ;;  %v637_v52 = vadd.f32 %v603_v44, %v331_v43 }
  0xdf   : > { %892 = vst.msk [vmem:[%s1451_s11 + $0x54] sm:$0xf] %vm870_vm4, %v859_v45  ;;  %v812_v50 = vsel %vm748_vm13, %v716_v39, %v780_v47  ;;  %v688_v51 = vld [vmem:[#allocation2 + $0x70] sm:$0xff] }
  0xe0   : > { %900 = vst.msk [vmem:[%s1451_s11 + $0x74] sm:$0xf] %vm870_vm4, %v867_v48  ;;  %v844_v53 = vpack.c.bf16 %v812_v50, %v812_v50  ;;  %v724_v54 = vadd.f32 %v1438_v30, %v688_v51  ;;  %v696_v55 = vld [vmem:[#allocation2 + $0xb0] sm:$0xff] }
  0xe1   : > { %v732_v56 = vadd.f32 %v1438_v30, %v696_v55  ;;  %v704_v57 = vld [vmem:[#allocation2 + $0xf0] sm:$0xff]  ;;  %662 = vst.msk [vmem:[#allocation2 + $0xb8] sm:$0xff] %vm267_vm1, %v629_v49 }
  0xe2   : > { %877 = vst.msk [vmem:[%s1451_s11 + $0x18] sm:$0xf] %vm870_vm4, %v844_v53  ;;  %vm756_vm14 = vcmp.gt.f32.partialorder %v724_v54, 0.0  ;;  %v788_v58 = vmul.f32 0.2, %v724_v54  ;;  %v740_v59 = vadd.f32 %v1438_v30, %v704_v57  ;;  %v681_v60 = vld [vmem:[#allocation2 + $0x38] sm:$0xff] }
  0xe3   : > { %vm764_vm15 = vcmp.gt.f32.partialorder %v732_v56, 0.0  ;;  %v796_v61 = vmul.f32 0.2, %v732_v56  ;;  %v717_v62 = vadd.f32 %v1438_v30, %v681_v60  ;;  %670 = vst.msk [vmem:[#allocation2 + $0xf8] sm:$0xff] %vm267_vm1, %v637_v52 }
  0xe4   : > { %v820_v63 = vsel %vm756_vm14, %v724_v54, %v788_v58  ;;  %vm772_vm0 = vcmp.gt.f32.partialorder %v740_v59, 0.0  ;;  %v804_v0 = vmul.f32 0.2, %v740_v59 }
  0xe5   : > { %v852_v1 = vpack.c.bf16 %v820_v63, %v820_v63  ;;  %v828_v2 = vsel %vm764_vm15, %v732_v56, %v796_v61  ;;  %vm749_vm2 = vcmp.gt.f32.partialorder %v717_v62, 0.0  ;;  %v781_v3 = vmul.f32 0.2, %v717_v62  ;;  %v689_v4 = vld [vmem:[#allocation2 + $0x78] sm:$0xff] }
  0xe6   : > { %v860_v5 = vpack.c.bf16 %v828_v2, %v828_v2  ;;  %v836_v6 = vsel %vm772_vm0, %v740_v59, %v804_v0  ;;  %v725_v7 = vadd.f32 %v1438_v30, %v689_v4 }
  0xe7   : > { %885 = vst.msk [vmem:[%s1451_s11 + $0x38] sm:$0xf] %vm870_vm4, %v852_v1  ;;  %v868_v8 = vpack.c.bf16 %v836_v6, %v836_v6  ;;  %v813_v9 = vsel %vm749_vm2, %v717_v62, %v781_v3 }
  0xe8   : > { %893 = vst.msk [vmem:[%s1451_s11 + $0x58] sm:$0xf] %vm870_vm4, %v860_v5  ;;  %v845_v10 = vpack.c.bf16 %v813_v9, %v813_v9  ;;  %vm757_vm1 = vcmp.gt.f32.partialorder %v725_v7, 0.0  ;;  %v789_v11 = vmul.f32 0.2, %v725_v7  ;;  %v697_v12 = vld [vmem:[#allocation2 + $0xb8] sm:$0xff] }
  0xe9   : > { %901 = vst.msk [vmem:[%s1451_s11 + $0x78] sm:$0xf] %vm870_vm4, %v868_v8  ;;  %v733_v13 = vadd.f32 %v1438_v30, %v697_v12 }
  0xea   : > { %878 = vst.msk [vmem:[%s1451_s11 + $0x1c] sm:$0xf] %vm870_vm4, %v845_v10  ;;  %v821_v14 = vsel %vm757_vm1, %v725_v7, %v789_v11  ;;  %v705_v15 = vld [vmem:[#allocation2 + $0xf8] sm:$0xff] }
  0xeb   : > { %v853_v16 = vpack.c.bf16 %v821_v14, %v821_v14  ;;  %vm765_vm3 = vcmp.gt.f32.partialorder %v733_v13, 0.0  ;;  %v797_v17 = vmul.f32 0.2, %v733_v13  ;;  %v741_v18 = vadd.f32 %v1438_v30, %v705_v15 }
  0xed   : > { %886 = vst.msk [vmem:[%s1451_s11 + $0x3c] sm:$0xf] %vm870_vm4, %v853_v16  ;;  %v829_v19 = vsel %vm765_vm3, %v733_v13, %v797_v17  ;;  %vm773_vm5 = vcmp.gt.f32.partialorder %v741_v18, 0.0  ;;  %v805_v20 = vmul.f32 0.2, %v741_v18 }
  0xee   : > { %v861_v21 = vpack.c.bf16 %v829_v19, %v829_v19 }
  0xef   : > { %v837_v22 = vsel %vm773_vm5, %v741_v18, %v805_v20 }
  0xf0   : > { %894 = vst.msk [vmem:[%s1451_s11 + $0x5c] sm:$0xf] %vm870_vm4, %v861_v21  ;;  %v869_v23 = vpack.c.bf16 %v837_v22, %v837_v22 }
  0xf2   : > { %902 = vst.msk [vmem:[%s1451_s11 + $0x7c] sm:$0xf] %vm870_vm4, %v869_v23 }
  0xf3 PF: > { %s15_s14 = sadd.s32 1, %s1285_s14   ;;  %s1588_s12 = smov %s1281_s13 }
  0xf4   : > { %p12_p8 = scmp.ge.s32.totalorder %s15_s14, 4   ;;  %s1589_s13 = smov %s1591_s16 }
  0xf6   :  { %14 = sbr.rel (!%p12_p8) target bundleno = 3 (0x3), region = 81 }
  0xfb   :  { %931 = vsyncpa [#allocation4], 1 }
  0xfc   :  { %933 = vsyncpa [#allocation4 + $0x1], 1 }
  0xfd   :  { %934 = vsyncpa [#allocation6], 1 }

// kernel: discriminator_forward.9
= control target key start
LH: loop header
LB: loop body
LE: loop exit
PB: predicated region body
PF: predicated region fallthrough
CT: control target
= control target key end

     0   :  { %s1718_s12 = smov 0   ;;  %s1720_s13 = smov 0   ;;  %s1980_s0 = inlined_call_operand.vmem [shape: bf16[128,1024], index: 0, kind: input, shape index: {}]   ;;  %s1981_s1 = inlined_call_operand.vmem [shape: bf16[1024,128], index: 1, kind: input, shape index: {}]   ;;  %s1982_s2 = inlined_call_operand.vmem [shape: f32[1,128], index: 2, kind: input, shape index: {}]   ;;  %s1983_s3 = inlined_call_operand.vmem [shape: bf16[128,128], index: 3, kind: output, shape index: {}]  }
   0x1   :  { %s1722_s14 = smov 0   ;;  %s1724_s15 = smov 0  }
   0x2   :  { %s1726_s16 = smov 0  }
   0x3 LB: > { %s25_s17 = sadd.s32 1, %s1691_s15  ;;  %p48_p1 = scmp.ne.s32.totalorder %s1683_s13, %s1679_s12  ;;  %s1695_s16 = sphi %s1726_s16, %s13_s16   ;;  %s1691_s15 = sphi %s1724_s15, %s1987_s15   ;;  %s1687_s14 = sphi %s1722_s14, %s1986_s14   ;;  %s1683_s13 = sphi %s1720_s13, %s1985_s13   ;;  %s1679_s12 = sphi %s1718_s12, %s1984_s12  }
   0x4   : > { %p26_p0 = scmp.ge.s32.totalorder %s25_s17, 2  ;;  %p49_p2 = scmp.eq.s32.totalorder %s1695_s16, 0 }
   0x5   : > { %s41_s19 = sadd.s32 1, %s1683_s13  ;;  %p1233_p5 = scmp.ge.s32.totalorder %s1695_s16, 2 }
   0x6   : > { %s1989_s17 = smov (%p26_p0, %s25_s17), 0  ;;  %p50_p3 = por %p49_p2, %p48_p1 }
   0x7   : > { %s37_s18 = ssub.s32 %s1691_s15, %s1989_s17  ;;  %162 = sbr.rel (%p1233_p5) target bundleno = 48 (0x30), region = 20 }
   0x8   : > { %p39_p4 = scmp.eq.s32.totalorder %s37_s18, 0 }
   0xa   : > { %s1753_s20 = scalar_select %p39_p4, %s1683_s13, %s41_s19  }
   0xc   : > { %165 = sbr.rel (!%p50_p3) target bundleno = 48 (0x30), region = 24  ;;  %s167_s21 = sand.u32 (%p50_p3), 1, %s1683_s13  }
   0xd   : > { %s1503_s22 = sshll.u32 (%p50_p3), %s1691_s15, 4  ;;  %s1234_s23 = sshll.u32 (%p50_p3), %s167_s21, 8 }
   0xe   : > { %s1761_s26 = scalar_lea.vmem (%p50_p3), %s1980_s0, %s1503_s22  ;;  %s1766_s27 = scalar_lea.vmem (%p50_p3), [#allocation3], %s1234_s23 }
   0xf   : > { %v188_v0 = vld [vmem:[%s1761_s26] sm:$0xff] (%p50_p3)  ;;  %v190_v1 = vld [vmem:[%s1761_s26 + $0x8] sm:$0xff] (%p50_p3) }
  0x10   : > { %v192_v2 = vld [vmem:[%s1761_s26 + $0x20] sm:$0xff] (%p50_p3)  ;;  %189 = vst [vmem:[%s1766_s27] sm:$0xff] (%p50_p3), %v188_v0  ;;  %v194_v3 = vld [vmem:[%s1761_s26 + $0x28] sm:$0xff] (%p50_p3) }
  0x11   : > { %191 = vst [vmem:[%s1766_s27 + $0x8] sm:$0xff] %v190_v1  ;;  %v196_v4 = vld [vmem:[%s1761_s26 + $0x40] sm:$0xff]  ;;  %v198_v5 = vld [vmem:[%s1761_s26 + $0x48] sm:$0xff] }
  0x12   : > { %193 = vst [vmem:[%s1766_s27 + $0x10] sm:$0xff] %v192_v2  ;;  %v200_v6 = vld [vmem:[%s1761_s26 + $0x60] sm:$0xff]  ;;  %v202_v7 = vld [vmem:[%s1761_s26 + $0x68] sm:$0xff] }
  0x13   : > { %195 = vst [vmem:[%s1766_s27 + $0x18] sm:$0xff] %v194_v3  ;;  %v204_v8 = vld [vmem:[%s1761_s26 + $0x80] sm:$0xff]  ;;  %v206_v9 = vld [vmem:[%s1761_s26 + $0x88] sm:$0xff] }
  0x14   : > { %197 = vst [vmem:[%s1766_s27 + $0x20] sm:$0xff] %v196_v4  ;;  %v208_v10 = vld [vmem:[%s1761_s26 + $0xa0] sm:$0xff]  ;;  %v210_v11 = vld [vmem:[%s1761_s26 + $0xa8] sm:$0xff] }
  0x15   : > { %199 = vst [vmem:[%s1766_s27 + $0x28] sm:$0xff] %v198_v5  ;;  %v212_v12 = vld [vmem:[%s1761_s26 + $0xc0] sm:$0xff]  ;;  %v214_v13 = vld [vmem:[%s1761_s26 + $0xc8] sm:$0xff] }
  0x16   : > { %201 = vst [vmem:[%s1766_s27 + $0x30] sm:$0xff] %v200_v6  ;;  %v216_v14 = vld [vmem:[%s1761_s26 + $0xe0] sm:$0xff]  ;;  %v218_v15 = vld [vmem:[%s1761_s26 + $0xe8] sm:$0xff] }
  0x17   : > { %203 = vst [vmem:[%s1766_s27 + $0x38] sm:$0xff] %v202_v7  ;;  %v220_v16 = vld [vmem:[%s1761_s26 + $0x100] sm:$0xff]  ;;  %v222_v17 = vld [vmem:[%s1761_s26 + $0x108] sm:$0xff] }
  0x18   : > { %205 = vst [vmem:[%s1766_s27 + $0x40] sm:$0xff] %v204_v8  ;;  %v224_v18 = vld [vmem:[%s1761_s26 + $0x120] sm:$0xff]  ;;  %v226_v19 = vld [vmem:[%s1761_s26 + $0x128] sm:$0xff] }
  0x19   : > { %207 = vst [vmem:[%s1766_s27 + $0x48] sm:$0xff] %v206_v9  ;;  %v228_v20 = vld [vmem:[%s1761_s26 + $0x140] sm:$0xff]  ;;  %v230_v21 = vld [vmem:[%s1761_s26 + $0x148] sm:$0xff] }
  0x1a   : > { %209 = vst [vmem:[%s1766_s27 + $0x50] sm:$0xff] %v208_v10  ;;  %v232_v22 = vld [vmem:[%s1761_s26 + $0x160] sm:$0xff]  ;;  %v234_v23 = vld [vmem:[%s1761_s26 + $0x168] sm:$0xff] }
  0x1b   : > { %211 = vst [vmem:[%s1766_s27 + $0x58] sm:$0xff] %v210_v11  ;;  %v236_v24 = vld [vmem:[%s1761_s26 + $0x180] sm:$0xff]  ;;  %v238_v25 = vld [vmem:[%s1761_s26 + $0x188] sm:$0xff] }
  0x1c   : > { %213 = vst [vmem:[%s1766_s27 + $0x60] sm:$0xff] %v212_v12  ;;  %v240_v26 = vld [vmem:[%s1761_s26 + $0x1a0] sm:$0xff]  ;;  %v242_v27 = vld [vmem:[%s1761_s26 + $0x1a8] sm:$0xff] }
  0x1d   : > { %215 = vst [vmem:[%s1766_s27 + $0x68] sm:$0xff] %v214_v13  ;;  %v244_v28 = vld [vmem:[%s1761_s26 + $0x1c0] sm:$0xff]  ;;  %v246_v29 = vld [vmem:[%s1761_s26 + $0x1c8] sm:$0xff] }
  0x1e   : > { %217 = vst [vmem:[%s1766_s27 + $0x70] sm:$0xff] %v216_v14  ;;  %v248_v30 = vld [vmem:[%s1761_s26 + $0x1e0] sm:$0xff]  ;;  %v250_v31 = vld [vmem:[%s1761_s26 + $0x1e8] sm:$0xff] }
  0x1f   : > { %219 = vst [vmem:[%s1766_s27 + $0x78] sm:$0xff] %v218_v15 }
  0x20   : > { %221 = vst [vmem:[%s1766_s27 + $0x80] sm:$0xff] %v220_v16 }
  0x21   : > { %223 = vst [vmem:[%s1766_s27 + $0x88] sm:$0xff] %v222_v17 }
  0x22   : > { %225 = vst [vmem:[%s1766_s27 + $0x90] sm:$0xff] %v224_v18 }
  0x23   : > { %227 = vst [vmem:[%s1766_s27 + $0x98] sm:$0xff] %v226_v19 }
  0x24   : > { %229 = vst [vmem:[%s1766_s27 + $0xa0] sm:$0xff] %v228_v20 }
  0x25   : > { %231 = vst [vmem:[%s1766_s27 + $0xa8] sm:$0xff] %v230_v21 }
  0x26   : > { %233 = vst [vmem:[%s1766_s27 + $0xb0] sm:$0xff] %v232_v22 }
  0x27   : > { %235 = vst [vmem:[%s1766_s27 + $0xb8] sm:$0xff] %v234_v23 }
  0x28   : > { %237 = vst [vmem:[%s1766_s27 + $0xc0] sm:$0xff] %v236_v24 }
  0x29   : > { %239 = vst [vmem:[%s1766_s27 + $0xc8] sm:$0xff] %v238_v25 }
  0x2a   : > { %241 = vst [vmem:[%s1766_s27 + $0xd0] sm:$0xff] %v240_v26 }
  0x2b   : > { %243 = vst [vmem:[%s1766_s27 + $0xd8] sm:$0xff] %v242_v27 }
  0x2c   : > { %245 = vst [vmem:[%s1766_s27 + $0xe0] sm:$0xff] %v244_v28 }
  0x2d   : > { %247 = vst [vmem:[%s1766_s27 + $0xe8] sm:$0xff] %v246_v29 }
  0x2e   : > { %249 = vst [vmem:[%s1766_s27 + $0xf0] sm:$0xff] %v248_v30 }
  0x2f   : > { %251 = vst [vmem:[%s1766_s27 + $0xf8] sm:$0xff] %v250_v31 }
  0x30 PF: > { %p1237_p6 = scmp.ge.s32.totalorder %s1695_s16, 1  ;;  %p268_p7 = scmp.lt.s32.totalorder %s1695_s16, 3 }
  0x32   : > { %p269_p8 = pnand %p1237_p6, %p268_p7 }
  0x33   : > { %s275_s28 = sand.u32 (!%p269_p8), 1, %s1679_s12   ;;  %s1239_s29 = sshll.u32 (!%p269_p8), %s1687_s14, 6 }
  0x34   : > { %272 = sbr.rel (%p269_p8) target bundleno = 386 (0x182), region = 51  ;;  %s1238_s30 = sshll.u32 (!%p269_p8), %s275_s28, 8 }
  0x35   : > { %p315_p9 = scmp.lt.s32.totalorder (!%p269_p8), %s1239_s29, 127  ;;  %s1838_s8 = scalar_lea.vmem (!%p269_p8), [#allocation3], %s1238_s30 }
  0x36   : > { %p1241_p10 = scmp.ne.s32.totalorder (!%p269_p8), %s1687_s14, 0 }
  0x39   : > { %s1991_s29 = smov (!%p315_p9, %s1239_s29), 127  ;;  %338 = sbr.rel (%p1241_p10) target bundleno = 79 (0x4f), region = 59 }
  0x3a   : > { %s1240_s4 = sshll.u32 %s1991_s29, 2 }
  0x3b   : > { %s1836_s7 = scalar_lea.vmem %s1981_s1, %s1240_s4 }
  0x3e   : > { %v1697_v32 = vmov 0.0  }
  0x3f   : > { %339 = vst [vmem:[#allocation2 + $0x30] sm:$0xff] %v1697_v32 }
  0x40   : > { %340 = vst [vmem:[#allocation2] sm:$0xff] %v1697_v32 }
  0x41   : > { %341 = vst [vmem:[#allocation2 + $0x58] sm:$0xff] %v1697_v32 }
  0x42   : > { %342 = vst [vmem:[#allocation2 + $0x18] sm:$0xff] %v1697_v32 }
  0x43   : > { %343 = vst [vmem:[#allocation2 + $0x50] sm:$0xff] %v1697_v32 }
  0x44   : > { %344 = vst [vmem:[#allocation2 + $0x68] sm:$0xff] %v1697_v32 }
  0x45   : > { %345 = vst [vmem:[#allocation2 + $0x8] sm:$0xff] %v1697_v32 }
  0x46   : > { %346 = vst [vmem:[#allocation2 + $0x48] sm:$0xff] %v1697_v32 }
  0x47   : > { %347 = vst [vmem:[#allocation2 + $0x40] sm:$0xff] %v1697_v32 }
  0x48   : > { %348 = vst [vmem:[#allocation2 + $0x20] sm:$0xff] %v1697_v32 }
  0x49   : > { %349 = vst [vmem:[#allocation2 + $0x10] sm:$0xff] %v1697_v32 }
  0x4a   : > { %350 = vst [vmem:[#allocation2 + $0x38] sm:$0xff] %v1697_v32 }
  0x4b   : > { %351 = vst [vmem:[#allocation2 + $0x60] sm:$0xff] %v1697_v32 }
  0x4c   : > { %352 = vst [vmem:[#allocation2 + $0x70] sm:$0xff] %v1697_v32 }
  0x4d   : > { %353 = vst [vmem:[#allocation2 + $0x78] sm:$0xff] %v1697_v32 }
  0x4e   : > { %354 = vst [vmem:[#allocation2 + $0x28] sm:$0xff] %v1697_v32 }
  0x4f PF: > { %v1543_v33 = vld [vmem:[%s1836_s7 + $0x38] sm:$0xff]  ;;  %v1542_v37 = vld [vmem:[%s1836_s7 + $0x30] sm:$0xff]  ;;  %v1541_v41 = vld [vmem:[%s1836_s7 + $0x28] sm:$0xff]  ;;  %p1498_p11 = scmp.ne.s32.totalorder %s1687_s14, 1 }
  0x50   : > { %v1551_v34 = vld [vmem:[%s1836_s7 + $0x78] sm:$0xff]  ;;  %819 = vmatpush.bf16.msra.mxu0 %v1543_v33  ;;  %v1550_v38 = vld [vmem:[%s1836_s7 + $0x70] sm:$0xff]  ;;  %v1549_v42 = vld [vmem:[%s1836_s7 + $0x68] sm:$0xff] }
  0x51   : > { %v1559_v35 = vld [vmem:[%s1836_s7 + $0xb8] sm:$0xff]  ;;  %868 = vmatpush.bf16.msra.mxu1 %v1551_v34  ;;  %v1558_v39 = vld [vmem:[%s1836_s7 + $0xb0] sm:$0xff]  ;;  %v1557_v43 = vld [vmem:[%s1836_s7 + $0xa8] sm:$0xff] }
  0x52   : > { %v1567_v36 = vld [vmem:[%s1836_s7 + $0xf8] sm:$0xff]  ;;  %917 = vmatpush.bf16.msra.mxu2 %v1559_v35  ;;  %v1566_v40 = vld [vmem:[%s1836_s7 + $0xf0] sm:$0xff]  ;;  %v1565_v44 = vld [vmem:[%s1836_s7 + $0xe8] sm:$0xff] }
  0x53   : > { %966 = vmatpush.bf16.msra.mxu3 %v1567_v36  ;;  %v1540_v45 = vld [vmem:[%s1836_s7 + $0x20] sm:$0xff]  ;;  %v1539_v49 = vld [vmem:[%s1836_s7 + $0x18] sm:$0xff]  ;;  %v1538_v53 = vld [vmem:[%s1836_s7 + $0x10] sm:$0xff] }
  0x54   : > { %820 = vmatpush.bf16.msra.mxu0 %v1542_v37  ;;  %v1548_v46 = vld [vmem:[%s1836_s7 + $0x60] sm:$0xff]  ;;  %v1547_v50 = vld [vmem:[%s1836_s7 + $0x58] sm:$0xff]  ;;  %v1546_v54 = vld [vmem:[%s1836_s7 + $0x50] sm:$0xff] }
  0x55   : > { %869 = vmatpush.bf16.msra.mxu1 %v1550_v38  ;;  %v1556_v47 = vld [vmem:[%s1836_s7 + $0xa0] sm:$0xff]  ;;  %v1555_v51 = vld [vmem:[%s1836_s7 + $0x98] sm:$0xff]  ;;  %v1554_v55 = vld [vmem:[%s1836_s7 + $0x90] sm:$0xff] }
  0x56   : > { %918 = vmatpush.bf16.msra.mxu2 %v1558_v39  ;;  %v1564_v48 = vld [vmem:[%s1836_s7 + $0xe0] sm:$0xff]  ;;  %v1563_v52 = vld [vmem:[%s1836_s7 + $0xd8] sm:$0xff]  ;;  %v1562_v56 = vld [vmem:[%s1836_s7 + $0xd0] sm:$0xff] }
  0x57   : > { %967 = vmatpush.bf16.msra.mxu3 %v1566_v40  ;;  %v1537_v57 = vld [vmem:[%s1836_s7 + $0x8] sm:$0xff]  ;;  %v1536_v61 = vld [vmem:[%s1836_s7] sm:$0xff]  ;;  %v1506_v2 = vld [vmem:[%s1838_s8 + $0xc] sm:$0xf0] }
  0x58   : > { %821 = vmatpush.bf16.msra.mxu0 %v1541_v41  ;;  %v1545_v58 = vld [vmem:[%s1836_s7 + $0x48] sm:$0xff]  ;;  %v1544_v62 = vld [vmem:[%s1836_s7 + $0x40] sm:$0xff]  ;;  %v1246_v4 = vld [vmem:[%s1838_s8 + $0x10] sm:$0xf0] }
  0x59   : > { %870 = vmatpush.bf16.msra.mxu1 %v1549_v42  ;;  %v1553_v59 = vld [vmem:[%s1836_s7 + $0x88] sm:$0xff]  ;;  %v1552_v63 = vld [vmem:[%s1836_s7 + $0x80] sm:$0xff]  ;;  %v1507_v6 = vld [vmem:[%s1838_s8 + $0x14] sm:$0xf0] }
  0x5a   : > { %919 = vmatpush.bf16.msra.mxu2 %v1557_v43  ;;  %v1561_v60 = vld [vmem:[%s1836_s7 + $0xc8] sm:$0xff]  ;;  %v1560_v0 = vld [vmem:[%s1836_s7 + $0xc0] sm:$0xff]  ;;  %v1254_v8 = vld [vmem:[%s1838_s8 + $0x18] sm:$0xf0] }
  0x5b   : > { %968 = vmatpush.bf16.msra.mxu3 %v1565_v44  ;;  %v1244_v1 = vld [vmem:[%s1838_s8] sm:$0xf]  ;;  %v1504_v3 = vld [vmem:[%s1838_s8 + $0x4] sm:$0xf]  ;;  %v1252_v5 = vld [vmem:[%s1838_s8 + $0x8] sm:$0xf] }
  0x5c   : > { %822 = vmatpush.bf16.msra.mxu0 %v1540_v45  ;;  %v1505_v7 = vld [vmem:[%s1838_s8 + $0xc] sm:$0xf]  ;;  %v1245_v9 = vor.u32 %v1506_v2, %v1244_v1  ;;  %v1249_v10 = vor.u32 %v1504_v3, %v1246_v4  ;;  %v1253_v11 = vor.u32 %v1507_v6, %v1252_v5  ;;  %v1260_v13 = vld [vmem:[%s1838_s8 + $0x20] sm:$0xf]  ;;  %v1510_v14 = vld [vmem:[%s1838_s8 + $0x2c] sm:$0xf0] }
  0x5d   : > { %871 = vmatpush.bf16.msra.mxu1 %v1548_v46  ;;  %v1257_v12 = vor.u32 %v1505_v7, %v1254_v8  ;;  %v1508_v15 = vld [vmem:[%s1838_s8 + $0x24] sm:$0xf]  ;;  %v1262_v16 = vld [vmem:[%s1838_s8 + $0x30] sm:$0xf0]  ;;  %v1268_v17 = vld [vmem:[%s1838_s8 + $0x28] sm:$0xf]  ;;  %v1261_v21 = vor.u32 %v1510_v14, %v1260_v13 }
  0x5e   : > { %920 = vmatpush.bf16.msra.mxu2 %v1556_v47  ;;  %v1511_v18 = vld [vmem:[%s1838_s8 + $0x34] sm:$0xf0]  ;;  %v1509_v19 = vld [vmem:[%s1838_s8 + $0x2c] sm:$0xf]  ;;  %v1270_v20 = vld [vmem:[%s1838_s8 + $0x38] sm:$0xf0]  ;;  %v1265_v22 = vor.u32 %v1508_v15, %v1262_v16 }
  0x5f   : > { %969 = vmatpush.bf16.msra.mxu3 %v1564_v48  ;;  %v1269_v23 = vor.u32 %v1511_v18, %v1268_v17  ;;  %v1273_v24 = vor.u32 %v1509_v19, %v1270_v20  ;;  %v1276_v25 = vld [vmem:[%s1838_s8 + $0x40] sm:$0xf]  ;;  %v1514_v26 = vld [vmem:[%s1838_s8 + $0x4c] sm:$0xf0]  ;;  %v1512_v27 = vld [vmem:[%s1838_s8 + $0x44] sm:$0xf] }
  0x60   : > { %823 = vmatpush.bf16.msra.mxu0 %v1539_v49  ;;  %v1278_v28 = vld [vmem:[%s1838_s8 + $0x50] sm:$0xf0]  ;;  %v1284_v29 = vld [vmem:[%s1838_s8 + $0x48] sm:$0xf]  ;;  %v1515_v30 = vld [vmem:[%s1838_s8 + $0x54] sm:$0xf0]  ;;  %v1277_v33 = vor.u32 %v1514_v26, %v1276_v25 }
  0x61   : > { %872 = vmatpush.bf16.msra.mxu1 %v1547_v50  ;;  %v1513_v31 = vld [vmem:[%s1838_s8 + $0x4c] sm:$0xf]  ;;  %v1286_v32 = vld [vmem:[%s1838_s8 + $0x58] sm:$0xf0]  ;;  %v1281_v34 = vor.u32 %v1512_v27, %v1278_v28  ;;  %v1285_v35 = vor.u32 %v1515_v30, %v1284_v29  ;;  %v1292_v37 = vld [vmem:[%s1838_s8 + $0x60] sm:$0xf] }
  0x62   : > { %921 = vmatpush.bf16.msra.mxu2 %v1555_v51  ;;  %v1289_v36 = vor.u32 %v1513_v31, %v1286_v32  ;;  %v1518_v38 = vld [vmem:[%s1838_s8 + $0x6c] sm:$0xf0]  ;;  %v1516_v39 = vld [vmem:[%s1838_s8 + $0x64] sm:$0xf]  ;;  %v1294_v40 = vld [vmem:[%s1838_s8 + $0x70] sm:$0xf0] }
  0x63   : > { %970 = vmatpush.bf16.msra.mxu3 %v1563_v52  ;;  %v1300_v41 = vld [vmem:[%s1838_s8 + $0x68] sm:$0xf]  ;;  %v1519_v42 = vld [vmem:[%s1838_s8 + $0x74] sm:$0xf0]  ;;  %v1517_v43 = vld [vmem:[%s1838_s8 + $0x6c] sm:$0xf]  ;;  %v1293_v45 = vor.u32 %v1518_v38, %v1292_v37  ;;  %v1297_v46 = vor.u32 %v1516_v39, %v1294_v40 }
  0x64   : > { %824 = vmatpush.bf16.msra.mxu0 %v1538_v53  ;;  %v1302_v44 = vld [vmem:[%s1838_s8 + $0x78] sm:$0xf0]  ;;  %v1301_v47 = vor.u32 %v1519_v42, %v1300_v41  ;;  %v1308_v49 = vld [vmem:[%s1838_s8 + $0x80] sm:$0xf]  ;;  %v1522_v50 = vld [vmem:[%s1838_s8 + $0x8c] sm:$0xf0] }
  0x65   : > { %873 = vmatpush.bf16.msra.mxu1 %v1546_v54  ;;  %v1305_v48 = vor.u32 %v1517_v43, %v1302_v44  ;;  %v1520_v51 = vld [vmem:[%s1838_s8 + $0x84] sm:$0xf]  ;;  %v1310_v52 = vld [vmem:[%s1838_s8 + $0x90] sm:$0xf0]  ;;  %v1316_v53 = vld [vmem:[%s1838_s8 + $0x88] sm:$0xf] }
  0x66   : > { %922 = vmatpush.bf16.msra.mxu2 %v1554_v55  ;;  %v1523_v54 = vld [vmem:[%s1838_s8 + $0x94] sm:$0xf0]  ;;  %v1521_v55 = vld [vmem:[%s1838_s8 + $0x8c] sm:$0xf]  ;;  %v1332_v1 = vld [vmem:[%s1838_s8 + $0xa8] sm:$0xf] }
  0x67   : > { %971 = vmatpush.bf16.msra.mxu3 %v1562_v56  ;;  %v1318_v56 = vld [vmem:[%s1838_s8 + $0x98] sm:$0xf0]  ;;  %v1527_v2 = vld [vmem:[%s1838_s8 + $0xb4] sm:$0xf0]  ;;  %v1525_v3 = vld [vmem:[%s1838_s8 + $0xac] sm:$0xf] }
  0x68   : > { %825 = vmatpush.bf16.msra.mxu0 %v1537_v57  ;;  %v1309_v57 = vor.u32 %v1522_v50, %v1308_v49  ;;  %v1334_v4 = vld [vmem:[%s1838_s8 + $0xb8] sm:$0xf0]  ;;  %v1333_v7 = vor.u32 %v1527_v2, %v1332_v1  ;;  %v1348_v13 = vld [vmem:[%s1838_s8 + $0xc8] sm:$0xf]  ;;  %v1531_v14 = vld [vmem:[%s1838_s8 + $0xd4] sm:$0xf0] }
  0x69   : > { %874 = vmatpush.bf16.msra.mxu1 %v1545_v58  ;;  %v1313_v58 = vor.u32 %v1520_v51, %v1310_v52  ;;  %v1337_v8 = vor.u32 %v1525_v3, %v1334_v4  ;;  %v1529_v15 = vld [vmem:[%s1838_s8 + $0xcc] sm:$0xf]  ;;  %v1350_v16 = vld [vmem:[%s1838_s8 + $0xd8] sm:$0xf0]  ;;  %v1349_v19 = vor.u32 %v1531_v14, %v1348_v13  ;;  %v1364_v25 = vld [vmem:[%s1838_s8 + $0xe8] sm:$0xf] }
  0x6a   : > { %923 = vmatpush.bf16.msra.mxu2 %v1553_v59  ;;  %v1317_v59 = vor.u32 %v1523_v54, %v1316_v53  ;;  %v1353_v20 = vor.u32 %v1529_v15, %v1350_v16  ;;  %v1535_v26 = vld [vmem:[%s1838_s8 + $0xf4] sm:$0xf0]  ;;  %v1533_v27 = vld [vmem:[%s1838_s8 + $0xec] sm:$0xf]  ;;  %v1366_v28 = vld [vmem:[%s1838_s8 + $0xf8] sm:$0xf0] }
  0x6b   : > { %972 = vmatpush.bf16.msra.mxu3 %v1561_v60  ;;  %v1321_v60 = vor.u32 %v1521_v55, %v1318_v56  ;;  %v1365_v31 = vor.u32 %v1535_v26, %v1364_v25  ;;  %v1369_v32 = vor.u32 %v1533_v27, %v1366_v28  ;;  %v355_v41 = vld [vmem:[#allocation2 + $0x30] sm:$0xff]  ;;  %v356_v50 = vld [vmem:[#allocation2] sm:$0xff]  ;;  %v358_v4 = vld [vmem:[#allocation2 + $0x18] sm:$0xff] }
  0x6c   : > { %826 = vmatpush.bf16.msra.mxu0 %v1536_v61  ;;  %v1324_v61 = vld [vmem:[%s1838_s8 + $0xa0] sm:$0xf]  ;;  %v359_v13 = vld [vmem:[#allocation2 + $0x50] sm:$0xff] }
  0x6d   : > { %875 = vmatpush.bf16.msra.mxu1 %v1544_v62  ;;  %v1526_v62 = vld [vmem:[%s1838_s8 + $0xac] sm:$0xf0] }
  0x6e   : > { %924 = vmatpush.bf16.msra.mxu2 %v1552_v63  ;;  %v1524_v63 = vld [vmem:[%s1838_s8 + $0xa4] sm:$0xf]  ;;  %v1325_v5 = vor.u32 %v1526_v62, %v1324_v61 }
  0x6f   : > { %973 = vmatpush.bf16.msra.mxu3 %v1560_v0  ;;  %827 = vmatmul.bf16.vlgmr.msra.gmra.mxu0 %v1245_v9  ;;  %v1326_v0 = vld [vmem:[%s1838_s8 + $0xb0] sm:$0xf0]  ;;  %v1340_v9 = vld [vmem:[%s1838_s8 + $0xc0] sm:$0xf] }
  0x70   : > { %876 = vmatmul.bf16.vlgmr.msra.gmra.mxu1 %v1249_v10  ;;  %v1329_v6 = vor.u32 %v1524_v63, %v1326_v0  ;;  %v1530_v10 = vld [vmem:[%s1838_s8 + $0xcc] sm:$0xf0] }
  0x71   : > { %925 = vmatmul.bf16.vlgmr.msra.gmra.mxu2 %v1253_v11  ;;  %v1528_v11 = vld [vmem:[%s1838_s8 + $0xc4] sm:$0xf]  ;;  %v1341_v17 = vor.u32 %v1530_v10, %v1340_v9 }
  0x72   : > { %974 = vmatmul.bf16.vlgmr.msra.gmra.mxu3 %v1257_v12  ;;  %v1342_v12 = vld [vmem:[%s1838_s8 + $0xd0] sm:$0xf0] }
  0x73   : > { %v1345_v18 = vor.u32 %v1528_v11, %v1342_v12 }
  0x7f   : > { %832 = vmatmul.bf16.gmra.mxu0 %v1261_v21  ;;  %v1356_v21 = vld [vmem:[%s1838_s8 + $0xe0] sm:$0xf] }
  0x80   : > { %881 = vmatmul.bf16.gmra.mxu1 %v1265_v22  ;;  %v1534_v22 = vld [vmem:[%s1838_s8 + $0xec] sm:$0xf0] }
  0x81   : > { %930 = vmatmul.bf16.gmra.mxu2 %v1269_v23  ;;  %v1532_v23 = vld [vmem:[%s1838_s8 + $0xe4] sm:$0xf]  ;;  %v1357_v29 = vor.u32 %v1534_v22, %v1356_v21  ;;  %v360_v22 = vld [vmem:[#allocation2 + $0x68] sm:$0xff] }
  0x82   : > { %979 = vmatmul.bf16.gmra.mxu3 %v1273_v24  ;;  %v1358_v24 = vld [vmem:[%s1838_s8 + $0xf0] sm:$0xf0] }
  0x83   : > { %v1361_v30 = vor.u32 %v1532_v23, %v1358_v24 }
  0x8f   : > { %837 = vmatmul.bf16.gmra.mxu0 %v1277_v33 }
  0x90   : > { %886 = vmatmul.bf16.gmra.mxu1 %v1281_v34 }
  0x91   : > { %935 = vmatmul.bf16.gmra.mxu2 %v1285_v35 }
  0x92   : > { %984 = vmatmul.bf16.gmra.mxu3 %v1289_v36 }
  0x9f   : > { %842 = vmatmul.bf16.gmra.mxu0 %v1293_v45 }
  0xa0   : > { %891 = vmatmul.bf16.gmra.mxu1 %v1297_v46 }
  0xa1   : > { %940 = vmatmul.bf16.gmra.mxu2 %v1301_v47 }
  0xa2   : > { %989 = vmatmul.bf16.gmra.mxu3 %v1305_v48 }
  0xaf   : > { %847 = vmatmul.bf16.gmra.mxu0 %v1309_v57 }
  0xb0   : > { %896 = vmatmul.bf16.gmra.mxu1 %v1313_v58 }
  0xb1   : > { %945 = vmatmul.bf16.gmra.mxu2 %v1317_v59  ;;  %v357_v59 = vld [vmem:[#allocation2 + $0x58] sm:$0xff] }
  0xb2   : > { %994 = vmatmul.bf16.gmra.mxu3 %v1321_v60 }
  0xbf   : > { %852 = vmatmul.bf16.gmra.mxu0 %v1325_v5 }
  0xc0   : > { %901 = vmatmul.bf16.gmra.mxu1 %v1329_v6 }
  0xc1   : > { %950 = vmatmul.bf16.gmra.mxu2 %v1333_v7 }
  0xc2   : > { %999 = vmatmul.bf16.gmra.mxu3 %v1337_v8 }
  0xcf   : > { %857 = vmatmul.bf16.gmra.mxu0 %v1341_v17 }
  0xd0   : > { %906 = vmatmul.bf16.gmra.mxu1 %v1345_v18 }
  0xd1   : > { %955 = vmatmul.bf16.gmra.mxu2 %v1349_v19 }
  0xd2   : > { %1004 = vmatmul.bf16.gmra.mxu3 %v1353_v20 }
  0xdf   : > { %862 = vmatmul.bf16.gmra.mxu0 %v1357_v29 }
  0xe0   : > { %911 = vmatmul.bf16.gmra.mxu1 %v1361_v30 }
  0xe1   : > { %960 = vmatmul.bf16.gmra.mxu2 %v1365_v31  ;;  %v361_v31 = vld [vmem:[#allocation2 + $0x8] sm:$0xff] }
  0xe2   : > { %1009 = vmatmul.bf16.gmra.mxu3 %v1369_v32 }
  0xec   : > { %v828_v33 = vpop.f32.mrf.mxu0 }
  0xed   : > { %v877_v34 = vpop.f32.mrf.mxu1 }
  0xee   : > { %v878_v35 = vadd.f32 %v877_v34, %v828_v33 }
  0xf4   : > { %v926_v36 = vpop.f32.mrf.mxu2  ;;  %v830_v39 = vpop.f32.mrf.mxu0 }
  0xf5   : > { %v975_v37 = vpop.f32.mrf.mxu3  ;;  %v927_v38 = vadd.f32 %v926_v36, %v878_v35  ;;  %v879_v40 = vpop.f32.mrf.mxu1 }
  0xf6   : > { %v880_v44 = vadd.f32 %v879_v40, %v830_v39  ;;  %v362_v40 = vld [vmem:[#allocation2 + $0x48] sm:$0xff] }
  0xf7   : > { %v976_v42 = vadd.f32 %v975_v37, %v927_v38 }
  0xf9   : > { %v1015_v43 = vadd.f32 %v976_v42, %v355_v41 }
  0xfb   : > { %1031 = vst [vmem:[#allocation2 + $0x30] sm:$0xff] %v1015_v43 }
  0xfc   : > { %v928_v45 = vpop.f32.mrf.mxu2  ;;  %v833_v48 = vpop.f32.mrf.mxu0 }
  0xfd   : > { %v977_v46 = vpop.f32.mrf.mxu3  ;;  %v929_v47 = vadd.f32 %v928_v45, %v880_v44  ;;  %v882_v49 = vpop.f32.mrf.mxu1 }
  0xfe   : > { %v883_v53 = vadd.f32 %v882_v49, %v833_v48  ;;  %v363_v49 = vld [vmem:[#allocation2 + $0x40] sm:$0xff] }
  0xff   : > { %v978_v51 = vadd.f32 %v977_v46, %v929_v47 }
 0x101   : > { %v1016_v52 = vadd.f32 %v978_v51, %v356_v50 }
 0x103   : > { %1032 = vst [vmem:[#allocation2] sm:$0xff] %v1016_v52 }
 0x104   : > { %v931_v54 = vpop.f32.mrf.mxu2  ;;  %v835_v57 = vpop.f32.mrf.mxu0 }
 0x105   : > { %v980_v55 = vpop.f32.mrf.mxu3  ;;  %v932_v56 = vadd.f32 %v931_v54, %v883_v53  ;;  %v884_v58 = vpop.f32.mrf.mxu1 }
 0x106   : > { %v885_v62 = vadd.f32 %v884_v58, %v835_v57  ;;  %v364_v58 = vld [vmem:[#allocation2 + $0x20] sm:$0xff] }
 0x107   : > { %v981_v60 = vadd.f32 %v980_v55, %v932_v56 }
 0x109   : > { %v1017_v61 = vadd.f32 %v981_v60, %v357_v59 }
 0x10b   : > { %1033 = vst [vmem:[#allocation2 + $0x58] sm:$0xff] %v1017_v61 }
 0x10c   : > { %v933_v63 = vpop.f32.mrf.mxu2  ;;  %v838_v2 = vpop.f32.mrf.mxu0 }
 0x10d   : > { %v982_v0 = vpop.f32.mrf.mxu3  ;;  %v934_v1 = vadd.f32 %v933_v63, %v885_v62  ;;  %v887_v3 = vpop.f32.mrf.mxu1 }
 0x10e   : > { %v888_v7 = vadd.f32 %v887_v3, %v838_v2  ;;  %v365_v3 = vld [vmem:[#allocation2 + $0x10] sm:$0xff] }
 0x10f   : > { %v983_v5 = vadd.f32 %v982_v0, %v934_v1 }
 0x111   : > { %v1018_v6 = vadd.f32 %v983_v5, %v358_v4 }
 0x113   : > { %1034 = vst [vmem:[#allocation2 + $0x18] sm:$0xff] %v1018_v6 }
 0x114   : > { %v936_v8 = vpop.f32.mrf.mxu2  ;;  %v840_v11 = vpop.f32.mrf.mxu0 }
 0x115   : > { %v985_v9 = vpop.f32.mrf.mxu3  ;;  %v937_v10 = vadd.f32 %v936_v8, %v888_v7  ;;  %v889_v12 = vpop.f32.mrf.mxu1 }
 0x116   : > { %v890_v16 = vadd.f32 %v889_v12, %v840_v11  ;;  %v366_v12 = vld [vmem:[#allocation2 + $0x38] sm:$0xff] }
 0x117   : > { %v986_v14 = vadd.f32 %v985_v9, %v937_v10 }
 0x119   : > { %v1019_v15 = vadd.f32 %v986_v14, %v359_v13 }
 0x11b   : > { %1035 = vst [vmem:[#allocation2 + $0x50] sm:$0xff] %v1019_v15 }
 0x11c   : > { %v938_v17 = vpop.f32.mrf.mxu2  ;;  %v843_v20 = vpop.f32.mrf.mxu0 }
 0x11d   : > { %v987_v18 = vpop.f32.mrf.mxu3  ;;  %v939_v19 = vadd.f32 %v938_v17, %v890_v16  ;;  %v892_v21 = vpop.f32.mrf.mxu1 }
 0x11e   : > { %v893_v25 = vadd.f32 %v892_v21, %v843_v20  ;;  %v367_v21 = vld [vmem:[#allocation2 + $0x60] sm:$0xff] }
 0x11f   : > { %v988_v23 = vadd.f32 %v987_v18, %v939_v19 }
 0x121   : > { %v1020_v24 = vadd.f32 %v988_v23, %v360_v22 }
 0x123   : > { %1036 = vst [vmem:[#allocation2 + $0x68] sm:$0xff] %v1020_v24 }
 0x124   : > { %v941_v26 = vpop.f32.mrf.mxu2  ;;  %v845_v29 = vpop.f32.mrf.mxu0 }
 0x125   : > { %v990_v27 = vpop.f32.mrf.mxu3  ;;  %v942_v28 = vadd.f32 %v941_v26, %v893_v25  ;;  %v894_v30 = vpop.f32.mrf.mxu1 }
 0x126   : > { %v895_v34 = vadd.f32 %v894_v30, %v845_v29 }
 0x127   : > { %v991_v32 = vadd.f32 %v990_v27, %v942_v28  ;;  %v368_v28 = vld [vmem:[#allocation2 + $0x70] sm:$0xff] }
 0x129   : > { %v1021_v33 = vadd.f32 %v991_v32, %v361_v31 }
 0x12b   : > { %1037 = vst [vmem:[#allocation2 + $0x8] sm:$0xff] %v1021_v33 }
 0x12c   : > { %v943_v35 = vpop.f32.mrf.mxu2  ;;  %v848_v38 = vpop.f32.mrf.mxu0 }
 0x12d   : > { %v992_v36 = vpop.f32.mrf.mxu3  ;;  %v944_v37 = vadd.f32 %v943_v35, %v895_v34  ;;  %v897_v39 = vpop.f32.mrf.mxu1 }
 0x12e   : > { %v898_v43 = vadd.f32 %v897_v39, %v848_v38 }
 0x12f   : > { %v993_v41 = vadd.f32 %v992_v36, %v944_v37  ;;  %v369_v37 = vld [vmem:[#allocation2 + $0x78] sm:$0xff] }
 0x131   : > { %v1022_v42 = vadd.f32 %v993_v41, %v362_v40 }
 0x133   : > { %1038 = vst [vmem:[#allocation2 + $0x48] sm:$0xff] %v1022_v42 }
 0x134   : > { %v946_v44 = vpop.f32.mrf.mxu2  ;;  %v850_v47 = vpop.f32.mrf.mxu0 }
 0x135   : > { %v995_v45 = vpop.f32.mrf.mxu3  ;;  %v947_v46 = vadd.f32 %v946_v44, %v898_v43  ;;  %v899_v48 = vpop.f32.mrf.mxu1 }
 0x136   : > { %v900_v52 = vadd.f32 %v899_v48, %v850_v47 }
 0x137   : > { %v996_v50 = vadd.f32 %v995_v45, %v947_v46  ;;  %v370_v45 = vld [vmem:[#allocation2 + $0x28] sm:$0xff] }
 0x139   : > { %v1023_v51 = vadd.f32 %v996_v50, %v363_v49 }
 0x13b   : > { %1039 = vst [vmem:[#allocation2 + $0x40] sm:$0xff] %v1023_v51 }
 0x13c   : > { %v948_v53 = vpop.f32.mrf.mxu2  ;;  %v853_v56 = vpop.f32.mrf.mxu0 }
 0x13d   : > { %v997_v54 = vpop.f32.mrf.mxu3  ;;  %v949_v55 = vadd.f32 %v948_v53, %v900_v52  ;;  %v902_v57 = vpop.f32.mrf.mxu1 }
 0x13e   : > { %v903_v61 = vadd.f32 %v902_v57, %v853_v56 }
 0x13f   : > { %v998_v59 = vadd.f32 %v997_v54, %v949_v55 }
 0x141   : > { %v1024_v60 = vadd.f32 %v998_v59, %v364_v58 }
 0x143   : > { %1040 = vst [vmem:[#allocation2 + $0x20] sm:$0xff] %v1024_v60 }
 0x144   : > { %v951_v62 = vpop.f32.mrf.mxu2  ;;  %v855_v1 = vpop.f32.mrf.mxu0 }
 0x145   : > { %v1000_v63 = vpop.f32.mrf.mxu3  ;;  %v952_v0 = vadd.f32 %v951_v62, %v903_v61  ;;  %v904_v2 = vpop.f32.mrf.mxu1 }
 0x146   : > { %v905_v6 = vadd.f32 %v904_v2, %v855_v1 }
 0x147   : > { %v1001_v4 = vadd.f32 %v1000_v63, %v952_v0 }
 0x149   : > { %v1025_v5 = vadd.f32 %v1001_v4, %v365_v3 }
 0x14b   : > { %1041 = vst [vmem:[#allocation2 + $0x10] sm:$0xff] %v1025_v5 }
 0x14c   : > { %v953_v7 = vpop.f32.mrf.mxu2  ;;  %v858_v10 = vpop.f32.mrf.mxu0 }
 0x14d   : > { %v1002_v8 = vpop.f32.mrf.mxu3  ;;  %v954_v9 = vadd.f32 %v953_v7, %v905_v6  ;;  %v907_v11 = vpop.f32.mrf.mxu1 }
 0x14e   : > { %v908_v15 = vadd.f32 %v907_v11, %v858_v10 }
 0x14f   : > { %v1003_v13 = vadd.f32 %v1002_v8, %v954_v9 }
 0x151   : > { %v1026_v14 = vadd.f32 %v1003_v13, %v366_v12 }
 0x153   : > { %1042 = vst [vmem:[#allocation2 + $0x38] sm:$0xff] %v1026_v14 }
 0x154   : > { %v956_v16 = vpop.f32.mrf.mxu2  ;;  %v860_v19 = vpop.f32.mrf.mxu0 }
 0x155   : > { %v1005_v17 = vpop.f32.mrf.mxu3  ;;  %v957_v18 = vadd.f32 %v956_v16, %v908_v15  ;;  %v909_v20 = vpop.f32.mrf.mxu1 }
 0x156   : > { %v910_v24 = vadd.f32 %v909_v20, %v860_v19 }
 0x157   : > { %v1006_v22 = vadd.f32 %v1005_v17, %v957_v18 }
 0x159   : > { %v1027_v23 = vadd.f32 %v1006_v22, %v367_v21 }
 0x15b   : > { %1043 = vst [vmem:[#allocation2 + $0x60] sm:$0xff] %v1027_v23 }
 0x15c   : > { %v958_v25 = vpop.f32.mrf.mxu2  ;;  %v863_v29 = vpop.f32.mrf.mxu0 }
 0x15d   : > { %v1007_v26 = vpop.f32.mrf.mxu3  ;;  %v959_v27 = vadd.f32 %v958_v25, %v910_v24  ;;  %v912_v30 = vpop.f32.mrf.mxu1 }
 0x15e   : > { %v913_v33 = vadd.f32 %v912_v30, %v863_v29 }
 0x15f   : > { %v1008_v31 = vadd.f32 %v1007_v26, %v959_v27 }
 0x161   : > { %v1028_v32 = vadd.f32 %v1008_v31, %v368_v28 }
 0x163   : > { %1044 = vst [vmem:[#allocation2 + $0x70] sm:$0xff] %v1028_v32 }
 0x164   : > { %v961_v34 = vpop.f32.mrf.mxu2  ;;  %v865_v39 = vpop.f32.mrf.mxu0 }
 0x165   : > { %v1010_v35 = vpop.f32.mrf.mxu3  ;;  %v962_v36 = vadd.f32 %v961_v34, %v913_v33  ;;  %v914_v40 = vpop.f32.mrf.mxu1 }
 0x166   : > { %v915_v42 = vadd.f32 %v914_v40, %v865_v39 }
 0x167   : > { %v1011_v38 = vadd.f32 %v1010_v35, %v962_v36 }
 0x169   : > { %v1029_v41 = vadd.f32 %v1011_v38, %v369_v37 }
 0x16b   : > { %1045 = vst [vmem:[#allocation2 + $0x78] sm:$0xff] %v1029_v41 }
 0x16c   : > { %v963_v43 = vpop.f32.mrf.mxu2 }
 0x16d   : > { %v964_v44 = vadd.f32 %v963_v43, %v915_v42  ;;  %v1012_v46 = vpop.f32.mrf.mxu3 }
 0x16f   : > { %v1013_v47 = vadd.f32 %v1012_v46, %v964_v44  ;;  %1050 = sbr.rel (%p1498_p11) target bundleno = 386 (0x182), region = 63 }
 0x171   : > { %v1030_v48 = vadd.f32 %v1013_v47, %v370_v45 }
 0x173   : > { %1046 = vst [vmem:[#allocation2 + $0x28] sm:$0xff] %v1030_v48 }
 0x174   : > { %v1051_v49 = vld [vmem:[#allocation2 + $0x30] sm:$0xff]  ;;  %v1052_v50 = vld [vmem:[#allocation2] sm:$0xff]  ;;  %v1053_v52 = vld [vmem:[#allocation2 + $0x58] sm:$0xff] }
 0x175   : > { %v1656_v51 = vld [vmem:[%s1982_s2] ss:$0 sm:$0xff]  ;;  %v1054_v53 = vld [vmem:[#allocation2 + $0x18] sm:$0xff]  ;;  %v1055_v54 = vld [vmem:[#allocation2 + $0x50] sm:$0xff] }
 0x176   : > { %v1056_v55 = vld [vmem:[#allocation2 + $0x68] sm:$0xff]  ;;  %v1071_v57 = vadd.f32 %v1656_v51, %v1051_v49  ;;  %v1072_v58 = vadd.f32 %v1656_v51, %v1052_v50  ;;  %v1073_v59 = vadd.f32 %v1656_v51, %v1053_v52  ;;  %v1074_v60 = vadd.f32 %v1656_v51, %v1054_v53  ;;  %v1059_v62 = vld [vmem:[#allocation2 + $0x40] sm:$0xff]  ;;  %v1061_v4 = vld [vmem:[#allocation2 + $0x10] sm:$0xff] }
 0x177   : > { %v1057_v56 = vld [vmem:[#allocation2 + $0x8] sm:$0xff]  ;;  %v1060_v63 = vld [vmem:[#allocation2 + $0x20] sm:$0xff]  ;;  %v1075_v0 = vadd.f32 %v1656_v51, %v1055_v54  ;;  %v1076_v1 = vadd.f32 %v1656_v51, %v1056_v55  ;;  %v1062_v5 = vld [vmem:[#allocation2 + $0x38] sm:$0xff]  ;;  %v1079_v9 = vadd.f32 %v1656_v51, %v1059_v62  ;;  %v1081_v16 = vadd.f32 %v1656_v51, %v1061_v4 }
 0x178   : > { %v1058_v61 = vld [vmem:[#allocation2 + $0x48] sm:$0xff]  ;;  %v1077_v2 = vadd.f32 %v1656_v51, %v1057_v56  ;;  %v1063_v6 = vld [vmem:[#allocation2 + $0x60] sm:$0xff]  ;;  %v1571_v7 = vpack.c.bf16 %v1072_v58, %v1071_v57  ;;  %v1576_v8 = vpack.c.bf16 %v1074_v60, %v1073_v59  ;;  %v1080_v10 = vadd.f32 %v1656_v51, %v1060_v63  ;;  %v1064_v11 = vld [vmem:[#allocation2 + $0x70] sm:$0xff] }
 0x179   : > { %v1078_v3 = vadd.f32 %v1656_v51, %v1058_v61  ;;  %v1065_v12 = vld [vmem:[#allocation2 + $0x78] sm:$0xff]  ;;  %v1581_v14 = vpack.c.bf16 %v1076_v1, %v1075_v0  ;;  %v1082_v17 = vadd.f32 %v1656_v51, %v1062_v5  ;;  %v1083_v19 = vadd.f32 %v1656_v51, %v1063_v6 }
 0x17a   : > { %v1066_v13 = vld [vmem:[#allocation2 + $0x28] sm:$0xff]  ;;  %1572 = vst [vmem:[%s1983_s3] sm:$0xff] %v1571_v7   ;;  %v1591_v18 = vpack.c.bf16 %v1080_v10, %v1079_v9  ;;  %v1084_v20 = vadd.f32 %v1656_v51, %v1064_v11  ;;  %v1085_v21 = vadd.f32 %v1656_v51, %v1065_v12 }
 0x17b   : > { %v1586_v15 = vpack.c.bf16 %v1078_v3, %v1077_v2  ;;  %1608 = vst [vmem:[%s1983_s3 + $0x8] sm:$0xff] %v1576_v8   ;;  %v1596_v22 = vpack.c.bf16 %v1082_v17, %v1081_v16  ;;  %v1086_v23 = vadd.f32 %v1656_v51, %v1066_v13 }
 0x17c   : > { %1609 = vst [vmem:[%s1983_s3 + $0x10] sm:$0xff] %v1581_v14   ;;  %v1601_v24 = vpack.c.bf16 %v1084_v20, %v1083_v19 }
 0x17d   : > { %1610 = vst [vmem:[%s1983_s3 + $0x18] sm:$0xff] %v1586_v15   ;;  %v1606_v25 = vpack.c.bf16 %v1086_v23, %v1085_v21 }
 0x17e   : > { %1611 = vst [vmem:[%s1983_s3 + $0x20] sm:$0xff] %v1591_v18  }
 0x17f   : > { %1612 = vst [vmem:[%s1983_s3 + $0x28] sm:$0xff] %v1596_v22  }
 0x180   : > { %1613 = vst [vmem:[%s1983_s3 + $0x30] sm:$0xff] %v1601_v24  }
 0x181   : > { %1614 = vst [vmem:[%s1983_s3 + $0x38] sm:$0xff] %v1606_v25  }
 0x182 PF: > { %s13_s16 = sadd.s32 1, %s1695_s16   ;;  %s1984_s12 = smov %s1683_s13 }
 0x183   : > { %p10_p12 = scmp.ge.s32.totalorder %s13_s16, 4   ;;  %s1985_s13 = smov %s1753_s20 }
 0x184   : > { %s1986_s14 = smov %s1691_s15  ;;  %s1987_s15 = smov %s1989_s17 }
 0x185   :  { %12 = sbr.rel (!%p10_p12) target bundleno = 3 (0x3), region = 104 }

// kernel: discriminator_forward.10
= control target key start
LH: loop header
LB: loop body
LE: loop exit
PB: predicated region body
PF: predicated region fallthrough
CT: control target
= control target key end

     0   :  { %s476_s6 = smov 0   ;;  %s478_s7 = smov 0   ;;  %s516_s0 = inlined_call_operand.vmem [shape: bf16[2,64,128], index: 0, kind: input, shape index: {}]   ;;  %s517_s1 = inlined_call_operand.vmem [shape: bf16[2,64,128], index: 1, kind: output, shape index: {}]  }
   0x1   :  { %s480_s8 = smov 0  }
   0x2 LB: > { %s23_s9 = sadd.s32 1, %s459_s7  ;;  %p361_p0 = scmp.ge.s32.totalorder %s463_s8, 1  ;;  %s463_s8 = sphi %s480_s8, %s11_s8   ;;  %s459_s7 = sphi %s478_s7, %s519_s7   ;;  %s455_s6 = sphi %s476_s6, %s518_s6  }
   0x3   : > { %p25_p1 = scmp.ge.s32.totalorder %s23_s9, 2  ;;  %p106_p2 = scmp.lt.s32.totalorder %s463_s8, 3 }
   0x5   : > { %s521_s9 = smov (%p25_p1, %s23_s9), 0  ;;  %p107_p3 = pnand %p361_p0, %p106_p2 }
   0x6   : > { %p132_p4 = scmp.lt.s32.totalorder (!%p107_p3), %s455_s6, 1 }
   0x7   : > { %110 = sbr.rel (%p107_p3) target bundleno = 111 (0x6f), region = 24 }
   0xc   : > { %s523_s6 = smov (!%p132_p4, %s455_s6), 1  ;;  %v465_v5 = vmov 64.0  }
   0xd   : > { %s368_s10 = sshll.u32 %s523_s6, 5  ;;  %437 = vrcp.f32 %v465_v5 }
   0xe   : > { %s139_s13 = scalar_lea.vmem %s516_s0, %s368_s10  ;;  %s147_s16 = scalar_lea.vmem %s517_s1, %s368_s10 }
   0xf   : > { %v371_v0 = vld [vmem:[%s139_s13] sm:$0xff]   ;;  %v406_v1 = vld [vmem:[%s139_s13 + $0x8] sm:$0xff]   ;;  %v407_v6 = vld [vmem:[%s139_s13 + $0x10] sm:$0xff]  }
  0x10   : > { %v372_v2 = vunpack.c.l.bf16 %v371_v0  ;;  %v373_v3 = vunpack.c.h.bf16 %v371_v0  ;;  %v376_v4 = vunpack.c.l.bf16 %v406_v1  ;;  %v377_v7 = vunpack.c.h.bf16 %v406_v1  ;;  %v408_v11 = vld [vmem:[%s139_s13 + $0x18] sm:$0xff]  }
  0x11   : > { %v380_v9 = vunpack.c.l.bf16 %v407_v6  ;;  %v381_v13 = vunpack.c.h.bf16 %v407_v6  ;;  %v384_v15 = vunpack.c.l.bf16 %v408_v11  ;;  %v385_v18 = vunpack.c.h.bf16 %v408_v11 }
  0x12   : > { %v164_v8 = vadd.f32 %v373_v3, %v372_v2 }
  0x13   : > { %v438_v12 = vpop.eup %437 }
  0x14   : > { %v165_v10 = vadd.f32 %v376_v4, %v164_v8  ;;  %v178_v17 = vmul.f32 64.0, %v438_v12  ;;  %vm182_vm0 = vweird.f32 %v438_v12 }
  0x16   : > { %v166_v14 = vadd.f32 %v377_v7, %v165_v10  ;;  %v179_v21 = vsub.f32 1.0, %v178_v17 }
  0x18   : > { %v167_v16 = vadd.f32 %v380_v9, %v166_v14  ;;  %v180_v24 = vmul.f32 %v438_v12, %v179_v21 }
  0x1a   : > { %v168_v19 = vadd.f32 %v381_v13, %v167_v16  ;;  %v181_v27 = vadd.f32 %v438_v12, %v180_v24 }
  0x1c   : > { %v169_v20 = vadd.f32 %v384_v15, %v168_v19  ;;  %v183_v30 = vsel %vm182_vm0, %v438_v12, %v181_v27 }
  0x1e   : > { %v170_v22 = vadd.f32 %v385_v18, %v169_v20 }
  0x20   : > { %v171_v23 = vrot.slane %v170_v22, 4 }
  0x22   : > { %v172_v25 = vadd.f32 %v171_v23, %v170_v22 }
  0x24   : > { %v173_v26 = vrot.slane %v172_v25, 2 }
  0x26   : > { %v174_v28 = vadd.f32 %v173_v26, %v172_v25 }
  0x28   : > { %v175_v29 = vrot.slane %v174_v28, 1 }
  0x2a   : > { %v176_v31 = vadd.f32 %v175_v29, %v174_v28 }
  0x2c   : > { %v184_v32 = vmul.f32 %v183_v30, %v176_v31 }
  0x2e   : > { %v185_v33 = vsub.f32 %v372_v2, %v184_v32  ;;  %v186_v34 = vsub.f32 %v373_v3, %v184_v32  ;;  %v187_v35 = vsub.f32 %v376_v4, %v184_v32  ;;  %v188_v36 = vsub.f32 %v377_v7, %v184_v32 }
  0x2f   : > { %v189_v37 = vsub.f32 %v380_v9, %v184_v32  ;;  %v190_v41 = vsub.f32 %v381_v13, %v184_v32  ;;  %v191_v44 = vsub.f32 %v384_v15, %v184_v32  ;;  %v192_v47 = vsub.f32 %v385_v18, %v184_v32 }
  0x30   : > { %v193_v38 = vmul.f32 %v185_v33, %v185_v33  ;;  %v194_v39 = vmul.f32 %v186_v34, %v186_v34  ;;  %v195_v40 = vmul.f32 %v187_v35, %v187_v35  ;;  %v196_v42 = vmul.f32 %v188_v36, %v188_v36 }
  0x31   : > { %v197_v45 = vmul.f32 %v189_v37, %v189_v37  ;;  %v198_v48 = vmul.f32 %v190_v41, %v190_v41  ;;  %v199_v50 = vmul.f32 %v191_v44, %v191_v44  ;;  %v200_v52 = vmul.f32 %v192_v47, %v192_v47 }
  0x32   : > { %v201_v43 = vadd.f32 %v194_v39, %v193_v38 }
  0x34   : > { %v202_v46 = vadd.f32 %v201_v43, %v195_v40 }
  0x36   : > { %v203_v49 = vadd.f32 %v202_v46, %v196_v42 }
  0x38   : > { %v204_v51 = vadd.f32 %v203_v49, %v197_v45 }
  0x3a   : > { %v205_v53 = vadd.f32 %v204_v51, %v198_v48 }
  0x3c   : > { %v206_v54 = vadd.f32 %v205_v53, %v199_v50 }
  0x3e   : > { %v207_v55 = vadd.f32 %v206_v54, %v200_v52 }
  0x40   : > { %v208_v56 = vrot.slane %v207_v55, 4 }
  0x42   : > { %v209_v57 = vadd.f32 %v208_v56, %v207_v55 }
  0x44   : > { %v210_v58 = vrot.slane %v209_v57, 2 }
  0x46   : > { %v211_v59 = vadd.f32 %v210_v58, %v209_v57 }
  0x48   : > { %v212_v60 = vrot.slane %v211_v59, 1 }
  0x4a   : > { %v213_v61 = vadd.f32 %v212_v60, %v211_v59 }
  0x4c   : > { %v214_v62 = vmul.f32 %v213_v61, %v183_v30 }
  0x4e   : > { %v215_v63 = vadd.f32 1e-05, %v214_v62 }
  0x50   : > { %439 = vrsqrt.f32 %v215_v63  ;;  %vm222_vm1 = vweird.f32 %v215_v63 }
  0x56   : > { %v440_v0 = vpop.eup %439 }
  0x57   : > { %v217_v1 = vmul.f32 %v440_v0, %v215_v63  ;;  %vm223_vm2 = vweird.f32 %v440_v0 }
  0x58   : > { %vm224_vm3 = vmor %vm222_vm1, %vm223_vm2 }
  0x59   : > { %v218_v2 = vmul.f32 %v440_v0, %v217_v1 }
  0x5b   : > { %v219_v3 = vmul.f32 0.5, %v218_v2 }
  0x5d   : > { %v220_v4 = vsub.f32 1.5, %v219_v3 }
  0x5f   : > { %v221_v5 = vmul.f32 %v440_v0, %v220_v4 }
  0x61   : > { %v225_v6 = vsel %vm224_vm3, %v440_v0, %v221_v5 }
  0x62   : > { %v226_v7 = vmul.f32 %v225_v6, %v185_v33  ;;  %v227_v8 = vmul.f32 %v225_v6, %v186_v34  ;;  %v228_v9 = vmul.f32 %v225_v6, %v187_v35  ;;  %v229_v10 = vmul.f32 %v225_v6, %v188_v36 }
  0x63   : > { %v230_v11 = vmul.f32 %v225_v6, %v189_v37  ;;  %v231_v12 = vmul.f32 %v225_v6, %v190_v41  ;;  %v232_v13 = vmul.f32 %v225_v6, %v191_v44  ;;  %v233_v14 = vmul.f32 %v225_v6, %v192_v47 }
  0x64   : > { %vm234_vm4 = vcmp.gt.f32.partialorder %v226_v7, 0.0  ;;  %vm235_vm5 = vcmp.gt.f32.partialorder %v227_v8, 0.0  ;;  %v242_v15 = vmul.f32 0.2, %v226_v7  ;;  %v243_v16 = vmul.f32 0.2, %v227_v8 }
  0x65   : > { %vm236_vm6 = vcmp.gt.f32.partialorder %v228_v9, 0.0  ;;  %vm237_vm7 = vcmp.gt.f32.partialorder %v229_v10, 0.0  ;;  %v244_v17 = vmul.f32 0.2, %v228_v9  ;;  %v245_v18 = vmul.f32 0.2, %v229_v10 }
  0x66   : > { %v250_v19 = vsel %vm234_vm4, %v226_v7, %v242_v15  ;;  %v251_v20 = vsel %vm235_vm5, %v227_v8, %v243_v16  ;;  %vm238_vm8 = vcmp.gt.f32.partialorder %v230_v11, 0.0  ;;  %vm239_vm9 = vcmp.gt.f32.partialorder %v231_v12, 0.0 }
  0x67   : > { %v389_v21 = vpack.c.bf16 %v251_v20, %v250_v19  ;;  %v252_v22 = vsel %vm236_vm6, %v228_v9, %v244_v17  ;;  %v253_v23 = vsel %vm237_vm7, %v229_v10, %v245_v18  ;;  %v246_v24 = vmul.f32 0.2, %v230_v11 }
  0x68   : > { %v394_v25 = vpack.c.bf16 %v253_v23, %v252_v22  ;;  %v247_v26 = vmul.f32 0.2, %v231_v12  ;;  %vm240_vm10 = vcmp.gt.f32.partialorder %v232_v13, 0.0  ;;  %vm241_vm11 = vcmp.gt.f32.partialorder %v233_v14, 0.0 }
  0x69   : > { %390 = vst [vmem:[%s147_s16] sm:$0xff] %v389_v21   ;;  %v254_v27 = vsel %vm238_vm8, %v230_v11, %v246_v24  ;;  %v248_v28 = vmul.f32 0.2, %v232_v13  ;;  %v249_v29 = vmul.f32 0.2, %v233_v14 }
  0x6a   : > { %409 = vst [vmem:[%s147_s16 + $0x8] sm:$0xff] %v394_v25   ;;  %v255_v30 = vsel %vm239_vm9, %v231_v12, %v247_v26 }
  0x6b   : > { %v399_v31 = vpack.c.bf16 %v255_v30, %v254_v27  ;;  %v256_v32 = vsel %vm240_vm10, %v232_v13, %v248_v28  ;;  %v257_v33 = vsel %vm241_vm11, %v233_v14, %v249_v29 }
  0x6c   : > { %v404_v34 = vpack.c.bf16 %v257_v33, %v256_v32 }
  0x6d   : > { %410 = vst [vmem:[%s147_s16 + $0x10] sm:$0xff] %v399_v31  }
  0x6e   : > { %411 = vst [vmem:[%s147_s16 + $0x18] sm:$0xff] %v404_v34  }
  0x6f PF: > { %s11_s8 = sadd.s32 1, %s463_s8   ;;  %s518_s6 = smov %s459_s7 }
  0x70   : > { %p8_p5 = scmp.ge.s32.totalorder %s11_s8, 4   ;;  %s519_s7 = smov %s521_s9 }
  0x72   :  { %10 = sbr.rel (!%p8_p5) target bundleno = 2 (0x2), region = 54 }

// kernel: discriminator_forward.12
= control target key start
LH: loop header
LB: loop body
LE: loop exit
PB: predicated region body
PF: predicated region fallthrough
CT: control target
= control target key end

     0   :  { %s510_s6 = smov 0   ;;  %s512_s7 = smov 0   ;;  %s610_s0 = inlined_call_operand.vmem [shape: bf16[2,16,256], index: 0, kind: input, shape index: {}]   ;;  %s611_s1 = inlined_call_operand.vmem [shape: bf16[2,16,256], index: 1, kind: output, shape index: {}]  }
   0x1   :  { %s514_s8 = smov 0   ;;  %s516_s9 = smov 0  }
   0x2   :  { %s518_s10 = smov 0   ;;  %s520_s11 = smov 0  }
   0x3   :  { %s522_s12 = smov 0  }
   0x4 LB: > { %s20_s13 = sadd.s32 1, %s489_s10  ;;  %s23_s14 = sadd.s32 1, %s493_s11  ;;  %s497_s12 = sphi %s522_s12, %s11_s12   ;;  %s493_s11 = sphi %s520_s11, %s618_s11   ;;  %s489_s10 = sphi %s518_s10, %s617_s10   ;;  %s485_s9 = sphi %s516_s9, %s616_s9   ;;  %s481_s8 = sphi %s514_s8, %s615_s8   ;;  %s477_s7 = sphi %s512_s7, %s614_s7   ;;  %s473_s6 = sphi %s510_s6, %s613_s6  }
   0x5   : > { %p21_p0 = scmp.ge.s32.totalorder %s20_s13, 2  ;;  %s358_s15 = sadd.s32 4294967295, %s497_s12  }
   0x6   : > { %p39_p1 = scmp.ne.s32.totalorder %s477_s7, %s473_s6  ;;  %p40_p2 = scmp.eq.s32.totalorder %s497_s12, 0 }
   0x7   : > { %s620_s13 = smov (%p21_p0, %s20_s13), 0  ;;  %s622_s14 = smov (!%p21_p0, %s23_s14), %s493_s11 }
   0x8   : > { %p25_p3 = scmp.ge.s32.totalorder %s622_s14, 2  ;;  %p71_p4 = scmp.eq.s32.totalorder %s358_s15, 3 }
   0x9   : > { %s28_s16 = ssub.s32 %s489_s10, %s620_s13  ;;  %p41_p5 = por %p40_p2, %p39_p1 }
   0xa   : > { %s624_s14 = smov (%p25_p3, %s622_s14), 0  ;;  %p558_p6 = por %p71_p4, %p39_p1 }
   0xb   : > { %s27_s18 = ssub.s32 %s493_s11, %s624_s14  ;;  %s32_s20 = sadd.s32 1, %s477_s7 }
   0xc   : > { %s29_s19 = sor.u32 %s28_s16, %s27_s18  ;;  %p361_p8 = scmp.ge.s32.totalorder %s497_s12, 4 }
   0xd   : > { %p30_p7 = scmp.eq.s32.totalorder %s29_s19, 0 }
   0xe   : > { %93 = sbr.rel (%p361_p8) target bundleno = 27 (0x1b), region = 16 }
   0xf   : > { %s566_s21 = scalar_select %p30_p7, %s477_s7, %s32_s20  }
  0x13   : > { %96 = sbr.rel (!%p41_p5) target bundleno = 27 (0x1b), region = 20  ;;  %s98_s22 = sand.u32 (%p41_p5), 1, %s477_s7  }
  0x14   : > { %s363_s23 = sshll.u32 (%p41_p5), %s493_s11, 2  ;;  %s362_s24 = sshll.u32 (%p41_p5), %s98_s22, 3 }
  0x15   : > { %s102_s25 = sadd.s32 (%p41_p5), %s489_s10, %s363_s23  ;;  %s100_s30 = scalar_lea.vmem (%p41_p5), [#allocation2], %s362_s24 }
  0x16   : > { %s364_s26 = sshll.u32 (%p41_p5), %s102_s25, 2 }
  0x17   : > { %s104_s29 = scalar_lea.vmem (%p41_p5), %s610_s0, %s364_s26 }
  0x18   : > { %v121_v0 = vld [vmem:[%s104_s29] sm:$0xf]  ;;  %v123_v1 = vld [vmem:[%s104_s29 + $0x8] sm:$0xf] }
  0x19   : > { %122 = vst [vmem:[%s100_s30] sm:$0xf] %v121_v0 }
  0x1a   : > { %124 = vst [vmem:[%s100_s30 + $0x4] sm:$0xf] %v123_v1 }
  0x1b PF: > { %p365_p9 = scmp.ge.s32.totalorder %s497_s12, 1  ;;  %p151_p10 = scmp.lt.s32.totalorder %s497_s12, 5 }
  0x1d   : > { %p152_p11 = pnand %p365_p9, %p151_p10 }
  0x1e   : > { %s158_s2 = sand.u32 (!%p152_p11), 1, %s473_s6  }
  0x1f   : > { %155 = sbr.rel (%p152_p11) target bundleno = 112 (0x70), region = 61  ;;  %s578_s3 = sshll.u32 (!%p152_p11), %s158_s2, 3 }
  0x20   : > { %s160_s4 = scalar_lea.vmem (!%p152_p11), [#allocation2], %s578_s3  ;;  %s175_s5 = scalar_lea.vmem (!%p152_p11), [#allocation3], %s578_s3 }
  0x24   : > { %v499_v2 = vmov 16.0   ;;  %v374_v3 = vld [vmem:[%s160_s4] sm:$0xff]   ;;  %s369_s6 = sshll.u32 (%p558_p6), %s485_s9, 2 }
  0x25   : > { %439 = vrcp.f32 %v499_v2  ;;  %v375_v4 = vunpack.c.l.bf16 %v374_v3  ;;  %v376_v5 = vunpack.c.h.bf16 %v374_v3  ;;  %s238_s15 = sadd.s32 (%p558_p6), %s481_s8, %s369_s6 }
  0x26   : > { %s370_s16 = sshll.u32 (%p558_p6), %s238_s15, 2 }
  0x27   : > { %v180_v6 = vadd.f32 %v376_v5, %v375_v4  ;;  %s240_s20 = scalar_lea.vmem (%p558_p6), %s611_s1, %s370_s16 }
  0x29   : > { %v181_v8 = vrot.slane %v180_v6, 4 }
  0x2b   : > { %v440_v7 = vpop.eup %439  ;;  %v182_v10 = vadd.f32 %v181_v8, %v180_v6 }
  0x2c   : > { %v188_v9 = vmul.f32 16.0, %v440_v7  ;;  %vm192_vm0 = vweird.f32 %v440_v7 }
  0x2d   : > { %v183_v12 = vrot.slane %v182_v10, 2 }
  0x2e   : > { %v189_v11 = vsub.f32 1.0, %v188_v9 }
  0x2f   : > { %v184_v14 = vadd.f32 %v183_v12, %v182_v10 }
  0x30   : > { %v190_v13 = vmul.f32 %v440_v7, %v189_v11 }
  0x31   : > { %v185_v16 = vrot.slane %v184_v14, 1 }
  0x32   : > { %v191_v15 = vadd.f32 %v440_v7, %v190_v13 }
  0x33   : > { %v186_v18 = vadd.f32 %v185_v16, %v184_v14 }
  0x34   : > { %v193_v17 = vsel %vm192_vm0, %v440_v7, %v191_v15 }
  0x35   : > { %v194_v19 = vmul.f32 %v193_v17, %v186_v18 }
  0x37   : > { %v195_v20 = vsub.f32 %v375_v4, %v194_v19  ;;  %v196_v21 = vsub.f32 %v376_v5, %v194_v19 }
  0x39   : > { %v197_v22 = vmul.f32 %v195_v20, %v195_v20  ;;  %v198_v23 = vmul.f32 %v196_v21, %v196_v21 }
  0x3b   : > { %v199_v24 = vadd.f32 %v198_v23, %v197_v22 }
  0x3d   : > { %v200_v25 = vrot.slane %v199_v24, 4 }
  0x3f   : > { %v201_v26 = vadd.f32 %v200_v25, %v199_v24 }
  0x41   : > { %v202_v27 = vrot.slane %v201_v26, 2 }
  0x43   : > { %v203_v28 = vadd.f32 %v202_v27, %v201_v26 }
  0x45   : > { %v204_v29 = vrot.slane %v203_v28, 1 }
  0x47   : > { %v205_v30 = vadd.f32 %v204_v29, %v203_v28 }
  0x49   : > { %v206_v31 = vmul.f32 %v205_v30, %v193_v17 }
  0x4b   : > { %v207_v32 = vadd.f32 1e-05, %v206_v31 }
  0x4d   : > { %441 = vrsqrt.f32 %v207_v32  ;;  %vm214_vm1 = vweird.f32 %v207_v32 }
  0x53   : > { %v442_v33 = vpop.eup %441 }
  0x54   : > { %v209_v34 = vmul.f32 %v442_v33, %v207_v32  ;;  %vm215_vm2 = vweird.f32 %v442_v33 }
  0x55   : > { %vm216_vm3 = vmor %vm214_vm1, %vm215_vm2 }
  0x56   : > { %v210_v35 = vmul.f32 %v442_v33, %v209_v34 }
  0x58   : > { %v211_v36 = vmul.f32 0.5, %v210_v35 }
  0x5a   : > { %v212_v37 = vsub.f32 1.5, %v211_v36 }
  0x5c   : > { %v213_v38 = vmul.f32 %v442_v33, %v212_v37 }
  0x5e   : > { %v217_v39 = vsel %vm216_vm3, %v442_v33, %v213_v38 }
  0x5f   : > { %v218_v40 = vmul.f32 %v217_v39, %v195_v20  ;;  %v219_v41 = vmul.f32 %v217_v39, %v196_v21 }
  0x61   : > { %vm220_vm4 = vcmp.gt.f32.partialorder %v218_v40, 0.0  ;;  %vm221_vm5 = vcmp.gt.f32.partialorder %v219_v41, 0.0  ;;  %v222_v42 = vmul.f32 0.2, %v218_v40  ;;  %v223_v43 = vmul.f32 0.2, %v219_v41 }
  0x62   : > { %236 = sbr.rel (!%p558_p6) target bundleno = 112 (0x70), region = 69 }
  0x63   : > { %v224_v44 = vsel %vm220_vm4, %v218_v40, %v222_v42  ;;  %v225_v45 = vsel %vm221_vm5, %v219_v41, %v223_v43 }
  0x64   : > { %v380_v46 = vpack.c.bf16 %v225_v45, %v224_v44 }
  0x66   : > { %381 = vst [vmem:[%s175_s5] sm:$0xff] %v380_v46  }
  0x6d   : > { %v257_v47 = vld [vmem:[%s175_s5] sm:$0xf]  ;;  %v259_v48 = vld [vmem:[%s175_s5 + $0x4] sm:$0xf] }
  0x6e   : > { %258 = vst [vmem:[%s240_s20] sm:$0xf] %v257_v47 }
  0x6f   : > { %260 = vst [vmem:[%s240_s20 + $0x8] sm:$0xf] %v259_v48 }
  0x70 PF: > { %s11_s12 = sadd.s32 1, %s497_s12   ;;  %s613_s6 = smov %s477_s7 }
  0x71   : > { %p8_p12 = scmp.ge.s32.totalorder %s11_s12, 6   ;;  %s614_s7 = smov %s566_s21 }
  0x72   : > { %s615_s8 = smov %s489_s10  ;;  %s616_s9 = smov %s493_s11 }
  0x73   : > { %s617_s10 = smov %s620_s13  ;;  %s618_s11 = smov %s624_s14 }
  0x74   :  { %10 = sbr.rel (!%p8_p12) target bundleno = 4 (0x4), region = 141 }

// kernel: discriminator_forward.11
= control target key start
LH: loop header
LB: loop body
LE: loop exit
PB: predicated region body
PF: predicated region fallthrough
CT: control target
= control target key end

     0   :  { %s1564_s12 = smov 0   ;;  %s1566_s13 = smov 0   ;;  %s1822_s0 = inlined_call_operand.vmem [shape: bf16[32,2048], index: 0, kind: input, shape index: {}]   ;;  %s1823_s1 = inlined_call_operand.vmem [shape: bf16[2048,256], index: 1, kind: input, shape index: {}]   ;;  %s1824_s2 = inlined_call_operand.vmem [shape: f32[1,256], index: 2, kind: input, shape index: {}]   ;;  %s1825_s3 = inlined_call_operand.vmem [shape: bf16[32,256], index: 3, kind: output, shape index: {}]  }
   0x1   :  { %s1568_s14 = smov 0   ;;  %s1570_s15 = smov 0  }
   0x2   :  { %s1572_s16 = smov 0  }
   0x3 LB: > { %s25_s17 = sadd.s32 1, %s1537_s15  ;;  %p48_p1 = scmp.ne.s32.totalorder %s1529_s13, %s1525_s12  ;;  %s1541_s16 = sphi %s1572_s16, %s13_s16   ;;  %s1537_s15 = sphi %s1570_s15, %s1829_s15   ;;  %s1533_s14 = sphi %s1568_s14, %s1828_s14   ;;  %s1529_s13 = sphi %s1566_s13, %s1827_s13   ;;  %s1525_s12 = sphi %s1564_s12, %s1826_s12  }
   0x4   : > { %p26_p0 = scmp.ge.s32.totalorder %s25_s17, 4  ;;  %p49_p2 = scmp.eq.s32.totalorder %s1541_s16, 0 }
   0x5   : > { %s41_s19 = sadd.s32 1, %s1529_s13  ;;  %p1085_p5 = scmp.ge.s32.totalorder %s1541_s16, 4 }
   0x6   : > { %s1831_s17 = smov (%p26_p0, %s25_s17), 0  ;;  %p50_p3 = por %p49_p2, %p48_p1 }
   0x7   : > { %s37_s18 = ssub.s32 %s1537_s15, %s1831_s17  ;;  %164 = sbr.rel (%p1085_p5) target bundleno = 24 (0x18), region = 20 }
   0x8   : > { %p39_p4 = scmp.eq.s32.totalorder %s37_s18, 0 }
   0xa   : > { %s1599_s20 = scalar_select %p39_p4, %s1529_s13, %s41_s19  }
   0xc   : > { %167 = sbr.rel (!%p50_p3) target bundleno = 24 (0x18), region = 24  ;;  %s169_s21 = sand.u32 (%p50_p3), 1, %s1529_s13  }
   0xd   : > { %s1388_s22 = sshll.u32 (%p50_p3), %s1537_s15, 4  ;;  %s1086_s23 = sshll.u32 (%p50_p3), %s169_s21, 6 }
   0xe   : > { %s177_s26 = scalar_lea.vmem (%p50_p3), %s1822_s0, %s1388_s22  ;;  %s171_s27 = scalar_lea.vmem (%p50_p3), [#allocation3], %s1086_s23 }
   0xf   : > { %v190_v0 = vld [vmem:[%s177_s26] sm:$0xff] (%p50_p3)  ;;  %v192_v1 = vld [vmem:[%s177_s26 + $0x8] sm:$0xff] (%p50_p3) }
  0x10   : > { %v194_v2 = vld [vmem:[%s177_s26 + $0x40] sm:$0xff] (%p50_p3)  ;;  %191 = vst [vmem:[%s171_s27] sm:$0xff] (%p50_p3), %v190_v0  ;;  %v196_v3 = vld [vmem:[%s177_s26 + $0x48] sm:$0xff] (%p50_p3) }
  0x11   : > { %193 = vst [vmem:[%s171_s27 + $0x8] sm:$0xff] %v192_v1  ;;  %v198_v4 = vld [vmem:[%s177_s26 + $0x80] sm:$0xff]  ;;  %v200_v5 = vld [vmem:[%s177_s26 + $0x88] sm:$0xff] }
  0x12   : > { %195 = vst [vmem:[%s171_s27 + $0x10] sm:$0xff] %v194_v2  ;;  %v202_v6 = vld [vmem:[%s177_s26 + $0xc0] sm:$0xff]  ;;  %v204_v7 = vld [vmem:[%s177_s26 + $0xc8] sm:$0xff] }
  0x13   : > { %197 = vst [vmem:[%s171_s27 + $0x18] sm:$0xff] %v196_v3 }
  0x14   : > { %199 = vst [vmem:[%s171_s27 + $0x20] sm:$0xff] %v198_v4 }
  0x15   : > { %201 = vst [vmem:[%s171_s27 + $0x28] sm:$0xff] %v200_v5 }
  0x16   : > { %203 = vst [vmem:[%s171_s27 + $0x30] sm:$0xff] %v202_v6 }
  0x17   : > { %205 = vst [vmem:[%s171_s27 + $0x38] sm:$0xff] %v204_v7 }
  0x18 PF: > { %p1089_p6 = scmp.ge.s32.totalorder %s1541_s16, 1  ;;  %p225_p7 = scmp.lt.s32.totalorder %s1541_s16, 5 }
  0x1a   : > { %p226_p8 = pnand %p1089_p6, %p225_p7 }
  0x1b   : > { %s232_s28 = sand.u32 (!%p226_p8), 1, %s1525_s12   ;;  %s1091_s29 = sshll.u32 (!%p226_p8), %s1533_s14, 6 }
  0x1c   : > { %229 = sbr.rel (%p226_p8) target bundleno = 290 (0x122), region = 51  ;;  %s1090_s30 = sshll.u32 (!%p226_p8), %s232_s28, 6 }
  0x1d   : > { %p278_p9 = scmp.lt.s32.totalorder (!%p226_p8), %s1091_s29, 255  ;;  %s1616_s8 = scalar_lea.vmem (!%p226_p8), [#allocation3], %s1090_s30 }
  0x1e   : > { %p1094_p10 = scmp.ne.s32.totalorder (!%p226_p8), %s1533_s14, 0 }
  0x21   : > { %s1833_s29 = smov (!%p278_p9, %s1091_s29), 255  ;;  %308 = sbr.rel (%p1094_p10) target bundleno = 47 (0x2f), region = 59 }
  0x22   : > { %s1389_s4 = sshll.u32 %s1833_s29, 3 }
  0x23   : > { %s1614_s7 = scalar_lea.vmem %s1823_s1, %s1389_s4 }
  0x26   : > { %v1543_v8 = vmov 0.0  }
  0x27   : > { %309 = vst [vmem:[#allocation2 + $0x30] sm:$0xff] %v1543_v8 }
  0x28   : > { %310 = vst [vmem:[#allocation2] sm:$0xff] %v1543_v8 }
  0x29   : > { %311 = vst [vmem:[#allocation2 + $0x18] sm:$0xff] %v1543_v8 }
  0x2a   : > { %312 = vst [vmem:[#allocation2 + $0x10] sm:$0xff] %v1543_v8 }
  0x2b   : > { %313 = vst [vmem:[#allocation2 + $0x8] sm:$0xff] %v1543_v8 }
  0x2c   : > { %314 = vst [vmem:[#allocation2 + $0x20] sm:$0xff] %v1543_v8 }
  0x2d   : > { %315 = vst [vmem:[#allocation2 + $0x28] sm:$0xff] %v1543_v8 }
  0x2e   : > { %316 = vst [vmem:[#allocation2 + $0x38] sm:$0xff] %v1543_v8 }
  0x2f PF: > { %v1185_v9 = vld [vmem:[%s1614_s7 + $0x70] sm:$0xf]  ;;  %v1413_v10 = vld [vmem:[%s1614_s7 + $0x74] sm:$0xf0]  ;;  %v1177_v20 = vld [vmem:[%s1614_s7 + $0x60] sm:$0xf] }
  0x30   : > { %v1249_v11 = vld [vmem:[%s1614_s7 + $0xf0] sm:$0xf]  ;;  %v1186_v12 = vor.u32 %v1413_v10, %v1185_v9  ;;  %v1429_v13 = vld [vmem:[%s1614_s7 + $0xf4] sm:$0xf0]  ;;  %v1411_v22 = vld [vmem:[%s1614_s7 + $0x64] sm:$0xf0] }
  0x31   : > { %v1313_v14 = vld [vmem:[%s1614_s7 + $0x170] sm:$0xf]  ;;  %v1445_v15 = vld [vmem:[%s1614_s7 + $0x174] sm:$0xf0]  ;;  %v1250_v16 = vor.u32 %v1429_v13, %v1249_v11  ;;  %v1241_v23 = vld [vmem:[%s1614_s7 + $0xe0] sm:$0xf]  ;;  %v1178_v25 = vor.u32 %v1411_v22, %v1177_v20 }
  0x32   : > { %v1314_v17 = vor.u32 %v1445_v15, %v1313_v14  ;;  %v1377_v18 = vld [vmem:[%s1614_s7 + $0x1f0] sm:$0xf]  ;;  %v1461_v19 = vld [vmem:[%s1614_s7 + $0x1f4] sm:$0xf0]  ;;  %757 = vmatpush.bf16.msra.mxu0 %v1186_v12  ;;  %v1427_v24 = vld [vmem:[%s1614_s7 + $0xe4] sm:$0xf0] }
  0x33   : > { %v1378_v21 = vor.u32 %v1461_v19, %v1377_v18  ;;  %776 = vmatpush.bf16.msra.mxu1 %v1250_v16  ;;  %v1242_v26 = vor.u32 %v1427_v24, %v1241_v23  ;;  %v1305_v27 = vld [vmem:[%s1614_s7 + $0x160] sm:$0xf]  ;;  %v1443_v28 = vld [vmem:[%s1614_s7 + $0x164] sm:$0xf0]  ;;  %v1169_v32 = vld [vmem:[%s1614_s7 + $0x50] sm:$0xf] }
  0x34   : > { %795 = vmatpush.bf16.msra.mxu2 %v1314_v17  ;;  %v1369_v29 = vld [vmem:[%s1614_s7 + $0x1e0] sm:$0xf]  ;;  %v1306_v30 = vor.u32 %v1443_v28, %v1305_v27  ;;  %v1459_v31 = vld [vmem:[%s1614_s7 + $0x1e4] sm:$0xf0]  ;;  %v1409_v33 = vld [vmem:[%s1614_s7 + $0x54] sm:$0xf0] }
  0x35   : > { %814 = vmatpush.bf16.msra.mxu3 %v1378_v21  ;;  %v1370_v34 = vor.u32 %v1459_v31, %v1369_v29  ;;  %v1233_v35 = vld [vmem:[%s1614_s7 + $0xd0] sm:$0xf]  ;;  %v1425_v36 = vld [vmem:[%s1614_s7 + $0xd4] sm:$0xf0]  ;;  %v1170_v38 = vor.u32 %v1409_v33, %v1169_v32  ;;  %v1161_v44 = vld [vmem:[%s1614_s7 + $0x40] sm:$0xf] }
  0x36   : > { %v1297_v37 = vld [vmem:[%s1614_s7 + $0x150] sm:$0xf]  ;;  %758 = vmatpush.bf16.msra.mxu0 %v1178_v25  ;;  %v1441_v39 = vld [vmem:[%s1614_s7 + $0x154] sm:$0xf0]  ;;  %v1234_v42 = vor.u32 %v1425_v36, %v1233_v35  ;;  %v1407_v45 = vld [vmem:[%s1614_s7 + $0x44] sm:$0xf0] }
  0x37   : > { %v1361_v40 = vld [vmem:[%s1614_s7 + $0x1d0] sm:$0xf]  ;;  %v1457_v41 = vld [vmem:[%s1614_s7 + $0x1d4] sm:$0xf0]  ;;  %777 = vmatpush.bf16.msra.mxu1 %v1242_v26  ;;  %v1298_v43 = vor.u32 %v1441_v39, %v1297_v37  ;;  %v1225_v46 = vld [vmem:[%s1614_s7 + $0xc0] sm:$0xf]  ;;  %v1162_v53 = vor.u32 %v1407_v45, %v1161_v44 }
  0x38   : > { %796 = vmatpush.bf16.msra.mxu2 %v1306_v30  ;;  %v1362_v47 = vor.u32 %v1457_v41, %v1361_v40  ;;  %v1423_v48 = vld [vmem:[%s1614_s7 + $0xc4] sm:$0xf0]  ;;  %v1289_v49 = vld [vmem:[%s1614_s7 + $0x140] sm:$0xf]  ;;  %v1153_v56 = vld [vmem:[%s1614_s7 + $0x30] sm:$0xf] }
  0x39   : > { %815 = vmatpush.bf16.msra.mxu3 %v1370_v34  ;;  %v1439_v50 = vld [vmem:[%s1614_s7 + $0x144] sm:$0xf0]  ;;  %v1353_v51 = vld [vmem:[%s1614_s7 + $0x1c0] sm:$0xf]  ;;  %v1226_v54 = vor.u32 %v1423_v48, %v1225_v46  ;;  %v1405_v57 = vld [vmem:[%s1614_s7 + $0x34] sm:$0xf0] }
  0x3a   : > { %v1455_v52 = vld [vmem:[%s1614_s7 + $0x1c4] sm:$0xf0]  ;;  %759 = vmatpush.bf16.msra.mxu0 %v1170_v38  ;;  %v1290_v55 = vor.u32 %v1439_v50, %v1289_v49  ;;  %v1217_v58 = vld [vmem:[%s1614_s7 + $0xb0] sm:$0xf]  ;;  %v1421_v60 = vld [vmem:[%s1614_s7 + $0xb4] sm:$0xf0]  ;;  %v1154_v1 = vor.u32 %v1405_v57, %v1153_v56 }
  0x3b   : > { %778 = vmatpush.bf16.msra.mxu1 %v1234_v42  ;;  %v1354_v59 = vor.u32 %v1455_v52, %v1353_v51  ;;  %v1281_v61 = vld [vmem:[%s1614_s7 + $0x130] sm:$0xf]  ;;  %v1437_v62 = vld [vmem:[%s1614_s7 + $0x134] sm:$0xf0]  ;;  %v1218_v2 = vor.u32 %v1421_v60, %v1217_v58  ;;  %v1145_v4 = vld [vmem:[%s1614_s7 + $0x20] sm:$0xf] }
  0x3c   : > { %797 = vmatpush.bf16.msra.mxu2 %v1298_v43  ;;  %v1345_v63 = vld [vmem:[%s1614_s7 + $0x1b0] sm:$0xf]  ;;  %v1453_v0 = vld [vmem:[%s1614_s7 + $0x1b4] sm:$0xf0]  ;;  %v1282_v3 = vor.u32 %v1437_v62, %v1281_v61  ;;  %v1403_v5 = vld [vmem:[%s1614_s7 + $0x24] sm:$0xf0] }
  0x3d   : > { %816 = vmatpush.bf16.msra.mxu3 %v1362_v47  ;;  %v1209_v6 = vld [vmem:[%s1614_s7 + $0xa0] sm:$0xf]  ;;  %v1346_v7 = vor.u32 %v1453_v0, %v1345_v63  ;;  %v1419_v8 = vld [vmem:[%s1614_s7 + $0xa4] sm:$0xf0]  ;;  %v1146_v13 = vor.u32 %v1403_v5, %v1145_v4  ;;  %v1137_v16 = vld [vmem:[%s1614_s7 + $0x10] sm:$0xf] }
  0x3e   : > { %760 = vmatpush.bf16.msra.mxu0 %v1162_v53  ;;  %v1273_v9 = vld [vmem:[%s1614_s7 + $0x120] sm:$0xf]  ;;  %v1435_v10 = vld [vmem:[%s1614_s7 + $0x124] sm:$0xf0]  ;;  %v1210_v14 = vor.u32 %v1419_v8, %v1209_v6  ;;  %v1401_v17 = vld [vmem:[%s1614_s7 + $0x14] sm:$0xf0] }
  0x3f   : > { %779 = vmatpush.bf16.msra.mxu1 %v1226_v54  ;;  %v1337_v11 = vld [vmem:[%s1614_s7 + $0x1a0] sm:$0xf]  ;;  %v1451_v12 = vld [vmem:[%s1614_s7 + $0x1a4] sm:$0xf0]  ;;  %v1274_v15 = vor.u32 %v1435_v10, %v1273_v9  ;;  %v1201_v18 = vld [vmem:[%s1614_s7 + $0x90] sm:$0xf]  ;;  %v1138_v26 = vor.u32 %v1401_v17, %v1137_v16 }
  0x40   : > { %798 = vmatpush.bf16.msra.mxu2 %v1290_v55  ;;  %v1338_v19 = vor.u32 %v1451_v12, %v1337_v11  ;;  %v1417_v20 = vld [vmem:[%s1614_s7 + $0x94] sm:$0xf0]  ;;  %v1265_v21 = vld [vmem:[%s1614_s7 + $0x110] sm:$0xf]  ;;  %v1129_v25 = vld [vmem:[%s1614_s7] sm:$0xf] }
  0x41   : > { %817 = vmatpush.bf16.msra.mxu3 %v1354_v59  ;;  %v1433_v22 = vld [vmem:[%s1614_s7 + $0x114] sm:$0xf0]  ;;  %v1329_v23 = vld [vmem:[%s1614_s7 + $0x190] sm:$0xf]  ;;  %v1399_v27 = vld [vmem:[%s1614_s7 + $0x4] sm:$0xf0]  ;;  %v1202_v30 = vor.u32 %v1417_v20, %v1201_v18 }
  0x42   : > { %761 = vmatpush.bf16.msra.mxu0 %v1154_v1  ;;  %v1449_v24 = vld [vmem:[%s1614_s7 + $0x194] sm:$0xf0]  ;;  %v1193_v28 = vld [vmem:[%s1614_s7 + $0x80] sm:$0xf]  ;;  %v1415_v29 = vld [vmem:[%s1614_s7 + $0x84] sm:$0xf0]  ;;  %v1266_v31 = vor.u32 %v1433_v22, %v1265_v21  ;;  %v1130_v43 = vor.u32 %v1399_v27, %v1129_v25 }
  0x43   : > { %780 = vmatpush.bf16.msra.mxu1 %v1218_v2  ;;  %v1257_v32 = vld [vmem:[%s1614_s7 + $0x100] sm:$0xf]  ;;  %v1431_v33 = vld [vmem:[%s1614_s7 + $0x104] sm:$0xf0]  ;;  %v1330_v35 = vor.u32 %v1449_v24, %v1329_v23  ;;  %v1392_v38 = vld [vmem:[%s1616_s8 + $0xc] sm:$0xf0]  ;;  %v1194_v47 = vor.u32 %v1415_v29, %v1193_v28 }
  0x44   : > { %799 = vmatpush.bf16.msra.mxu2 %v1282_v3  ;;  %v1321_v34 = vld [vmem:[%s1614_s7 + $0x180] sm:$0xf]  ;;  %v1447_v36 = vld [vmem:[%s1614_s7 + $0x184] sm:$0xf0]  ;;  %v1390_v39 = vld [vmem:[%s1616_s8 + $0x4] sm:$0xf]  ;;  %v1258_v48 = vor.u32 %v1431_v33, %v1257_v32 }
  0x45   : > { %818 = vmatpush.bf16.msra.mxu3 %v1346_v7  ;;  %v1097_v37 = vld [vmem:[%s1616_s8] sm:$0xf]  ;;  %v1099_v40 = vld [vmem:[%s1616_s8 + $0x10] sm:$0xf0]  ;;  %v1315_v42 = vld [vmem:[%s1614_s7 + $0x178] sm:$0xf0]  ;;  %v1322_v52 = vor.u32 %v1447_v36, %v1321_v34 }
  0x46   : > { %762 = vmatpush.bf16.msra.mxu0 %v1146_v13  ;;  %v1444_v41 = vld [vmem:[%s1614_s7 + $0x174] sm:$0xf]  ;;  %v1105_v44 = vld [vmem:[%s1616_s8 + $0x8] sm:$0xf]  ;;  %v1251_v46 = vld [vmem:[%s1614_s7 + $0xf8] sm:$0xf0]  ;;  %v1698_v57 = vor.u32 %v1392_v38, %v1097_v37  ;;  %v1703_v62 = vor.u32 %v1390_v39, %v1099_v40 }
  0x47   : > { %781 = vmatpush.bf16.msra.mxu1 %v1210_v14  ;;  %v1428_v45 = vld [vmem:[%s1614_s7 + $0xf4] sm:$0xf]  ;;  %v1393_v49 = vld [vmem:[%s1616_s8 + $0x14] sm:$0xf0]  ;;  %v1391_v50 = vld [vmem:[%s1616_s8 + $0xc] sm:$0xf]  ;;  %v1318_v53 = vor.u32 %v1444_v41, %v1315_v42 }
  0x48   : > { %800 = vmatpush.bf16.msra.mxu2 %v1274_v15  ;;  %v1107_v51 = vld [vmem:[%s1616_s8 + $0x18] sm:$0xf0]  ;;  %v1412_v54 = vld [vmem:[%s1614_s7 + $0x74] sm:$0xf]  ;;  %v1254_v58 = vor.u32 %v1428_v45, %v1251_v46  ;;  %v1442_v60 = vld [vmem:[%s1614_s7 + $0x164] sm:$0xf]  ;;  %v1705_v63 = vor.u32 %v1393_v49, %v1105_v44 }
  0x49   : > { %819 = vmatpush.bf16.msra.mxu3 %v1338_v19  ;;  %v1187_v55 = vld [vmem:[%s1614_s7 + $0x78] sm:$0xf0]  ;;  %v1460_v56 = vld [vmem:[%s1614_s7 + $0x1f4] sm:$0xf]  ;;  %v1307_v61 = vld [vmem:[%s1614_s7 + $0x168] sm:$0xf0]  ;;  %v1709_v2 = vor.u32 %v1391_v50, %v1107_v51 }
  0x4a   : > { %763 = vmatpush.bf16.msra.mxu0 %v1138_v26  ;;  %v1379_v59 = vld [vmem:[%s1614_s7 + $0x1f8] sm:$0xf0]  ;;  %v1426_v0 = vld [vmem:[%s1614_s7 + $0xe4] sm:$0xf]  ;;  %v1243_v1 = vld [vmem:[%s1614_s7 + $0xe8] sm:$0xf0]  ;;  %v1190_v3 = vor.u32 %v1412_v54, %v1187_v55  ;;  %v1310_v5 = vor.u32 %v1442_v60, %v1307_v61 }
  0x4b   : > { %782 = vmatpush.bf16.msra.mxu1 %v1202_v30  ;;  %v1382_v4 = vor.u32 %v1460_v56, %v1379_v59  ;;  %v1410_v6 = vld [vmem:[%s1614_s7 + $0x64] sm:$0xf]  ;;  %v1179_v7 = vld [vmem:[%s1614_s7 + $0x68] sm:$0xf0]  ;;  %v1246_v9 = vor.u32 %v1426_v0, %v1243_v1  ;;  %v1440_v11 = vld [vmem:[%s1614_s7 + $0x154] sm:$0xf] }
  0x4c   : > { %801 = vmatpush.bf16.msra.mxu2 %v1266_v31  ;;  %v1458_v8 = vld [vmem:[%s1614_s7 + $0x1e4] sm:$0xf]  ;;  %v1371_v10 = vld [vmem:[%s1614_s7 + $0x1e8] sm:$0xf0]  ;;  %v1299_v12 = vld [vmem:[%s1614_s7 + $0x158] sm:$0xf0]  ;;  %v1182_v15 = vor.u32 %v1410_v6, %v1179_v7 }
  0x4d   : > { %820 = vmatpush.bf16.msra.mxu3 %v1330_v35  ;;  %v1424_v13 = vld [vmem:[%s1614_s7 + $0xd4] sm:$0xf]  ;;  %v1235_v14 = vld [vmem:[%s1614_s7 + $0xd8] sm:$0xf0]  ;;  %v1374_v16 = vor.u32 %v1458_v8, %v1371_v10  ;;  %v1302_v17 = vor.u32 %v1440_v11, %v1299_v12  ;;  %v1438_v23 = vld [vmem:[%s1614_s7 + $0x144] sm:$0xf] }
  0x4e   : > { %764 = vmatpush.bf16.msra.mxu0 %v1130_v43  ;;  %v1408_v18 = vld [vmem:[%s1614_s7 + $0x54] sm:$0xf]  ;;  %v1171_v19 = vld [vmem:[%s1614_s7 + $0x58] sm:$0xf0]  ;;  %v1238_v21 = vor.u32 %v1424_v13, %v1235_v14  ;;  %v1291_v24 = vld [vmem:[%s1614_s7 + $0x148] sm:$0xf0] }
  0x4f   : > { %783 = vmatpush.bf16.msra.mxu1 %v1194_v47  ;;  %v1456_v20 = vld [vmem:[%s1614_s7 + $0x1d4] sm:$0xf]  ;;  %v1363_v22 = vld [vmem:[%s1614_s7 + $0x1d8] sm:$0xf0]  ;;  %v1422_v25 = vld [vmem:[%s1614_s7 + $0xc4] sm:$0xf]  ;;  %v1174_v27 = vor.u32 %v1408_v18, %v1171_v19  ;;  %v1294_v32 = vor.u32 %v1438_v23, %v1291_v24 }
  0x50   : > { %802 = vmatpush.bf16.msra.mxu2 %v1258_v48  ;;  %v1227_v26 = vld [vmem:[%s1614_s7 + $0xc8] sm:$0xf0]  ;;  %v1406_v28 = vld [vmem:[%s1614_s7 + $0x44] sm:$0xf]  ;;  %v1366_v31 = vor.u32 %v1456_v20, %v1363_v22  ;;  %v1113_v34 = vld [vmem:[%s1616_s8 + $0x20] sm:$0xf] }
  0x51   : > { %821 = vmatpush.bf16.msra.mxu3 %v1322_v52  ;;  %765 = vmatmul.bf16.vlgmr.msra.gmra.mxu0 %v1698_v57  ;;  %v1163_v29 = vld [vmem:[%s1614_s7 + $0x48] sm:$0xf0]  ;;  %v1454_v30 = vld [vmem:[%s1614_s7 + $0x1c4] sm:$0xf]  ;;  %v1396_v35 = vld [vmem:[%s1616_s8 + $0x2c] sm:$0xf0]  ;;  %v1230_v36 = vor.u32 %v1422_v25, %v1227_v26 }
  0x52   : > { %784 = vmatmul.bf16.vlgmr.msra.gmra.mxu1 %v1703_v62  ;;  %833 = vmatpush.bf16.msrb.mxu0 %v1190_v3  ;;  %v1355_v33 = vld [vmem:[%s1614_s7 + $0x1c8] sm:$0xf0]  ;;  %v1394_v37 = vld [vmem:[%s1616_s8 + $0x24] sm:$0xf]  ;;  %v1115_v38 = vld [vmem:[%s1616_s8 + $0x30] sm:$0xf0]  ;;  %v1166_v44 = vor.u32 %v1406_v28, %v1163_v29 }
  0x53   : > { %852 = vmatpush.bf16.msrb.mxu1 %v1254_v58  ;;  %803 = vmatmul.bf16.vlgmr.msra.gmra.mxu2 %v1705_v63  ;;  %v1436_v39 = vld [vmem:[%s1614_s7 + $0x134] sm:$0xf]  ;;  %v1283_v40 = vld [vmem:[%s1614_s7 + $0x138] sm:$0xf0]  ;;  %v1121_v41 = vld [vmem:[%s1616_s8 + $0x28] sm:$0xf]  ;;  %v1358_v48 = vor.u32 %v1454_v30, %v1355_v33  ;;  %v1755_v59 = vor.u32 %v1394_v37, %v1115_v38 }
  0x54   : > { %871 = vmatpush.bf16.msrb.mxu2 %v1318_v53  ;;  %822 = vmatmul.bf16.vlgmr.msra.gmra.mxu3 %v1709_v2  ;;  %v1420_v42 = vld [vmem:[%s1614_s7 + $0xb4] sm:$0xf]  ;;  %v1219_v43 = vld [vmem:[%s1614_s7 + $0xb8] sm:$0xf0]  ;;  %v1397_v45 = vld [vmem:[%s1616_s8 + $0x34] sm:$0xf0]  ;;  %v1286_v49 = vor.u32 %v1436_v39, %v1283_v40  ;;  %v1750_v53 = vor.u32 %v1396_v35, %v1113_v34 }
  0x55   : > { %890 = vmatpush.bf16.msrb.mxu3 %v1382_v4  ;;  %v1395_v46 = vld [vmem:[%s1616_s8 + $0x2c] sm:$0xf]  ;;  %v1123_v47 = vld [vmem:[%s1616_s8 + $0x38] sm:$0xf0]  ;;  %v1404_v50 = vld [vmem:[%s1614_s7 + $0x34] sm:$0xf]  ;;  %v1222_v54 = vor.u32 %v1420_v42, %v1219_v43  ;;  %v1757_v60 = vor.u32 %v1397_v45, %v1121_v41 }
  0x56   : > { %834 = vmatpush.bf16.msrb.mxu0 %v1182_v15  ;;  %v1155_v51 = vld [vmem:[%s1614_s7 + $0x38] sm:$0xf0]  ;;  %v1452_v52 = vld [vmem:[%s1614_s7 + $0x1b4] sm:$0xf]  ;;  %v1434_v56 = vld [vmem:[%s1614_s7 + $0x124] sm:$0xf]  ;;  %v1126_v1 = vor.u32 %v1395_v46, %v1123_v47 }
  0x57   : > { %853 = vmatpush.bf16.msrb.mxu1 %v1246_v9  ;;  %v1347_v55 = vld [vmem:[%s1614_s7 + $0x1b8] sm:$0xf0]  ;;  %v1275_v58 = vld [vmem:[%s1614_s7 + $0x128] sm:$0xf0]  ;;  %v1418_v61 = vld [vmem:[%s1614_s7 + $0xa4] sm:$0xf]  ;;  %v1158_v3 = vor.u32 %v1404_v50, %v1155_v51 }
  0x58   : > { %872 = vmatpush.bf16.msrb.mxu2 %v1310_v5  ;;  %v1211_v0 = vld [vmem:[%s1614_s7 + $0xa8] sm:$0xf0]  ;;  %v1350_v4 = vor.u32 %v1452_v52, %v1347_v55  ;;  %v1278_v5 = vor.u32 %v1434_v56, %v1275_v58  ;;  %v1402_v6 = vld [vmem:[%s1614_s7 + $0x24] sm:$0xf]  ;;  %v1432_v11 = vld [vmem:[%s1614_s7 + $0x114] sm:$0xf] }
  0x59   : > { %891 = vmatpush.bf16.msrb.mxu3 %v1374_v16  ;;  %v1147_v7 = vld [vmem:[%s1614_s7 + $0x28] sm:$0xf0]  ;;  %v1450_v8 = vld [vmem:[%s1614_s7 + $0x1a4] sm:$0xf]  ;;  %v1214_v9 = vor.u32 %v1418_v61, %v1211_v0  ;;  %v1267_v12 = vld [vmem:[%s1614_s7 + $0x118] sm:$0xf0] }
  0x5a   : > { %835 = vmatpush.bf16.msrb.mxu0 %v1174_v27  ;;  %v1339_v10 = vld [vmem:[%s1614_s7 + $0x1a8] sm:$0xf0]  ;;  %v1416_v13 = vld [vmem:[%s1614_s7 + $0x94] sm:$0xf]  ;;  %v1203_v14 = vld [vmem:[%s1614_s7 + $0x98] sm:$0xf0]  ;;  %v1150_v15 = vor.u32 %v1402_v6, %v1147_v7 }
  0x5b   : > { %854 = vmatpush.bf16.msrb.mxu1 %v1238_v21  ;;  %v1342_v16 = vor.u32 %v1450_v8, %v1339_v10  ;;  %v1400_v18 = vld [vmem:[%s1614_s7 + $0x14] sm:$0xf]  ;;  %v1139_v19 = vld [vmem:[%s1614_s7 + $0x18] sm:$0xf0]  ;;  %v1206_v21 = vor.u32 %v1416_v13, %v1203_v14  ;;  %v1430_v23 = vld [vmem:[%s1614_s7 + $0x104] sm:$0xf] }
  0x5c   : > { %873 = vmatpush.bf16.msrb.mxu2 %v1302_v17  ;;  %v1270_v17 = vor.u32 %v1432_v11, %v1267_v12  ;;  %v1448_v20 = vld [vmem:[%s1614_s7 + $0x194] sm:$0xf]  ;;  %v1331_v22 = vld [vmem:[%s1614_s7 + $0x198] sm:$0xf0]  ;;  %v1259_v24 = vld [vmem:[%s1614_s7 + $0x108] sm:$0xf0]  ;;  %v1142_v27 = vor.u32 %v1400_v18, %v1139_v19 }
  0x5d   : > { %892 = vmatpush.bf16.msrb.mxu3 %v1366_v31  ;;  %v1414_v25 = vld [vmem:[%s1614_s7 + $0x84] sm:$0xf]  ;;  %v1195_v26 = vld [vmem:[%s1614_s7 + $0x88] sm:$0xf0]  ;;  %v1334_v28 = vor.u32 %v1448_v20, %v1331_v22  ;;  %v1262_v29 = vor.u32 %v1430_v23, %v1259_v24  ;;  %v317_v43 = vld [vmem:[#allocation2 + $0x30] sm:$0xff]  ;;  %p1383_p11 = scmp.ne.s32.totalorder %s1533_s14, 3 }
  0x5e   : > { %836 = vmatpush.bf16.msrb.mxu0 %v1166_v44  ;;  %v1398_v30 = vld [vmem:[%s1614_s7 + $0x4] sm:$0xf]  ;;  %v1131_v31 = vld [vmem:[%s1614_s7 + $0x8] sm:$0xf0]  ;;  %v320_v24 = vld [vmem:[#allocation2 + $0x10] sm:$0xff] }
  0x5f   : > { %855 = vmatpush.bf16.msrb.mxu1 %v1230_v36  ;;  %v1446_v33 = vld [vmem:[%s1614_s7 + $0x184] sm:$0xf]  ;;  %v1323_v34 = vld [vmem:[%s1614_s7 + $0x188] sm:$0xf0]  ;;  %v1134_v35 = vor.u32 %v1398_v30, %v1131_v31 }
  0x60   : > { %874 = vmatpush.bf16.msrb.mxu2 %v1294_v32  ;;  %v1198_v32 = vor.u32 %v1414_v25, %v1195_v26  ;;  %v1326_v36 = vor.u32 %v1446_v33, %v1323_v34  ;;  %v323_v6 = vld [vmem:[#allocation2 + $0x28] sm:$0xff]  ;;  %v322_v33 = vld [vmem:[#allocation2 + $0x20] sm:$0xff] }
  0x61   : > { %893 = vmatpush.bf16.msrb.mxu3 %v1358_v48  ;;  %770 = vmatmul.bf16.gmra.mxu0 %v1750_v53 }
  0x62   : > { %789 = vmatmul.bf16.gmra.mxu1 %v1755_v59  ;;  %837 = vmatpush.bf16.msrb.mxu0 %v1158_v3 }
  0x63   : > { %856 = vmatpush.bf16.msrb.mxu1 %v1222_v54  ;;  %808 = vmatmul.bf16.gmra.mxu2 %v1757_v60 }
  0x64   : > { %875 = vmatpush.bf16.msrb.mxu2 %v1286_v49  ;;  %827 = vmatmul.bf16.gmra.mxu3 %v1126_v1  ;;  %v319_v49 = vld [vmem:[#allocation2 + $0x18] sm:$0xff] }
  0x65   : > { %894 = vmatpush.bf16.msrb.mxu3 %v1350_v4 }
  0x66   : > { %838 = vmatpush.bf16.msrb.mxu0 %v1150_v15 }
  0x67   : > { %857 = vmatpush.bf16.msrb.mxu1 %v1214_v9 }
  0x68   : > { %876 = vmatpush.bf16.msrb.mxu2 %v1278_v5 }
  0x69   : > { %895 = vmatpush.bf16.msrb.mxu3 %v1342_v16 }
  0x6a   : > { %839 = vmatpush.bf16.msrb.mxu0 %v1142_v27 }
  0x6b   : > { %858 = vmatpush.bf16.msrb.mxu1 %v1206_v21 }
  0x6c   : > { %877 = vmatpush.bf16.msrb.mxu2 %v1270_v17  ;;  %v318_v17 = vld [vmem:[#allocation2] sm:$0xff] }
  0x6d   : > { %896 = vmatpush.bf16.msrb.mxu3 %v1334_v28 }
  0x6e   : > { %840 = vmatpush.bf16.msrb.mxu0 %v1134_v35 }
  0x6f   : > { %859 = vmatpush.bf16.msrb.mxu1 %v1198_v32 }
  0x70   : > { %878 = vmatpush.bf16.msrb.mxu2 %v1262_v29 }
  0x71   : > { %897 = vmatpush.bf16.msrb.mxu3 %v1326_v36  ;;  %841 = vmatmul.bf16.vlgmr.msrb.gmra.mxu0 %v1698_v57 }
  0x72   : > { %860 = vmatmul.bf16.vlgmr.msrb.gmra.mxu1 %v1703_v62 }
  0x73   : > { %879 = vmatmul.bf16.vlgmr.msrb.gmra.mxu2 %v1705_v63 }
  0x74   : > { %898 = vmatmul.bf16.vlgmr.msrb.gmra.mxu3 %v1709_v2 }
  0x81   : > { %846 = vmatmul.bf16.gmra.mxu0 %v1750_v53 }
  0x82   : > { %865 = vmatmul.bf16.gmra.mxu1 %v1755_v59  ;;  %v321_v59 = vld [vmem:[#allocation2 + $0x8] sm:$0xff] }
  0x83   : > { %884 = vmatmul.bf16.gmra.mxu2 %v1757_v60 }
  0x84   : > { %903 = vmatmul.bf16.gmra.mxu3 %v1126_v1 }
  0xce   : > { %v766_v37 = vpop.f32.mrf.mxu0 }
  0xcf   : > { %v785_v38 = vpop.f32.mrf.mxu1 }
  0xd0   : > { %v786_v39 = vadd.f32 %v785_v38, %v766_v37 }
  0xd6   : > { %v804_v40 = vpop.f32.mrf.mxu2  ;;  %v768_v57 = vpop.f32.mrf.mxu0 }
  0xd7   : > { %v805_v41 = vadd.f32 %v804_v40, %v786_v39  ;;  %v823_v42 = vpop.f32.mrf.mxu3  ;;  %v787_v62 = vpop.f32.mrf.mxu1 }
  0xd8   : > { %v788_v2 = vadd.f32 %v787_v62, %v768_v57 }
  0xd9   : > { %v824_v44 = vadd.f32 %v823_v42, %v805_v41  ;;  %v324_v41 = vld [vmem:[#allocation2 + $0x38] sm:$0xff] }
  0xdb   : > { %v909_v63 = vadd.f32 %v824_v44, %v317_v43 }
  0xdd   : > { %917 = vst [vmem:[#allocation2 + $0x30] sm:$0xff] %v909_v63 }
  0xde   : > { %v806_v45 = vpop.f32.mrf.mxu2  ;;  %v771_v48 = vpop.f32.mrf.mxu0 }
  0xdf   : > { %v807_v46 = vadd.f32 %v806_v45, %v788_v2  ;;  %v825_v47 = vpop.f32.mrf.mxu3  ;;  %v790_v50 = vpop.f32.mrf.mxu1 }
  0xe0   : > { %v791_v53 = vadd.f32 %v790_v50, %v771_v48 }
  0xe1   : > { %v826_v51 = vadd.f32 %v825_v47, %v807_v46 }
  0xe3   : > { %v911_v52 = vadd.f32 %v826_v51, %v319_v49 }
  0xe5   : > { %919 = vst [vmem:[#allocation2 + $0x18] sm:$0xff] %v911_v52 }
  0xe6   : > { %v809_v54 = vpop.f32.mrf.mxu2  ;;  %v773_v58 = vpop.f32.mrf.mxu0 }
  0xe7   : > { %v810_v55 = vadd.f32 %v809_v54, %v791_v53  ;;  %v828_v56 = vpop.f32.mrf.mxu3  ;;  %v792_v60 = vpop.f32.mrf.mxu1 }
  0xe8   : > { %v793_v1 = vadd.f32 %v792_v60, %v773_v58 }
  0xe9   : > { %v829_v61 = vadd.f32 %v828_v56, %v810_v55 }
  0xeb   : > { %v913_v0 = vadd.f32 %v829_v61, %v321_v59 }
  0xed   : > { %921 = vst [vmem:[#allocation2 + $0x8] sm:$0xff] %v913_v0 }
  0xee   : > { %v811_v3 = vpop.f32.mrf.mxu2  ;;  %v842_v7 = vpop.f32.mrf.mxu0 }
  0xef   : > { %v812_v4 = vadd.f32 %v811_v3, %v793_v1  ;;  %v830_v5 = vpop.f32.mrf.mxu3  ;;  %v861_v8 = vpop.f32.mrf.mxu1 }
  0xf0   : > { %v862_v11 = vadd.f32 %v861_v8, %v842_v7 }
  0xf1   : > { %v831_v9 = vadd.f32 %v830_v5, %v812_v4 }
  0xf3   : > { %v915_v10 = vadd.f32 %v831_v9, %v323_v6 }
  0xf5   : > { %923 = vst [vmem:[#allocation2 + $0x28] sm:$0xff] %v915_v10 }
  0xf6   : > { %v880_v12 = vpop.f32.mrf.mxu2  ;;  %v844_v15 = vpop.f32.mrf.mxu0 }
  0xf7   : > { %v899_v13 = vpop.f32.mrf.mxu3  ;;  %v881_v14 = vadd.f32 %v880_v12, %v862_v11  ;;  %v863_v16 = vpop.f32.mrf.mxu1 }
  0xf8   : > { %v864_v20 = vadd.f32 %v863_v16, %v844_v15 }
  0xf9   : > { %v900_v18 = vadd.f32 %v899_v13, %v881_v14 }
  0xfb   : > { %v910_v19 = vadd.f32 %v900_v18, %v318_v17 }
  0xfd   : > { %918 = vst [vmem:[#allocation2] sm:$0xff] %v910_v19 }
  0xfe   : > { %v882_v21 = vpop.f32.mrf.mxu2  ;;  %v847_v25 = vpop.f32.mrf.mxu0 }
  0xff   : > { %v901_v22 = vpop.f32.mrf.mxu3  ;;  %v883_v23 = vadd.f32 %v882_v21, %v864_v20  ;;  %v866_v26 = vpop.f32.mrf.mxu1 }
 0x100   : > { %v867_v29 = vadd.f32 %v866_v26, %v847_v25 }
 0x101   : > { %v902_v27 = vadd.f32 %v901_v22, %v883_v23 }
 0x103   : > { %v912_v28 = vadd.f32 %v902_v27, %v320_v24 }
 0x105   : > { %920 = vst [vmem:[#allocation2 + $0x10] sm:$0xff] %v912_v28 }
 0x106   : > { %v885_v30 = vpop.f32.mrf.mxu2  ;;  %v849_v35 = vpop.f32.mrf.mxu0 }
 0x107   : > { %v904_v31 = vpop.f32.mrf.mxu3  ;;  %v886_v32 = vadd.f32 %v885_v30, %v867_v29  ;;  %v868_v36 = vpop.f32.mrf.mxu1 }
 0x108   : > { %v869_v38 = vadd.f32 %v868_v36, %v849_v35 }
 0x109   : > { %v905_v34 = vadd.f32 %v904_v31, %v886_v32 }
 0x10b   : > { %v914_v37 = vadd.f32 %v905_v34, %v322_v33 }
 0x10d   : > { %922 = vst [vmem:[#allocation2 + $0x20] sm:$0xff] %v914_v37 }
 0x10e   : > { %v887_v39 = vpop.f32.mrf.mxu2 }
 0x10f   : > { %v888_v40 = vadd.f32 %v887_v39, %v869_v38  ;;  %v906_v42 = vpop.f32.mrf.mxu3 }
 0x111   : > { %v907_v57 = vadd.f32 %v906_v42, %v888_v40  ;;  %928 = sbr.rel (%p1383_p11) target bundleno = 290 (0x122), region = 63 }
 0x113   : > { %v916_v43 = vadd.f32 %v907_v57, %v324_v41 }
 0x115   : > { %924 = vst [vmem:[#allocation2 + $0x38] sm:$0xff] %v916_v43 }
 0x116   : > { %v929_v62 = vld [vmem:[#allocation2 + $0x30] sm:$0xff]  ;;  %v930_v44 = vld [vmem:[#allocation2] sm:$0xff]  ;;  %v931_v46 = vld [vmem:[#allocation2 + $0x18] sm:$0xff] }
 0x117   : > { %v937_v63 = vld [vmem:[%s1824_s2] sm:$0x3]  ;;  %v932_v47 = vld [vmem:[#allocation2 + $0x10] sm:$0xff]  ;;  %v933_v48 = vld [vmem:[#allocation2 + $0x8] sm:$0xff] }
 0x118   : > { %v939_v2 = vperm.slane %v937_v63, 0  ;;  %v940_v45 = vperm.slane %v937_v63, 1  ;;  %v934_v49 = vld [vmem:[#allocation2 + $0x20] sm:$0xff]  ;;  %v935_v50 = vld [vmem:[#allocation2 + $0x28] sm:$0xff] }
 0x11a   : > { %v943_v52 = vadd.f32 %v939_v2, %v929_v62  ;;  %v944_v53 = vadd.f32 %v940_v45, %v930_v44  ;;  %v945_v54 = vadd.f32 %v939_v2, %v931_v46  ;;  %v946_v55 = vadd.f32 %v940_v45, %v932_v47 }
 0x11b   : > { %v947_v56 = vadd.f32 %v939_v2, %v933_v48  ;;  %v948_v58 = vadd.f32 %v940_v45, %v934_v49  ;;  %v949_v59 = vadd.f32 %v939_v2, %v935_v50 }
 0x11c   : > { %v936_v51 = vld [vmem:[#allocation2 + $0x38] sm:$0xff]  ;;  %v951_v61 = vpack.c.bf16 %v944_v53, %v943_v52  ;;  %v952_v0 = vpack.c.bf16 %v946_v55, %v945_v54 }
 0x11d   : > { %v950_v60 = vadd.f32 %v940_v45, %v936_v51  ;;  %v953_v1 = vpack.c.bf16 %v948_v58, %v947_v56 }
 0x11e   : > { %955 = vst [vmem:[%s1825_s3] sm:$0xff] %v951_v61 }
 0x11f   : > { %v954_v3 = vpack.c.bf16 %v950_v60, %v949_v59  ;;  %956 = vst [vmem:[%s1825_s3 + $0x8] sm:$0xff] %v952_v0 }
 0x120   : > { %957 = vst [vmem:[%s1825_s3 + $0x10] sm:$0xff] %v953_v1 }
 0x121   : > { %958 = vst [vmem:[%s1825_s3 + $0x18] sm:$0xff] %v954_v3 }
 0x122 PF: > { %s13_s16 = sadd.s32 1, %s1541_s16   ;;  %s1826_s12 = smov %s1529_s13 }
 0x123   : > { %p10_p12 = scmp.ge.s32.totalorder %s13_s16, 6   ;;  %s1827_s13 = smov %s1599_s20 }
 0x124   : > { %s1828_s14 = smov %s1537_s15  ;;  %s1829_s15 = smov %s1831_s17 }
 0x125   :  { %12 = sbr.rel (!%p10_p12) target bundleno = 3 (0x3), region = 104 }

// kernel: discriminator_forward.14
= control target key start
LH: loop header
LB: loop body
LE: loop exit
PB: predicated region body
PF: predicated region fallthrough
CT: control target
= control target key end

     0   :  { %s509_s6 = smov 0   ;;  %s511_s7 = smov 0   ;;  %s612_s0 = inlined_call_operand.vmem [shape: bf16[2,9,512], index: 0, kind: input, shape index: {}]   ;;  %s613_s1 = inlined_call_operand.vmem [shape: bf16[2,9,512], index: 1, kind: output, shape index: {}]  }
   0x1   :  { %s513_s8 = smov 0   ;;  %s515_s9 = smov 0  }
   0x2   :  { %s517_s10 = smov 0   ;;  %s519_s11 = smov 0  }
   0x3   :  { %s521_s12 = smov 0  }
   0x4 LB: > { %s20_s13 = sadd.s32 1, %s488_s10  ;;  %s23_s14 = sadd.s32 1, %s492_s11  ;;  %s496_s12 = sphi %s521_s12, %s11_s12   ;;  %s492_s11 = sphi %s519_s11, %s620_s11   ;;  %s488_s10 = sphi %s517_s10, %s619_s10   ;;  %s484_s9 = sphi %s515_s9, %s618_s9   ;;  %s480_s8 = sphi %s513_s8, %s617_s8   ;;  %s476_s7 = sphi %s511_s7, %s616_s7   ;;  %s472_s6 = sphi %s509_s6, %s615_s6  }
   0x5   : > { %p21_p0 = scmp.ge.s32.totalorder %s20_s13, 4  ;;  %s366_s15 = sadd.s32 4294967295, %s496_s12  }
   0x6   : > { %p39_p1 = scmp.ne.s32.totalorder %s476_s7, %s472_s6  ;;  %p40_p2 = scmp.eq.s32.totalorder %s496_s12, 0 }
   0x7   : > { %s622_s13 = smov (%p21_p0, %s20_s13), 0  ;;  %s624_s14 = smov (!%p21_p0, %s23_s14), %s492_s11 }
   0x8   : > { %p25_p3 = scmp.ge.s32.totalorder %s624_s14, 2  ;;  %p71_p4 = scmp.eq.s32.totalorder %s366_s15, 7 }
   0x9   : > { %s28_s16 = ssub.s32 %s488_s10, %s622_s13  ;;  %p41_p5 = por %p40_p2, %p39_p1 }
   0xa   : > { %s626_s14 = smov (%p25_p3, %s624_s14), 0  ;;  %p557_p6 = por %p71_p4, %p39_p1 }
   0xb   : > { %s27_s18 = ssub.s32 %s492_s11, %s626_s14  ;;  %s32_s20 = sadd.s32 1, %s476_s7 }
   0xc   : > { %s29_s19 = sor.u32 %s28_s16, %s27_s18  ;;  %p369_p8 = scmp.ge.s32.totalorder %s496_s12, 8 }
   0xd   : > { %p30_p7 = scmp.eq.s32.totalorder %s29_s19, 0 }
   0xe   : > { %93 = sbr.rel (%p369_p8) target bundleno = 27 (0x1b), region = 16 }
   0xf   : > { %s565_s21 = scalar_select %p30_p7, %s476_s7, %s32_s20  }
  0x13   : > { %96 = sbr.rel (!%p41_p5) target bundleno = 27 (0x1b), region = 20  ;;  %s98_s22 = sand.u32 (%p41_p5), 1, %s476_s7  }
  0x14   : > { %s371_s23 = sshll.u32 (%p41_p5), %s492_s11, 3  ;;  %s370_s24 = sshll.u32 (%p41_p5), %s98_s22, 3 }
  0x15   : > { %s102_s25 = sadd.s32 (%p41_p5), %s488_s10, %s371_s23  ;;  %s100_s30 = scalar_lea.vmem (%p41_p5), [#allocation2], %s370_s24 }
  0x16   : > { %s372_s26 = sshll.u32 (%p41_p5), %s102_s25, 2 }
  0x17   : > { %s104_s29 = scalar_lea.vmem (%p41_p5), %s612_s0, %s372_s26 }
  0x18   : > { %v121_v0 = vld [vmem:[%s104_s29] sm:$0xf]  ;;  %v123_v1 = vld [vmem:[%s104_s29 + $0x10] sm:$0xf] }
  0x19   : > { %122 = vst [vmem:[%s100_s30] sm:$0xf] %v121_v0 }
  0x1a   : > { %124 = vst [vmem:[%s100_s30 + $0x4] sm:$0xf] %v123_v1 }
  0x1b PF: > { %p373_p9 = scmp.ge.s32.totalorder %s496_s12, 1  ;;  %p151_p10 = scmp.lt.s32.totalorder %s496_s12, 9 }
  0x1d   : > { %p152_p11 = pnand %p373_p9, %p151_p10 }
  0x1e   : > { %s158_s2 = sand.u32 (!%p152_p11), 1, %s472_s6  }
  0x1f   : > { %155 = sbr.rel (%p152_p11) target bundleno = 114 (0x72), region = 61  ;;  %s577_s3 = sshll.u32 (!%p152_p11), %s158_s2, 3 }
  0x20   : > { %s160_s4 = scalar_lea.vmem (!%p152_p11), [#allocation2], %s577_s3  ;;  %s175_s5 = scalar_lea.vmem (!%p152_p11), [#allocation3], %s577_s3 }
  0x24   : > { %v498_v2 = vmov 9.0   ;;  %v176_v3 = vld [vmem:[%s160_s4] sm:$0xf]  ;;  %v177_v4 = vld [vmem:[%s160_s4 + $0x4] sm:$0x1]  ;;  %vm180_vm0 = vcmask 1040384  }
  0x25   : > { %438 = vrcp.f32 %v498_v2  ;;  %v178_v5 = vunpack.c.l.bf16 %v176_v3  ;;  %v179_v6 = vunpack.c.l.bf16 %v177_v4  ;;  %vm233_vm5 = vsmask.f32 256  ;;  %v235_v49 = vld [vmem:[%s175_s5 + $0x4] sm:$0x1]  ;;  %s377_s6 = sshll.u32 (%p557_p6), %s484_s9, 3 }
  0x26   : > { %vm234_vm8 = vmand %vm180_vm0, %vm233_vm5  ;;  %s246_s15 = sadd.s32 (%p557_p6), %s480_s8, %s377_s6 }
  0x27   : > { %v181_v7 = vsel %vm180_vm0, %v179_v6, 0.0  ;;  %s378_s16 = sshll.u32 (%p557_p6), %s246_s15, 2 }
  0x28   : > { %v182_v9 = vadd.f32 %v181_v7, %v178_v5  ;;  %s248_s20 = scalar_lea.vmem (%p557_p6), %s613_s1, %s378_s16 }
  0x2a   : > { %v183_v11 = vrot.slane %v182_v9, 4 }
  0x2b   : > { %v439_v8 = vpop.eup %438 }
  0x2c   : > { %v190_v10 = vmul.f32 9.0, %v439_v8  ;;  %v184_v13 = vadd.f32 %v183_v11, %v182_v9  ;;  %vm194_vm1 = vweird.f32 %v439_v8 }
  0x2e   : > { %v191_v12 = vsub.f32 1.0, %v190_v10  ;;  %v185_v15 = vrot.slane %v184_v13, 2 }
  0x30   : > { %v192_v14 = vmul.f32 %v439_v8, %v191_v12  ;;  %v186_v17 = vadd.f32 %v185_v15, %v184_v13 }
  0x32   : > { %v193_v16 = vadd.f32 %v439_v8, %v192_v14  ;;  %v187_v18 = vrot.slane %v186_v17, 1 }
  0x34   : > { %v195_v19 = vsel %vm194_vm1, %v439_v8, %v193_v16  ;;  %v188_v20 = vadd.f32 %v187_v18, %v186_v17 }
  0x36   : > { %v196_v21 = vmul.f32 %v195_v19, %v188_v20 }
  0x38   : > { %v197_v22 = vsub.f32 %v178_v5, %v196_v21  ;;  %v198_v23 = vsub.f32 %v179_v6, %v196_v21 }
  0x3a   : > { %v199_v24 = vmul.f32 %v197_v22, %v197_v22  ;;  %v200_v25 = vmul.f32 %v198_v23, %v198_v23 }
  0x3c   : > { %v201_v26 = vsel %vm180_vm0, %v200_v25, 0.0 }
  0x3d   : > { %v202_v27 = vadd.f32 %v201_v26, %v199_v24 }
  0x3f   : > { %v203_v28 = vrot.slane %v202_v27, 4 }
  0x41   : > { %v204_v29 = vadd.f32 %v203_v28, %v202_v27 }
  0x43   : > { %v205_v30 = vrot.slane %v204_v29, 2 }
  0x45   : > { %v206_v31 = vadd.f32 %v205_v30, %v204_v29 }
  0x47   : > { %v207_v32 = vrot.slane %v206_v31, 1 }
  0x49   : > { %v208_v33 = vadd.f32 %v207_v32, %v206_v31 }
  0x4b   : > { %v209_v34 = vmul.f32 %v208_v33, %v195_v19 }
  0x4d   : > { %v210_v35 = vadd.f32 1e-05, %v209_v34 }
  0x4f   : > { %440 = vrsqrt.f32 %v210_v35  ;;  %vm217_vm2 = vweird.f32 %v210_v35 }
  0x55   : > { %v441_v36 = vpop.eup %440 }
  0x56   : > { %v212_v37 = vmul.f32 %v441_v36, %v210_v35  ;;  %vm218_vm3 = vweird.f32 %v441_v36 }
  0x57   : > { %vm219_vm4 = vmor %vm217_vm2, %vm218_vm3 }
  0x58   : > { %v213_v38 = vmul.f32 %v441_v36, %v212_v37 }
  0x5a   : > { %v214_v39 = vmul.f32 0.5, %v213_v38 }
  0x5c   : > { %v215_v40 = vsub.f32 1.5, %v214_v39 }
  0x5e   : > { %v216_v41 = vmul.f32 %v441_v36, %v215_v40 }
  0x60   : > { %v220_v42 = vsel %vm219_vm4, %v441_v36, %v216_v41 }
  0x61   : > { %v221_v43 = vmul.f32 %v220_v42, %v197_v22  ;;  %v222_v44 = vmul.f32 %v220_v42, %v198_v23 }
  0x63   : > { %vm223_vm6 = vcmp.gt.f32.partialorder %v221_v43, 0.0  ;;  %v225_v45 = vmul.f32 0.2, %v221_v43  ;;  %vm224_vm7 = vcmp.gt.f32.partialorder %v222_v44, 0.0  ;;  %v226_v46 = vmul.f32 0.2, %v222_v44 }
  0x65   : > { %v227_v47 = vsel %vm223_vm6, %v221_v43, %v225_v45  ;;  %v228_v48 = vsel %vm224_vm7, %v222_v44, %v226_v46  ;;  %244 = sbr.rel (!%p557_p6) target bundleno = 114 (0x72), region = 69 }
  0x66   : > { %v229_v50 = vpack.c.bf16 %v227_v47, %v227_v47  ;;  %v230_v51 = vpack.c.bf16 %v228_v48, %v228_v48 }
  0x68   : > { %231 = vst [vmem:[%s175_s5] sm:$0xf] %v229_v50  ;;  %v236_v52 = vsel %vm234_vm8, %v230_v51, %v235_v49 }
  0x69   : > { %237 = vst [vmem:[%s175_s5 + $0x4] sm:$0x1] %v236_v52 }
  0x6f   : > { %v265_v53 = vld [vmem:[%s175_s5] sm:$0xf] }
  0x70   : > { %v267_v54 = vld [vmem:[%s175_s5 + $0x4] sm:$0xf]  ;;  %266 = vst [vmem:[%s248_s20] sm:$0xf] %v265_v53 }
  0x71   : > { %268 = vst [vmem:[%s248_s20 + $0x10] sm:$0xf] %v267_v54 }
  0x72 PF: > { %s11_s12 = sadd.s32 1, %s496_s12   ;;  %s615_s6 = smov %s476_s7 }
  0x73   : > { %p8_p12 = scmp.ge.s32.totalorder %s11_s12, 10   ;;  %s616_s7 = smov %s565_s21 }
  0x74   : > { %s617_s8 = smov %s488_s10  ;;  %s618_s9 = smov %s492_s11 }
  0x75   : > { %s619_s10 = smov %s622_s13  ;;  %s620_s11 = smov %s626_s14 }
  0x76   :  { %10 = sbr.rel (!%p8_p12) target bundleno = 4 (0x4), region = 141 }

// kernel: discriminator_forward.13
= control target key start
LH: loop header
LB: loop body
LE: loop exit
PB: predicated region body
PF: predicated region fallthrough
CT: control target
= control target key end

     0   :  { %s2390_s0 = inlined_call_operand.vmem [shape: bf16[24,4096], index: 0, kind: input, shape index: {}]   ;;  %s2391_s1 = inlined_call_operand.vmem [shape: bf16[4096,512], index: 1, kind: input, shape index: {}]   ;;  %s2392_s2 = inlined_call_operand.vmem [shape: f32[1,512], index: 2, kind: input, shape index: {}]   ;;  %s2393_s3 = inlined_call_operand.vmem [shape: bf16[24,512], index: 3, kind: output, shape index: {}]  }
   0x1   :  { %2395 = sst [smem:[#allocation7_spill]] %s2390_s0 }
   0x2   :  { %2396 = sst [smem:[#allocation8_spill]] %s2391_s1 }
   0x3   :  { %s1908_s12 = smov 0   ;;  %s1910_s13 = smov 0  }
   0x4   :  { %s1912_s14 = smov 0   ;;  %s1914_s15 = smov 0  }
   0x5   :  { %s1916_s16 = smov 0   ;;  %s1918_s17 = smov 0  }
   0x6   :  { %s1920_s18 = smov 0   ;;  %s1922_s19 = smov 0  }
   0x7   :  { %s1924_s20 = smov 0   ;;  %s1926_s21 = smov 0  }
   0x8   :  { %s1928_s22 = smov 0  }
   0x9 LB: > { %s1344_s23 = sadd.s32 4294967295, %s1885_s22   ;;  %s25_s24 = sadd.s32 1, %s1877_s20  ;;  %s1885_s22 = sphi %s1928_s22, %s13_s22   ;;  %s1881_s21 = sphi %s1926_s21, %s2413_s21   ;;  %s1877_s20 = sphi %s1924_s20, %s2412_s20   ;;  %s1873_s19 = sphi %s1922_s19, %s2411_s19   ;;  %s1869_s18 = sphi %s1920_s18, %s2410_s18   ;;  %s1865_s17 = sphi %s1918_s17, %s2409_s17   ;;  %s1861_s16 = sphi %s1916_s16, %s2408_s16   ;;  %s1857_s15 = sphi %s1914_s15, %s2407_s15   ;;  %s1853_s14 = sphi %s1912_s14, %s2406_s14   ;;  %s1849_s13 = sphi %s1910_s13, %s2405_s13   ;;  %s1845_s12 = sphi %s1908_s12, %s2404_s12  }
   0xa   : > { %p26_p0 = scmp.ge.s32.totalorder %s25_s24, 8  ;;  %s28_s25 = sadd.s32 1, %s1881_s21 }
   0xb   : > { %s41_s26 = sadd.s32 1, %s1865_s17  ;;  %p48_p1 = scmp.ne.s32.totalorder %s1865_s17, %s1861_s16 }
   0xc   : > { %s2415_s24 = smov (%p26_p0, %s25_s24), 0  ;;  %s2417_s25 = smov (!%p26_p0, %s28_s25), %s1881_s21 }
   0xd   : > { %s37_s27 = ssub.s32 %s1877_s20, %s2415_s24  ;;  %p49_p2 = scmp.eq.s32.totalorder %s1885_s22, 0 }
   0xe   : > { %p30_p3 = scmp.ge.s32.totalorder %s2417_s25, 2  ;;  %p39_p4 = scmp.eq.s32.totalorder %s37_s27, 0 }
   0xf   : > { %p1975_p5 = por %p49_p2, %p48_p1  ;;  %s69_s29 = sadd.s32 1, %s1857_s15 }
  0x10   : > { %s2419_s25 = smov (%p30_p3, %s2417_s25), 0  ;;  %p76_p6 = scmp.ne.s32.totalorder %s1857_s15, %s1853_s14 }
  0x11   : > { %2398 = sst [smem:[#allocation6_spill]] %s2419_s25  ;;  %s65_s4 = ssub.s32 %s1881_s21, %s2419_s25 }
  0x12   : > { %s1983_s30 = scalar_select %p39_p4, %s1865_s17, %s41_s26  }
  0x13   : > { %s66_s5 = sor.u32 %s65_s4, %s37_s27  ;;  %p121_p7 = scmp.eq.s32.totalorder %s65_s4, 0 }
  0x14   : > { %p67_p8 = scmp.eq.s32.totalorder %s66_s5, 0  ;;  %p1989_p9 = por %p76_p6, %p49_p2 }
  0x15   : > { %s123_s7 = sadd.s32 1, %s1849_s13  ;;  %p133_p10 = scmp.ne.s32.totalorder %s1849_s13, %s1845_s12 }
  0x16   : > { %s1997_s8 = scalar_select %p67_p8, %s1857_s15, %s69_s29  }
  0x17   : > { %s2000_s9 = scalar_select %p121_p7, %s1849_s13, %s123_s7  }
  0x18   : > { %p134_p11 = scmp.eq.s32.totalorder %s1344_s23, 15  ;;  %p1347_p13 = scmp.ge.s32.totalorder %s1885_s22, 16 }
  0x1a   : > { %p2002_p12 = por %p134_p11, %p133_p10  ;;  %156 = sbr.rel (%p1347_p13) target bundleno = 121 (0x79), region = 16 }
  0x1f   : > { %159 = sbr.rel (!%p1975_p5) target bundleno = 47 (0x2f), region = 20  ;;  %s161_s11 = sand.u32 (%p1975_p5), 1, %s1865_s17  }
  0x20   : > { %s1636_s26 = sshll.u32 (%p1975_p5), %s1877_s20, 4  ;;  %s1707_s27 = smul.u32 (%p1975_p5), 48, %s161_s11 }
  0x21   : > { %s2401_s0 = sld [smem:[#allocation7_spill]] (%p1975_p5) }
  0x22   : > { %s163_s23 = scalar_lea.vmem (%p1975_p5), [#allocation3], %s1707_s27 }
  0x27   : > { %s169_s5 = scalar_lea.vmem %s2401_s0, %s1636_s26 }
  0x28   : > { %v182_v0 = vld [vmem:[%s169_s5] sm:$0xff]  ;;  %v184_v1 = vld [vmem:[%s169_s5 + $0x8] sm:$0xff] }
  0x29   : > { %v186_v2 = vld [vmem:[%s169_s5 + $0x80] sm:$0xff]  ;;  %183 = vst [vmem:[%s163_s23] sm:$0xff] %v182_v0  ;;  %v188_v3 = vld [vmem:[%s169_s5 + $0x88] sm:$0xff] }
  0x2a   : > { %185 = vst [vmem:[%s163_s23 + $0x8] sm:$0xff] %v184_v1  ;;  %v190_v4 = vld [vmem:[%s169_s5 + $0x100] sm:$0xff]  ;;  %v192_v5 = vld [vmem:[%s169_s5 + $0x108] sm:$0xff] }
  0x2b   : > { %187 = vst [vmem:[%s163_s23 + $0x10] sm:$0xff] %v186_v2 }
  0x2c   : > { %189 = vst [vmem:[%s163_s23 + $0x18] sm:$0xff] %v188_v3 }
  0x2d   : > { %191 = vst [vmem:[%s163_s23 + $0x20] sm:$0xff] %v190_v4 }
  0x2e   : > { %193 = vst [vmem:[%s163_s23 + $0x28] sm:$0xff] %v192_v5 }
  0x2f PF: > { %199 = sbr.rel (!%p1989_p9) target bundleno = 121 (0x79), region = 43  ;;  %s201_s28 = sand.u32 (%p1989_p9), 1, %s1857_s15  }
  0x30   : > { %s1352_s7 = sshll.u32 (%p1989_p9), %s1881_s21, 1  ;;  %s1350_s11 = sshll.u32 (%p1989_p9), %s201_s28, 9 }
  0x31   : > { %s1637_s26 = sshll.u32 (%p1989_p9), %s1877_s20, 8  ;;  %s2402_s1 = sld [smem:[#allocation8_spill]] (%p1989_p9) }
  0x32   : > { %s207_s27 = sadd.s32 (%p1989_p9), %s1637_s26, %s1352_s7  ;;  %s2027_s6 = scalar_lea.vmem (%p1989_p9), [#allocation4], %s1350_s11 }
  0x33   : > { %s1354_s29 = sshll.u32 (%p1989_p9), %s207_s27, 2 }
  0x37   : > { %s2022_s5 = scalar_lea.vmem %s2402_s1, %s1354_s29 }
  0x38   : > { %v364_v6 = vld [vmem:[%s2022_s5] sm:$0xff]  ;;  %v366_v7 = vld [vmem:[%s2022_s5 + $0x10] sm:$0xff] }
  0x39   : > { %v368_v8 = vld [vmem:[%s2022_s5 + $0x20] sm:$0xff]  ;;  %365 = vst [vmem:[%s2027_s6] sm:$0xff] %v364_v6  ;;  %v370_v9 = vld [vmem:[%s2022_s5 + $0x30] sm:$0xff] }
  0x3a   : > { %367 = vst [vmem:[%s2027_s6 + $0x8] sm:$0xff] %v366_v7  ;;  %v372_v10 = vld [vmem:[%s2022_s5 + $0x40] sm:$0xff]  ;;  %v374_v11 = vld [vmem:[%s2022_s5 + $0x50] sm:$0xff] }
  0x3b   : > { %369 = vst [vmem:[%s2027_s6 + $0x10] sm:$0xff] %v368_v8  ;;  %v376_v12 = vld [vmem:[%s2022_s5 + $0x60] sm:$0xff]  ;;  %v378_v13 = vld [vmem:[%s2022_s5 + $0x70] sm:$0xff] }
  0x3c   : > { %371 = vst [vmem:[%s2027_s6 + $0x18] sm:$0xff] %v370_v9  ;;  %v380_v14 = vld [vmem:[%s2022_s5 + $0x80] sm:$0xff]  ;;  %v382_v15 = vld [vmem:[%s2022_s5 + $0x90] sm:$0xff] }
  0x3d   : > { %373 = vst [vmem:[%s2027_s6 + $0x20] sm:$0xff] %v372_v10  ;;  %v384_v16 = vld [vmem:[%s2022_s5 + $0xa0] sm:$0xff]  ;;  %v386_v17 = vld [vmem:[%s2022_s5 + $0xb0] sm:$0xff] }
  0x3e   : > { %375 = vst [vmem:[%s2027_s6 + $0x28] sm:$0xff] %v374_v11  ;;  %v388_v18 = vld [vmem:[%s2022_s5 + $0xc0] sm:$0xff]  ;;  %v390_v19 = vld [vmem:[%s2022_s5 + $0xd0] sm:$0xff] }
  0x3f   : > { %377 = vst [vmem:[%s2027_s6 + $0x30] sm:$0xff] %v376_v12  ;;  %v392_v20 = vld [vmem:[%s2022_s5 + $0xe0] sm:$0xff]  ;;  %v394_v21 = vld [vmem:[%s2022_s5 + $0xf0] sm:$0xff] }
  0x40   : > { %379 = vst [vmem:[%s2027_s6 + $0x38] sm:$0xff] %v378_v13  ;;  %v396_v22 = vld [vmem:[%s2022_s5 + $0x100] sm:$0xff]  ;;  %v398_v23 = vld [vmem:[%s2022_s5 + $0x110] sm:$0xff] }
  0x41   : > { %381 = vst [vmem:[%s2027_s6 + $0x40] sm:$0xff] %v380_v14  ;;  %v400_v24 = vld [vmem:[%s2022_s5 + $0x120] sm:$0xff]  ;;  %v402_v25 = vld [vmem:[%s2022_s5 + $0x130] sm:$0xff] }
  0x42   : > { %383 = vst [vmem:[%s2027_s6 + $0x48] sm:$0xff] %v382_v15  ;;  %v404_v26 = vld [vmem:[%s2022_s5 + $0x140] sm:$0xff]  ;;  %v406_v27 = vld [vmem:[%s2022_s5 + $0x150] sm:$0xff] }
  0x43   : > { %385 = vst [vmem:[%s2027_s6 + $0x50] sm:$0xff] %v384_v16  ;;  %v408_v28 = vld [vmem:[%s2022_s5 + $0x160] sm:$0xff]  ;;  %v410_v29 = vld [vmem:[%s2022_s5 + $0x170] sm:$0xff] }
  0x44   : > { %387 = vst [vmem:[%s2027_s6 + $0x58] sm:$0xff] %v386_v17  ;;  %v412_v30 = vld [vmem:[%s2022_s5 + $0x180] sm:$0xff]  ;;  %v414_v31 = vld [vmem:[%s2022_s5 + $0x190] sm:$0xff] }
  0x45   : > { %389 = vst [vmem:[%s2027_s6 + $0x60] sm:$0xff] %v388_v18  ;;  %v416_v32 = vld [vmem:[%s2022_s5 + $0x1a0] sm:$0xff]  ;;  %v418_v33 = vld [vmem:[%s2022_s5 + $0x1b0] sm:$0xff] }
  0x46   : > { %391 = vst [vmem:[%s2027_s6 + $0x68] sm:$0xff] %v390_v19  ;;  %v420_v34 = vld [vmem:[%s2022_s5 + $0x1c0] sm:$0xff]  ;;  %v422_v35 = vld [vmem:[%s2022_s5 + $0x1d0] sm:$0xff] }
  0x47   : > { %393 = vst [vmem:[%s2027_s6 + $0x70] sm:$0xff] %v392_v20  ;;  %v424_v36 = vld [vmem:[%s2022_s5 + $0x1e0] sm:$0xff]  ;;  %v426_v37 = vld [vmem:[%s2022_s5 + $0x1f0] sm:$0xff] }
  0x48   : > { %395 = vst [vmem:[%s2027_s6 + $0x78] sm:$0xff] %v394_v21  ;;  %v428_v38 = vld [vmem:[%s2022_s5 + $0x200] sm:$0xff]  ;;  %v430_v39 = vld [vmem:[%s2022_s5 + $0x210] sm:$0xff] }
  0x49   : > { %397 = vst [vmem:[%s2027_s6 + $0x80] sm:$0xff] %v396_v22  ;;  %v432_v40 = vld [vmem:[%s2022_s5 + $0x220] sm:$0xff]  ;;  %v434_v41 = vld [vmem:[%s2022_s5 + $0x230] sm:$0xff] }
  0x4a   : > { %399 = vst [vmem:[%s2027_s6 + $0x88] sm:$0xff] %v398_v23  ;;  %v436_v42 = vld [vmem:[%s2022_s5 + $0x240] sm:$0xff]  ;;  %v438_v43 = vld [vmem:[%s2022_s5 + $0x250] sm:$0xff] }
  0x4b   : > { %401 = vst [vmem:[%s2027_s6 + $0x90] sm:$0xff] %v400_v24  ;;  %v440_v44 = vld [vmem:[%s2022_s5 + $0x260] sm:$0xff]  ;;  %v442_v45 = vld [vmem:[%s2022_s5 + $0x270] sm:$0xff] }
  0x4c   : > { %403 = vst [vmem:[%s2027_s6 + $0x98] sm:$0xff] %v402_v25  ;;  %v444_v46 = vld [vmem:[%s2022_s5 + $0x280] sm:$0xff]  ;;  %v446_v47 = vld [vmem:[%s2022_s5 + $0x290] sm:$0xff] }
  0x4d   : > { %405 = vst [vmem:[%s2027_s6 + $0xa0] sm:$0xff] %v404_v26  ;;  %v448_v48 = vld [vmem:[%s2022_s5 + $0x2a0] sm:$0xff]  ;;  %v450_v49 = vld [vmem:[%s2022_s5 + $0x2b0] sm:$0xff] }
  0x4e   : > { %407 = vst [vmem:[%s2027_s6 + $0xa8] sm:$0xff] %v406_v27  ;;  %v452_v50 = vld [vmem:[%s2022_s5 + $0x2c0] sm:$0xff]  ;;  %v454_v51 = vld [vmem:[%s2022_s5 + $0x2d0] sm:$0xff] }
  0x4f   : > { %409 = vst [vmem:[%s2027_s6 + $0xb0] sm:$0xff] %v408_v28  ;;  %v456_v52 = vld [vmem:[%s2022_s5 + $0x2e0] sm:$0xff]  ;;  %v458_v53 = vld [vmem:[%s2022_s5 + $0x2f0] sm:$0xff] }
  0x50   : > { %411 = vst [vmem:[%s2027_s6 + $0xb8] sm:$0xff] %v410_v29  ;;  %v460_v54 = vld [vmem:[%s2022_s5 + $0x300] sm:$0xff]  ;;  %v462_v55 = vld [vmem:[%s2022_s5 + $0x310] sm:$0xff] }
  0x51   : > { %413 = vst [vmem:[%s2027_s6 + $0xc0] sm:$0xff] %v412_v30  ;;  %v464_v56 = vld [vmem:[%s2022_s5 + $0x320] sm:$0xff]  ;;  %v466_v57 = vld [vmem:[%s2022_s5 + $0x330] sm:$0xff] }
  0x52   : > { %415 = vst [vmem:[%s2027_s6 + $0xc8] sm:$0xff] %v414_v31  ;;  %v468_v58 = vld [vmem:[%s2022_s5 + $0x340] sm:$0xff]  ;;  %v470_v59 = vld [vmem:[%s2022_s5 + $0x350] sm:$0xff] }
  0x53   : > { %417 = vst [vmem:[%s2027_s6 + $0xd0] sm:$0xff] %v416_v32  ;;  %v472_v60 = vld [vmem:[%s2022_s5 + $0x360] sm:$0xff]  ;;  %v474_v61 = vld [vmem:[%s2022_s5 + $0x370] sm:$0xff] }
  0x54   : > { %419 = vst [vmem:[%s2027_s6 + $0xd8] sm:$0xff] %v418_v33  ;;  %v476_v62 = vld [vmem:[%s2022_s5 + $0x380] sm:$0xff]  ;;  %v478_v63 = vld [vmem:[%s2022_s5 + $0x390] sm:$0xff] }
  0x55   : > { %421 = vst [vmem:[%s2027_s6 + $0xe0] sm:$0xff] %v420_v34  ;;  %v480_v0 = vld [vmem:[%s2022_s5 + $0x3a0] sm:$0xff]  ;;  %v482_v1 = vld [vmem:[%s2022_s5 + $0x3b0] sm:$0xff] }
  0x56   : > { %423 = vst [vmem:[%s2027_s6 + $0xe8] sm:$0xff] %v422_v35  ;;  %v484_v2 = vld [vmem:[%s2022_s5 + $0x3c0] sm:$0xff]  ;;  %v486_v3 = vld [vmem:[%s2022_s5 + $0x3d0] sm:$0xff] }
  0x57   : > { %425 = vst [vmem:[%s2027_s6 + $0xf0] sm:$0xff] %v424_v36  ;;  %v488_v4 = vld [vmem:[%s2022_s5 + $0x3e0] sm:$0xff]  ;;  %v490_v5 = vld [vmem:[%s2022_s5 + $0x3f0] sm:$0xff] }
  0x58   : > { %427 = vst [vmem:[%s2027_s6 + $0xf8] sm:$0xff] %v426_v37 }
  0x59   : > { %429 = vst [vmem:[%s2027_s6 + $0x100] sm:$0xff] %v428_v38 }
  0x5a   : > { %431 = vst [vmem:[%s2027_s6 + $0x108] sm:$0xff] %v430_v39 }
  0x5b   : > { %433 = vst [vmem:[%s2027_s6 + $0x110] sm:$0xff] %v432_v40 }
  0x5c   : > { %435 = vst [vmem:[%s2027_s6 + $0x118] sm:$0xff] %v434_v41 }
  0x5d   : > { %437 = vst [vmem:[%s2027_s6 + $0x120] sm:$0xff] %v436_v42 }
  0x5e   : > { %439 = vst [vmem:[%s2027_s6 + $0x128] sm:$0xff] %v438_v43 }
  0x5f   : > { %441 = vst [vmem:[%s2027_s6 + $0x130] sm:$0xff] %v440_v44 }
  0x60   : > { %443 = vst [vmem:[%s2027_s6 + $0x138] sm:$0xff] %v442_v45 }
  0x61   : > { %445 = vst [vmem:[%s2027_s6 + $0x140] sm:$0xff] %v444_v46 }
  0x62   : > { %447 = vst [vmem:[%s2027_s6 + $0x148] sm:$0xff] %v446_v47 }
  0x63   : > { %449 = vst [vmem:[%s2027_s6 + $0x150] sm:$0xff] %v448_v48 }
  0x64   : > { %451 = vst [vmem:[%s2027_s6 + $0x158] sm:$0xff] %v450_v49 }
  0x65   : > { %453 = vst [vmem:[%s2027_s6 + $0x160] sm:$0xff] %v452_v50 }
  0x66   : > { %455 = vst [vmem:[%s2027_s6 + $0x168] sm:$0xff] %v454_v51 }
  0x67   : > { %457 = vst [vmem:[%s2027_s6 + $0x170] sm:$0xff] %v456_v52 }
  0x68   : > { %459 = vst [vmem:[%s2027_s6 + $0x178] sm:$0xff] %v458_v53 }
  0x69   : > { %461 = vst [vmem:[%s2027_s6 + $0x180] sm:$0xff] %v460_v54 }
  0x6a   : > { %463 = vst [vmem:[%s2027_s6 + $0x188] sm:$0xff] %v462_v55 }
  0x6b   : > { %465 = vst [vmem:[%s2027_s6 + $0x190] sm:$0xff] %v464_v56 }
  0x6c   : > { %467 = vst [vmem:[%s2027_s6 + $0x198] sm:$0xff] %v466_v57 }
  0x6d   : > { %469 = vst [vmem:[%s2027_s6 + $0x1a0] sm:$0xff] %v468_v58 }
  0x6e   : > { %471 = vst [vmem:[%s2027_s6 + $0x1a8] sm:$0xff] %v470_v59 }
  0x6f   : > { %473 = vst [vmem:[%s2027_s6 + $0x1b0] sm:$0xff] %v472_v60 }
  0x70   : > { %475 = vst [vmem:[%s2027_s6 + $0x1b8] sm:$0xff] %v474_v61 }
  0x71   : > { %477 = vst [vmem:[%s2027_s6 + $0x1c0] sm:$0xff] %v476_v62 }
  0x72   : > { %479 = vst [vmem:[%s2027_s6 + $0x1c8] sm:$0xff] %v478_v63 }
  0x73   : > { %481 = vst [vmem:[%s2027_s6 + $0x1d0] sm:$0xff] %v480_v0 }
  0x74   : > { %483 = vst [vmem:[%s2027_s6 + $0x1d8] sm:$0xff] %v482_v1 }
  0x75   : > { %485 = vst [vmem:[%s2027_s6 + $0x1e0] sm:$0xff] %v484_v2 }
  0x76   : > { %487 = vst [vmem:[%s2027_s6 + $0x1e8] sm:$0xff] %v486_v3 }
  0x77   : > { %489 = vst [vmem:[%s2027_s6 + $0x1f0] sm:$0xff] %v488_v4 }
  0x78   : > { %491 = vst [vmem:[%s2027_s6 + $0x1f8] sm:$0xff] %v490_v5 }
  0x79 PF: > { %p1355_p0 = scmp.ge.s32.totalorder %s1885_s22, 1  ;;  %p504_p1 = scmp.lt.s32.totalorder %s1885_s22, 17 }
  0x7b   : > { %p505_p2 = pnand %p1355_p0, %p504_p1 }
  0x7c   : > { %s511_s0 = sand.u32 (!%p505_p2), 1, %s1861_s16   ;;  %s518_s23 = sand.u32 (!%p505_p2), 1, %s1853_s14  }
  0x7d   : > { %508 = sbr.rel (%p505_p2) target bundleno = 387 (0x183), region = 85  ;;  %s1356_s7 = sshll.u32 (!%p505_p2), %s518_s23, 9 }
  0x7e   : > { %s1708_s28 = smul.u32 (!%p505_p2), 48, %s511_s0  ;;  %s545_s11 = sand.u32 (!%p505_p2), 1, %s1845_s12  }
  0x7f   : > { %s1709_s26 = smul.u32 (!%p505_p2), 24, %s545_s11  ;;  %s1357_s27 = sshll.u32 (!%p505_p2), %s1873_s19, 1 }
  0x80   : > { %p553_p3 = scmp.lt.s32.totalorder (!%p505_p2), %s1357_s27, 3  ;;  %s2166_s6 = scalar_lea.vmem (!%p505_p2), [#allocation3], %s1708_s28 }
  0x81   : > { %s2168_s1 = scalar_lea.vmem (!%p505_p2), [#allocation4], %s1356_s7  ;;  %s2170_s25 = scalar_lea.vmem (!%p505_p2), [#allocation5], %s1709_s26 }
  0x82   : > { %s2421_s27 = smov (!%p553_p3, %s1357_s27), 3  ;;  %p1358_p4 = scmp.ne.s32.totalorder %s1869_s18, 0 }
  0x83   : > { %s555_s5 = scalar_lea.vmem %s2392_s2, %s2421_s27 }
  0x84   : > { %562 = sbr.rel (%p1358_p4) target bundleno = 144 (0x90), region = 97 }
  0x89   : > { %v1887_v6 = vmov 0.0  }
  0x8a   : > { %563 = vst [vmem:[#allocation2 + $0x28] sm:$0xff] %v1887_v6 }
  0x8b   : > { %564 = vst [vmem:[#allocation2 + $0x10] sm:$0xff] %v1887_v6 }
  0x8c   : > { %565 = vst [vmem:[#allocation2 + $0x8] sm:$0xff] %v1887_v6 }
  0x8d   : > { %566 = vst [vmem:[#allocation2] sm:$0xff] %v1887_v6 }
  0x8e   : > { %567 = vst [vmem:[#allocation2 + $0x18] sm:$0xff] %v1887_v6 }
  0x8f   : > { %568 = vst [vmem:[#allocation2 + $0x20] sm:$0xff] %v1887_v6 }
  0x90 PF: > { %v1433_v7 = vld [vmem:[%s2168_s1 + $0x70] sm:$0xf]  ;;  %v1657_v8 = vld [vmem:[%s2168_s1 + $0x74] sm:$0xf0]  ;;  %v1425_v18 = vld [vmem:[%s2168_s1 + $0x60] sm:$0xf] }
  0x91   : > { %v1497_v9 = vld [vmem:[%s2168_s1 + $0xf0] sm:$0xf]  ;;  %v1434_v10 = vor.u32 %v1657_v8, %v1433_v7  ;;  %v1673_v11 = vld [vmem:[%s2168_s1 + $0xf4] sm:$0xf0]  ;;  %v1655_v20 = vld [vmem:[%s2168_s1 + $0x64] sm:$0xf0] }
  0x92   : > { %v1561_v12 = vld [vmem:[%s2168_s1 + $0x170] sm:$0xf]  ;;  %v1689_v13 = vld [vmem:[%s2168_s1 + $0x174] sm:$0xf0]  ;;  %v1498_v14 = vor.u32 %v1673_v11, %v1497_v9  ;;  %v1489_v21 = vld [vmem:[%s2168_s1 + $0xe0] sm:$0xf]  ;;  %v1426_v23 = vor.u32 %v1655_v20, %v1425_v18 }
  0x93   : > { %v1562_v15 = vor.u32 %v1689_v13, %v1561_v12  ;;  %v1625_v16 = vld [vmem:[%s2168_s1 + $0x1f0] sm:$0xf]  ;;  %v1705_v17 = vld [vmem:[%s2168_s1 + $0x1f4] sm:$0xf0]  ;;  %999 = vmatpush.bf16.msra.mxu0 %v1434_v10  ;;  %v1671_v22 = vld [vmem:[%s2168_s1 + $0xe4] sm:$0xf0] }
  0x94   : > { %v1626_v19 = vor.u32 %v1705_v17, %v1625_v16  ;;  %1017 = vmatpush.bf16.msra.mxu1 %v1498_v14  ;;  %v1490_v24 = vor.u32 %v1671_v22, %v1489_v21  ;;  %v1553_v25 = vld [vmem:[%s2168_s1 + $0x160] sm:$0xf]  ;;  %v1687_v26 = vld [vmem:[%s2168_s1 + $0x164] sm:$0xf0]  ;;  %v1417_v30 = vld [vmem:[%s2168_s1 + $0x50] sm:$0xf] }
  0x95   : > { %1035 = vmatpush.bf16.msra.mxu2 %v1562_v15  ;;  %v1617_v27 = vld [vmem:[%s2168_s1 + $0x1e0] sm:$0xf]  ;;  %v1554_v28 = vor.u32 %v1687_v26, %v1553_v25  ;;  %v1703_v29 = vld [vmem:[%s2168_s1 + $0x1e4] sm:$0xf0]  ;;  %v1653_v31 = vld [vmem:[%s2168_s1 + $0x54] sm:$0xf0] }
  0x96   : > { %1053 = vmatpush.bf16.msra.mxu3 %v1626_v19  ;;  %v1618_v32 = vor.u32 %v1703_v29, %v1617_v27  ;;  %v1481_v33 = vld [vmem:[%s2168_s1 + $0xd0] sm:$0xf]  ;;  %v1669_v34 = vld [vmem:[%s2168_s1 + $0xd4] sm:$0xf0]  ;;  %v1418_v36 = vor.u32 %v1653_v31, %v1417_v30  ;;  %v1409_v42 = vld [vmem:[%s2168_s1 + $0x40] sm:$0xf] }
  0x97   : > { %v1545_v35 = vld [vmem:[%s2168_s1 + $0x150] sm:$0xf]  ;;  %1000 = vmatpush.bf16.msra.mxu0 %v1426_v23  ;;  %v1685_v37 = vld [vmem:[%s2168_s1 + $0x154] sm:$0xf0]  ;;  %v1482_v40 = vor.u32 %v1669_v34, %v1481_v33  ;;  %v1651_v43 = vld [vmem:[%s2168_s1 + $0x44] sm:$0xf0] }
  0x98   : > { %v1609_v38 = vld [vmem:[%s2168_s1 + $0x1d0] sm:$0xf]  ;;  %v1701_v39 = vld [vmem:[%s2168_s1 + $0x1d4] sm:$0xf0]  ;;  %1018 = vmatpush.bf16.msra.mxu1 %v1490_v24  ;;  %v1546_v41 = vor.u32 %v1685_v37, %v1545_v35  ;;  %v1473_v44 = vld [vmem:[%s2168_s1 + $0xc0] sm:$0xf]  ;;  %v1410_v51 = vor.u32 %v1651_v43, %v1409_v42 }
  0x99   : > { %1036 = vmatpush.bf16.msra.mxu2 %v1554_v28  ;;  %v1610_v45 = vor.u32 %v1701_v39, %v1609_v38  ;;  %v1667_v46 = vld [vmem:[%s2168_s1 + $0xc4] sm:$0xf0]  ;;  %v1537_v47 = vld [vmem:[%s2168_s1 + $0x140] sm:$0xf]  ;;  %v1401_v54 = vld [vmem:[%s2168_s1 + $0x30] sm:$0xf] }
  0x9a   : > { %1054 = vmatpush.bf16.msra.mxu3 %v1618_v32  ;;  %v1683_v48 = vld [vmem:[%s2168_s1 + $0x144] sm:$0xf0]  ;;  %v1601_v49 = vld [vmem:[%s2168_s1 + $0x1c0] sm:$0xf]  ;;  %v1474_v52 = vor.u32 %v1667_v46, %v1473_v44  ;;  %v1649_v55 = vld [vmem:[%s2168_s1 + $0x34] sm:$0xf0] }
  0x9b   : > { %v1699_v50 = vld [vmem:[%s2168_s1 + $0x1c4] sm:$0xf0]  ;;  %1001 = vmatpush.bf16.msra.mxu0 %v1418_v36  ;;  %v1538_v53 = vor.u32 %v1683_v48, %v1537_v47  ;;  %v1465_v56 = vld [vmem:[%s2168_s1 + $0xb0] sm:$0xf]  ;;  %v1665_v58 = vld [vmem:[%s2168_s1 + $0xb4] sm:$0xf0]  ;;  %v1402_v63 = vor.u32 %v1649_v55, %v1401_v54 }
  0x9c   : > { %1019 = vmatpush.bf16.msra.mxu1 %v1482_v40  ;;  %v1602_v57 = vor.u32 %v1699_v50, %v1601_v49  ;;  %v1529_v59 = vld [vmem:[%s2168_s1 + $0x130] sm:$0xf]  ;;  %v1681_v60 = vld [vmem:[%s2168_s1 + $0x134] sm:$0xf0]  ;;  %v1466_v0 = vor.u32 %v1665_v58, %v1465_v56  ;;  %v1393_v2 = vld [vmem:[%s2168_s1 + $0x20] sm:$0xf] }
  0x9d   : > { %1037 = vmatpush.bf16.msra.mxu2 %v1546_v41  ;;  %v1593_v61 = vld [vmem:[%s2168_s1 + $0x1b0] sm:$0xf]  ;;  %v1697_v62 = vld [vmem:[%s2168_s1 + $0x1b4] sm:$0xf0]  ;;  %v1530_v1 = vor.u32 %v1681_v60, %v1529_v59  ;;  %v1647_v3 = vld [vmem:[%s2168_s1 + $0x24] sm:$0xf0] }
  0x9e   : > { %1055 = vmatpush.bf16.msra.mxu3 %v1610_v45  ;;  %v1457_v4 = vld [vmem:[%s2168_s1 + $0xa0] sm:$0xf]  ;;  %v1594_v5 = vor.u32 %v1697_v62, %v1593_v61  ;;  %v1663_v6 = vld [vmem:[%s2168_s1 + $0xa4] sm:$0xf0]  ;;  %v1394_v11 = vor.u32 %v1647_v3, %v1393_v2  ;;  %v1385_v14 = vld [vmem:[%s2168_s1 + $0x10] sm:$0xf] }
  0x9f   : > { %1002 = vmatpush.bf16.msra.mxu0 %v1410_v51  ;;  %v1521_v7 = vld [vmem:[%s2168_s1 + $0x120] sm:$0xf]  ;;  %v1679_v8 = vld [vmem:[%s2168_s1 + $0x124] sm:$0xf0]  ;;  %v1458_v12 = vor.u32 %v1663_v6, %v1457_v4  ;;  %v1645_v15 = vld [vmem:[%s2168_s1 + $0x14] sm:$0xf0] }
  0xa0   : > { %1020 = vmatpush.bf16.msra.mxu1 %v1474_v52  ;;  %v1585_v9 = vld [vmem:[%s2168_s1 + $0x1a0] sm:$0xf]  ;;  %v1695_v10 = vld [vmem:[%s2168_s1 + $0x1a4] sm:$0xf0]  ;;  %v1522_v13 = vor.u32 %v1679_v8, %v1521_v7  ;;  %v1449_v16 = vld [vmem:[%s2168_s1 + $0x90] sm:$0xf]  ;;  %v1386_v24 = vor.u32 %v1645_v15, %v1385_v14 }
  0xa1   : > { %1038 = vmatpush.bf16.msra.mxu2 %v1538_v53  ;;  %v1586_v17 = vor.u32 %v1695_v10, %v1585_v9  ;;  %v1661_v18 = vld [vmem:[%s2168_s1 + $0x94] sm:$0xf0]  ;;  %v1513_v19 = vld [vmem:[%s2168_s1 + $0x110] sm:$0xf]  ;;  %v1377_v23 = vld [vmem:[%s2168_s1] sm:$0xf] }
  0xa2   : > { %1056 = vmatpush.bf16.msra.mxu3 %v1602_v57  ;;  %v1677_v20 = vld [vmem:[%s2168_s1 + $0x114] sm:$0xf0]  ;;  %v1577_v21 = vld [vmem:[%s2168_s1 + $0x190] sm:$0xf]  ;;  %v1643_v25 = vld [vmem:[%s2168_s1 + $0x4] sm:$0xf0]  ;;  %v1450_v28 = vor.u32 %v1661_v18, %v1449_v16 }
  0xa3   : > { %1003 = vmatpush.bf16.msra.mxu0 %v1402_v63  ;;  %v1693_v22 = vld [vmem:[%s2168_s1 + $0x194] sm:$0xf0]  ;;  %v1441_v26 = vld [vmem:[%s2168_s1 + $0x80] sm:$0xf]  ;;  %v1659_v27 = vld [vmem:[%s2168_s1 + $0x84] sm:$0xf0]  ;;  %v1514_v29 = vor.u32 %v1677_v20, %v1513_v19  ;;  %v1378_v41 = vor.u32 %v1643_v25, %v1377_v23 }
  0xa4   : > { %1021 = vmatpush.bf16.msra.mxu1 %v1466_v0  ;;  %v1505_v30 = vld [vmem:[%s2168_s1 + $0x100] sm:$0xf]  ;;  %v1675_v31 = vld [vmem:[%s2168_s1 + $0x104] sm:$0xf0]  ;;  %v1578_v33 = vor.u32 %v1693_v22, %v1577_v21  ;;  %v1638_v37 = vld [vmem:[%s2166_s6 + $0x4] sm:$0xf]  ;;  %v1442_v45 = vor.u32 %v1659_v27, %v1441_v26 }
  0xa5   : > { %1039 = vmatpush.bf16.msra.mxu2 %v1530_v1  ;;  %v1569_v32 = vld [vmem:[%s2168_s1 + $0x180] sm:$0xf]  ;;  %v1691_v34 = vld [vmem:[%s2168_s1 + $0x184] sm:$0xf0]  ;;  %v1363_v38 = vld [vmem:[%s2166_s6 + $0x10] sm:$0xf0]  ;;  %v1506_v46 = vor.u32 %v1675_v31, %v1505_v30 }
  0xa6   : > { %1057 = vmatpush.bf16.msra.mxu3 %v1594_v5  ;;  %v1361_v35 = vld [vmem:[%s2166_s6] sm:$0xf]  ;;  %v1640_v36 = vld [vmem:[%s2166_s6 + $0xc] sm:$0xf0]  ;;  %v1688_v39 = vld [vmem:[%s2168_s1 + $0x174] sm:$0xf]  ;;  %v1570_v50 = vor.u32 %v1691_v34, %v1569_v32  ;;  %v2257_v60 = vor.u32 %v1638_v37, %v1363_v38 }
  0xa7   : > { %1004 = vmatpush.bf16.msra.mxu0 %v1394_v11  ;;  %v1563_v40 = vld [vmem:[%s2168_s1 + $0x178] sm:$0xf0]  ;;  %v1369_v42 = vld [vmem:[%s2166_s6 + $0x8] sm:$0xf]  ;;  %v1704_v43 = vld [vmem:[%s2168_s1 + $0x1f4] sm:$0xf]  ;;  %v2252_v55 = vor.u32 %v1640_v36, %v1361_v35 }
  0xa8   : > { %1022 = vmatpush.bf16.msra.mxu1 %v1458_v12  ;;  %v1627_v44 = vld [vmem:[%s2168_s1 + $0x1f8] sm:$0xf0]  ;;  %v1641_v47 = vld [vmem:[%s2166_s6 + $0x14] sm:$0xf0]  ;;  %v1566_v51 = vor.u32 %v1688_v39, %v1563_v40  ;;  %v1656_v52 = vld [vmem:[%s2168_s1 + $0x74] sm:$0xf] }
  0xa9   : > { %1040 = vmatpush.bf16.msra.mxu2 %v1522_v13  ;;  %v1639_v48 = vld [vmem:[%s2166_s6 + $0xc] sm:$0xf]  ;;  %v1371_v49 = vld [vmem:[%s2166_s6 + $0x18] sm:$0xf0]  ;;  %v1672_v54 = vld [vmem:[%s2168_s1 + $0xf4] sm:$0xf]  ;;  %v1630_v56 = vor.u32 %v1704_v43, %v1627_v44  ;;  %v2259_v61 = vor.u32 %v1641_v47, %v1369_v42 }
  0xaa   : > { %1058 = vmatpush.bf16.msra.mxu3 %v1586_v17  ;;  %v1435_v53 = vld [vmem:[%s2168_s1 + $0x78] sm:$0xf0]  ;;  %v1686_v58 = vld [vmem:[%s2168_s1 + $0x164] sm:$0xf]  ;;  %v1555_v59 = vld [vmem:[%s2168_s1 + $0x168] sm:$0xf0]  ;;  %v2263_v0 = vor.u32 %v1639_v48, %v1371_v49 }
  0xab   : > { %1005 = vmatpush.bf16.msra.mxu0 %v1386_v24  ;;  %v1499_v57 = vld [vmem:[%s2168_s1 + $0xf8] sm:$0xf0]  ;;  %v1702_v62 = vld [vmem:[%s2168_s1 + $0x1e4] sm:$0xf]  ;;  %v1619_v63 = vld [vmem:[%s2168_s1 + $0x1e8] sm:$0xf0]  ;;  %v1438_v1 = vor.u32 %v1656_v52, %v1435_v53  ;;  %v1558_v3 = vor.u32 %v1686_v58, %v1555_v59 }
  0xac   : > { %1023 = vmatpush.bf16.msra.mxu1 %v1450_v28  ;;  %v1502_v2 = vor.u32 %v1672_v54, %v1499_v57  ;;  %v1654_v4 = vld [vmem:[%s2168_s1 + $0x64] sm:$0xf]  ;;  %v1427_v5 = vld [vmem:[%s2168_s1 + $0x68] sm:$0xf0]  ;;  %v1622_v7 = vor.u32 %v1702_v62, %v1619_v63  ;;  %v1684_v9 = vld [vmem:[%s2168_s1 + $0x154] sm:$0xf] }
  0xad   : > { %1041 = vmatpush.bf16.msra.mxu2 %v1514_v29  ;;  %v1670_v6 = vld [vmem:[%s2168_s1 + $0xe4] sm:$0xf]  ;;  %v1491_v8 = vld [vmem:[%s2168_s1 + $0xe8] sm:$0xf0]  ;;  %v1547_v10 = vld [vmem:[%s2168_s1 + $0x158] sm:$0xf0]  ;;  %v1430_v13 = vor.u32 %v1654_v4, %v1427_v5 }
  0xae   : > { %1059 = vmatpush.bf16.msra.mxu3 %v1578_v33  ;;  %v1700_v11 = vld [vmem:[%s2168_s1 + $0x1d4] sm:$0xf]  ;;  %v1611_v12 = vld [vmem:[%s2168_s1 + $0x1d8] sm:$0xf0]  ;;  %v1494_v14 = vor.u32 %v1670_v6, %v1491_v8  ;;  %v1550_v15 = vor.u32 %v1684_v9, %v1547_v10  ;;  %v1682_v21 = vld [vmem:[%s2168_s1 + $0x144] sm:$0xf] }
  0xaf   : > { %1006 = vmatpush.bf16.msra.mxu0 %v1378_v41  ;;  %v1652_v16 = vld [vmem:[%s2168_s1 + $0x54] sm:$0xf]  ;;  %v1419_v17 = vld [vmem:[%s2168_s1 + $0x58] sm:$0xf0]  ;;  %v1614_v19 = vor.u32 %v1700_v11, %v1611_v12  ;;  %v1539_v22 = vld [vmem:[%s2168_s1 + $0x148] sm:$0xf0] }
  0xb0   : > { %1024 = vmatpush.bf16.msra.mxu1 %v1442_v45  ;;  %v1668_v18 = vld [vmem:[%s2168_s1 + $0xd4] sm:$0xf]  ;;  %v1483_v20 = vld [vmem:[%s2168_s1 + $0xd8] sm:$0xf0]  ;;  %v1698_v23 = vld [vmem:[%s2168_s1 + $0x1c4] sm:$0xf]  ;;  %v1422_v26 = vor.u32 %v1652_v16, %v1419_v17  ;;  %v1542_v29 = vor.u32 %v1682_v21, %v1539_v22 }
  0xb1   : > { %1042 = vmatpush.bf16.msra.mxu2 %v1506_v46  ;;  %v1603_v24 = vld [vmem:[%s2168_s1 + $0x1c8] sm:$0xf0]  ;;  %v579_v25 = vld [vmem:[%s2166_s6 + $0x20] sm:$0xff]  ;;  %v1486_v28 = vor.u32 %v1668_v18, %v1483_v20  ;;  %v1531_v37 = vld [vmem:[%s2168_s1 + $0x138] sm:$0xf0]  ;;  %p1631_p5 = scmp.ne.s32.totalorder %s1869_s18, 7 }
  0xb2   : > { %1060 = vmatpush.bf16.msra.mxu3 %v1570_v50  ;;  %1007 = vmatmul.bf16.vlgmr.msra.gmra.mxu0 %v2252_v55  ;;  %v580_v27 = vld [vmem:[%s2166_s6 + $0x28] sm:$0xff]  ;;  %v1650_v30 = vld [vmem:[%s2168_s1 + $0x44] sm:$0xf]  ;;  %v1606_v33 = vor.u32 %v1698_v23, %v1603_v24  ;;  %v659_v35 = vunpack.c.l.b16 %v579_v25  ;;  %v1680_v36 = vld [vmem:[%s2168_s1 + $0x134] sm:$0xf]  ;;  %v660_v38 = vunpack.c.h.b16 %v579_v25 }
  0xb3   : > { %1025 = vmatmul.bf16.vlgmr.msra.gmra.mxu1 %v2257_v60  ;;  %1071 = vmatpush.bf16.msrb.mxu0 %v1438_v1  ;;  %v1411_v31 = vld [vmem:[%s2168_s1 + $0x48] sm:$0xf0]  ;;  %v1666_v32 = vld [vmem:[%s2168_s1 + $0xc4] sm:$0xf]  ;;  %v661_v39 = vunpack.c.l.b16 %v580_v27  ;;  %v1696_v40 = vld [vmem:[%s2168_s1 + $0x1b4] sm:$0xf]  ;;  %v662_v43 = vunpack.c.h.b16 %v580_v27  ;;  %v1534_v45 = vor.u32 %v1680_v36, %v1531_v37 }
  0xb4   : > { %1043 = vmatmul.bf16.vlgmr.msra.gmra.mxu2 %v2259_v61  ;;  %1089 = vmatpush.bf16.msrb.mxu1 %v1502_v2  ;;  %v1475_v34 = vld [vmem:[%s2168_s1 + $0xc8] sm:$0xf0]  ;;  %v1595_v41 = vld [vmem:[%s2168_s1 + $0x1b8] sm:$0xf0]  ;;  %v1414_v42 = vor.u32 %v1650_v30, %v1411_v31  ;;  %v1648_v46 = vld [vmem:[%s2168_s1 + $0x34] sm:$0xf]  ;;  %v2298_v49 = vpack.c.b16 %v659_v35, %v659_v35  ;;  %v2303_v54 = vpack.c.b16 %v660_v38, %v660_v38 }
  0xb5   : > { %1107 = vmatpush.bf16.msrb.mxu2 %v1566_v51  ;;  %1061 = vmatmul.bf16.vlgmr.msra.gmra.mxu3 %v2263_v0  ;;  %v1478_v44 = vor.u32 %v1666_v32, %v1475_v34  ;;  %v1403_v47 = vld [vmem:[%s2168_s1 + $0x38] sm:$0xf0]  ;;  %v1664_v48 = vld [vmem:[%s2168_s1 + $0xb4] sm:$0xf]  ;;  %v1598_v50 = vor.u32 %v1696_v40, %v1595_v41  ;;  %v1678_v52 = vld [vmem:[%s2168_s1 + $0x124] sm:$0xf]  ;;  %v670_v59 = vpack.c.b16 %v662_v43, %v662_v43 }
  0xb6   : > { %1125 = vmatpush.bf16.msrb.mxu3 %v1630_v56  ;;  %v1467_v51 = vld [vmem:[%s2168_s1 + $0xb8] sm:$0xf0]  ;;  %v1523_v53 = vld [vmem:[%s2168_s1 + $0x128] sm:$0xf0]  ;;  %v2305_v56 = vpack.c.b16 %v661_v39, %v661_v39  ;;  %v1694_v57 = vld [vmem:[%s2168_s1 + $0x1a4] sm:$0xf]  ;;  %v1406_v62 = vor.u32 %v1648_v46, %v1403_v47 }
  0xb7   : > { %1072 = vmatpush.bf16.msrb.mxu0 %v1430_v13  ;;  %v1587_v58 = vld [vmem:[%s2168_s1 + $0x1a8] sm:$0xf0]  ;;  %v1470_v63 = vor.u32 %v1664_v48, %v1467_v51  ;;  %v1526_v1 = vor.u32 %v1678_v52, %v1523_v53  ;;  %v1646_v2 = vld [vmem:[%s2168_s1 + $0x24] sm:$0xf]  ;;  %v1515_v8 = vld [vmem:[%s2168_s1 + $0x118] sm:$0xf0] }
  0xb8   : > { %1090 = vmatpush.bf16.msrb.mxu1 %v1494_v14  ;;  %v1662_v4 = vld [vmem:[%s2168_s1 + $0xa4] sm:$0xf]  ;;  %v1590_v5 = vor.u32 %v1694_v57, %v1587_v58  ;;  %v1459_v6 = vld [vmem:[%s2168_s1 + $0xa8] sm:$0xf0]  ;;  %v1692_v9 = vld [vmem:[%s2168_s1 + $0x194] sm:$0xf] }
  0xb9   : > { %1108 = vmatpush.bf16.msrb.mxu2 %v1558_v3  ;;  %v1395_v3 = vld [vmem:[%s2168_s1 + $0x28] sm:$0xf0]  ;;  %v1579_v10 = vld [vmem:[%s2168_s1 + $0x198] sm:$0xf0]  ;;  %v1462_v12 = vor.u32 %v1662_v4, %v1459_v6  ;;  %v1644_v14 = vld [vmem:[%s2168_s1 + $0x14] sm:$0xf] }
  0xba   : > { %1126 = vmatpush.bf16.msrb.mxu3 %v1622_v7  ;;  %v1676_v7 = vld [vmem:[%s2168_s1 + $0x114] sm:$0xf]  ;;  %v1398_v11 = vor.u32 %v1646_v2, %v1395_v3  ;;  %v1582_v17 = vor.u32 %v1692_v9, %v1579_v10  ;;  %v1451_v18 = vld [vmem:[%s2168_s1 + $0x98] sm:$0xf0]  ;;  %v1507_v20 = vld [vmem:[%s2168_s1 + $0x108] sm:$0xf0] }
  0xbb   : > { %1073 = vmatpush.bf16.msrb.mxu0 %v1422_v26  ;;  %v1518_v13 = vor.u32 %v1676_v7, %v1515_v8  ;;  %v1660_v16 = vld [vmem:[%s2168_s1 + $0x94] sm:$0xf]  ;;  %v1690_v21 = vld [vmem:[%s2168_s1 + $0x184] sm:$0xf]  ;;  %v1571_v22 = vld [vmem:[%s2168_s1 + $0x188] sm:$0xf0] }
  0xbc   : > { %1091 = vmatpush.bf16.msrb.mxu1 %v1486_v28  ;;  %v1454_v24 = vor.u32 %v1660_v16, %v1451_v18  ;;  %v1642_v26 = vld [vmem:[%s2168_s1 + $0x4] sm:$0xf]  ;;  %v1379_v27 = vld [vmem:[%s2168_s1 + $0x8] sm:$0xf0]  ;;  %v1574_v28 = vor.u32 %v1690_v21, %v1571_v22  ;;  %v569_v39 = vld [vmem:[#allocation2 + $0x28] sm:$0xff] }
  0xbd   : > { %1109 = vmatpush.bf16.msrb.mxu2 %v1550_v15  ;;  %v1387_v15 = vld [vmem:[%s2168_s1 + $0x18] sm:$0xf0]  ;;  %v1443_v30 = vld [vmem:[%s2168_s1 + $0x88] sm:$0xf0]  ;;  %v1382_v31 = vor.u32 %v1642_v26, %v1379_v27  ;;  %v570_v6 = vld [vmem:[#allocation2 + $0x10] sm:$0xff] }
  0xbe   : > { %1127 = vmatpush.bf16.msrb.mxu3 %v1614_v19  ;;  %v1674_v19 = vld [vmem:[%s2168_s1 + $0x104] sm:$0xf]  ;;  %v1390_v23 = vor.u32 %v1644_v14, %v1387_v15  ;;  %v572_v15 = vld [vmem:[#allocation2] sm:$0xff] }
  0xbf   : > { %1074 = vmatpush.bf16.msrb.mxu0 %v1414_v42  ;;  %v1510_v25 = vor.u32 %v1674_v19, %v1507_v20 }
  0xc0   : > { %1092 = vmatpush.bf16.msrb.mxu1 %v1478_v44 }
  0xc1   : > { %1110 = vmatpush.bf16.msrb.mxu2 %v1542_v29  ;;  %v1658_v29 = vld [vmem:[%s2168_s1 + $0x84] sm:$0xf] }
  0xc2   : > { %1128 = vmatpush.bf16.msrb.mxu3 %v1606_v33  ;;  %1012 = vmatmul.bf16.gmra.mxu0 %v2298_v49  ;;  %v1446_v32 = vor.u32 %v1658_v29, %v1443_v30 }
  0xc3   : > { %1030 = vmatmul.bf16.gmra.mxu1 %v2303_v54  ;;  %1075 = vmatpush.bf16.msrb.mxu0 %v1406_v62 }
  0xc4   : > { %1048 = vmatmul.bf16.gmra.mxu2 %v2305_v56  ;;  %1093 = vmatpush.bf16.msrb.mxu1 %v1470_v63 }
  0xc5   : > { %1111 = vmatpush.bf16.msrb.mxu2 %v1534_v45  ;;  %1066 = vmatmul.bf16.gmra.mxu3 %v670_v59  ;;  %v571_v45 = vld [vmem:[#allocation2 + $0x8] sm:$0xff] }
  0xc6   : > { %1129 = vmatpush.bf16.msrb.mxu3 %v1598_v50 }
  0xc7   : > { %1076 = vmatpush.bf16.msrb.mxu0 %v1398_v11 }
  0xc8   : > { %1094 = vmatpush.bf16.msrb.mxu1 %v1462_v12 }
  0xc9   : > { %1112 = vmatpush.bf16.msrb.mxu2 %v1526_v1 }
  0xca   : > { %1130 = vmatpush.bf16.msrb.mxu3 %v1590_v5 }
  0xcb   : > { %1077 = vmatpush.bf16.msrb.mxu0 %v1390_v23 }
  0xcc   : > { %1095 = vmatpush.bf16.msrb.mxu1 %v1454_v24  ;;  %v574_v24 = vld [vmem:[#allocation2 + $0x20] sm:$0xff] }
  0xcd   : > { %1113 = vmatpush.bf16.msrb.mxu2 %v1518_v13 }
  0xce   : > { %1131 = vmatpush.bf16.msrb.mxu3 %v1582_v17 }
  0xcf   : > { %1078 = vmatpush.bf16.msrb.mxu0 %v1382_v31 }
  0xd0   : > { %1096 = vmatpush.bf16.msrb.mxu1 %v1446_v32 }
  0xd1   : > { %1114 = vmatpush.bf16.msrb.mxu2 %v1510_v25 }
  0xd2   : > { %1132 = vmatpush.bf16.msrb.mxu3 %v1574_v28  ;;  %1079 = vmatmul.bf16.vlgmr.msrb.gmra.mxu0 %v2252_v55 }
  0xd3   : > { %1097 = vmatmul.bf16.vlgmr.msrb.gmra.mxu1 %v2257_v60 }
  0xd4   : > { %1115 = vmatmul.bf16.vlgmr.msrb.gmra.mxu2 %v2259_v61 }
  0xd5   : > { %1133 = vmatmul.bf16.vlgmr.msrb.gmra.mxu3 %v2263_v0 }
  0xe2   : > { %1084 = vmatmul.bf16.gmra.mxu0 %v2298_v49 }
  0xe3   : > { %1102 = vmatmul.bf16.gmra.mxu1 %v2303_v54  ;;  %v573_v54 = vld [vmem:[#allocation2 + $0x18] sm:$0xff] }
  0xe4   : > { %1120 = vmatmul.bf16.gmra.mxu2 %v2305_v56 }
  0xe5   : > { %1138 = vmatmul.bf16.gmra.mxu3 %v670_v59 }
 0x12f   : > { %v1008_v33 = vpop.f32.mrf.mxu0 }
 0x130   : > { %v1026_v34 = vpop.f32.mrf.mxu1 }
 0x131   : > { %v1027_v35 = vadd.f32 %v1026_v34, %v1008_v33 }
 0x137   : > { %v1044_v36 = vpop.f32.mrf.mxu2  ;;  %v1010_v55 = vpop.f32.mrf.mxu0 }
 0x138   : > { %v1045_v37 = vadd.f32 %v1044_v36, %v1027_v35  ;;  %v1062_v38 = vpop.f32.mrf.mxu3  ;;  %v1028_v61 = vpop.f32.mrf.mxu1 }
 0x139   : > { %v1029_v0 = vadd.f32 %v1028_v61, %v1010_v55 }
 0x13a   : > { %v1063_v40 = vadd.f32 %v1062_v38, %v1045_v37 }
 0x13c   : > { %v1143_v60 = vadd.f32 %v1063_v40, %v569_v39 }
 0x13e   : > { %1149 = vst [vmem:[#allocation2 + $0x28] sm:$0xff] %v1143_v60 }
 0x13f   : > { %v1046_v41 = vpop.f32.mrf.mxu2  ;;  %v1013_v44 = vpop.f32.mrf.mxu0 }
 0x140   : > { %v1047_v42 = vadd.f32 %v1046_v41, %v1029_v0  ;;  %v1064_v43 = vpop.f32.mrf.mxu3  ;;  %v1031_v46 = vpop.f32.mrf.mxu1 }
 0x141   : > { %v1032_v49 = vadd.f32 %v1031_v46, %v1013_v44 }
 0x142   : > { %v1065_v47 = vadd.f32 %v1064_v43, %v1047_v42 }
 0x144   : > { %v1145_v48 = vadd.f32 %v1065_v47, %v571_v45 }
 0x146   : > { %1151 = vst [vmem:[#allocation2 + $0x8] sm:$0xff] %v1145_v48 }
 0x147   : > { %v1049_v50 = vpop.f32.mrf.mxu2  ;;  %v1015_v53 = vpop.f32.mrf.mxu0 }
 0x148   : > { %v1050_v51 = vadd.f32 %v1049_v50, %v1032_v49  ;;  %v1067_v52 = vpop.f32.mrf.mxu3  ;;  %v1033_v56 = vpop.f32.mrf.mxu1 }
 0x14a   : > { %v1068_v57 = vadd.f32 %v1067_v52, %v1050_v51 }
 0x14c   : > { %v1147_v58 = vadd.f32 %v1068_v57, %v573_v54 }
 0x14e   : > { %1153 = vst [vmem:[#allocation2 + $0x18] sm:$0xff] %v1147_v58 }
 0x14f   : > { %v1051_v59 = vpop.f32.mrf.mxu2  ;;  %v1080_v63 = vpop.f32.mrf.mxu0 }
 0x150   : > { %v1069_v62 = vpop.f32.mrf.mxu3  ;;  %v1098_v1 = vpop.f32.mrf.mxu1 }
 0x151   : > { %v1099_v2 = vadd.f32 %v1098_v1, %v1080_v63 }
 0x157   : > { %v1116_v3 = vpop.f32.mrf.mxu2  ;;  %v1082_v7 = vpop.f32.mrf.mxu0 }
 0x158   : > { %v1117_v4 = vadd.f32 %v1116_v3, %v1099_v2  ;;  %v1134_v5 = vpop.f32.mrf.mxu3  ;;  %v1100_v9 = vpop.f32.mrf.mxu1 }
 0x159   : > { %v1101_v11 = vadd.f32 %v1100_v9, %v1082_v7 }
 0x15a   : > { %v1135_v8 = vadd.f32 %v1134_v5, %v1117_v4 }
 0x15c   : > { %v1144_v10 = vadd.f32 %v1135_v8, %v570_v6 }
 0x15e   : > { %1150 = vst [vmem:[#allocation2 + $0x10] sm:$0xff] %v1144_v10 }
 0x15f   : > { %v1118_v12 = vpop.f32.mrf.mxu2  ;;  %v1085_v16 = vpop.f32.mrf.mxu0 }
 0x160   : > { %v1119_v13 = vadd.f32 %v1118_v12, %v1101_v11  ;;  %v1136_v14 = vpop.f32.mrf.mxu3  ;;  %v1103_v18 = vpop.f32.mrf.mxu1 }
 0x161   : > { %v1104_v20 = vadd.f32 %v1103_v18, %v1085_v16 }
 0x162   : > { %v1137_v17 = vadd.f32 %v1136_v14, %v1119_v13 }
 0x164   : > { %v1146_v19 = vadd.f32 %v1137_v17, %v572_v15 }
 0x166   : > { %1152 = vst [vmem:[#allocation2] sm:$0xff] %v1146_v19 }
 0x167   : > { %v1121_v21 = vpop.f32.mrf.mxu2  ;;  %v1087_v25 = vpop.f32.mrf.mxu0 }
 0x168   : > { %v1122_v22 = vadd.f32 %v1121_v21, %v1104_v20  ;;  %v1139_v23 = vpop.f32.mrf.mxu3  ;;  %v1105_v27 = vpop.f32.mrf.mxu1 }
 0x16a   : > { %v1140_v26 = vadd.f32 %v1139_v23, %v1122_v22 }
 0x16c   : > { %v1148_v28 = vadd.f32 %v1140_v26, %v574_v24  ;;  %1158 = sbr.rel (%p1631_p5) target bundleno = 379 (0x17b), region = 101 }
 0x16e   : > { %1154 = vst [vmem:[#allocation2 + $0x20] sm:$0xff] %v1148_v28 }
 0x16f   : > { %v1123_v29 = vpop.f32.mrf.mxu2 }
 0x170   : > { %v1141_v30 = vpop.f32.mrf.mxu3 }
 0x171   : > { %v1159_v31 = vld [vmem:[#allocation2 + $0x28] sm:$0xff]  ;;  %v1160_v32 = vld [vmem:[#allocation2 + $0x10] sm:$0xff]  ;;  %v1165_v33 = vld [vmem:[%s555_s5] sm:$0x3] }
 0x172   : > { %v1167_v34 = vperm.slane %v1165_v33, 0  ;;  %v1168_v35 = vperm.slane %v1165_v33, 1  ;;  %v1161_v36 = vld [vmem:[#allocation2 + $0x8] sm:$0xff]  ;;  %v1162_v37 = vld [vmem:[#allocation2] sm:$0xff]  ;;  %v1163_v38 = vld [vmem:[#allocation2 + $0x18] sm:$0xff] }
 0x174   : > { %v1171_v39 = vadd.f32 %v1167_v34, %v1159_v31  ;;  %v1172_v61 = vadd.f32 %v1168_v35, %v1160_v32  ;;  %v1173_v40 = vadd.f32 %v1167_v34, %v1161_v36  ;;  %v1174_v60 = vadd.f32 %v1168_v35, %v1162_v37 }
 0x175   : > { %v1164_v55 = vld [vmem:[#allocation2 + $0x20] sm:$0xff]  ;;  %v1175_v0 = vadd.f32 %v1167_v34, %v1163_v38 }
 0x176   : > { %v1176_v41 = vadd.f32 %v1168_v35, %v1164_v55  ;;  %v1177_v42 = vpack.c.bf16 %v1172_v61, %v1171_v39  ;;  %v1178_v43 = vpack.c.bf16 %v1174_v60, %v1173_v40 }
 0x178   : > { %v1179_v44 = vpack.c.bf16 %v1176_v41, %v1175_v0  ;;  %1180 = vst [vmem:[%s2170_s25] sm:$0xff] %v1177_v42 }
 0x179   : > { %1181 = vst [vmem:[%s2170_s25 + $0x8] sm:$0xff] %v1178_v43 }
 0x17a   : > { %1182 = vst [vmem:[%s2170_s25 + $0x10] sm:$0xff] %v1179_v44 }
 0x17b PF: > { %1189 = sbr.rel (!%p2002_p12) target bundleno = 387 (0x183), region = 105  ;;  %s1706_s14 = sshll.u32 (%p2002_p12), %s1873_s19, 3 }
 0x17c   : > { %s1195_s0 = scalar_lea.vmem (%p2002_p12), %s2393_s3, %s1706_s14 }
 0x17f   : > { %v1228_v45 = vld [vmem:[%s2170_s25] sm:$0xff] (%p2002_p12) }
 0x180   : > { %v1230_v46 = vld [vmem:[%s2170_s25 + $0x8] sm:$0xff]  ;;  %1229 = vst [vmem:[%s1195_s0] sm:$0xff] %v1228_v45 }
 0x181   : > { %v1232_v47 = vld [vmem:[%s2170_s25 + $0x10] sm:$0xff]  ;;  %1231 = vst [vmem:[%s1195_s0 + $0x10] sm:$0xff] %v1230_v46 }
 0x182   : > { %1233 = vst [vmem:[%s1195_s0 + $0x20] sm:$0xff] %v1232_v47 }
 0x183 PF: > { %s13_s22 = sadd.s32 1, %s1885_s22   ;;  %s2403_s10 = sld [smem:[#allocation6_spill]] }
 0x184   : > { %p10_p6 = scmp.ge.s32.totalorder %s13_s22, 18   ;;  %s2404_s12 = smov %s1849_s13 }
 0x185   : > { %s2405_s13 = smov %s2000_s9  ;;  %s2406_s14 = smov %s1857_s15 }
 0x186   : > { %s2407_s15 = smov %s1997_s8  ;;  %s2408_s16 = smov %s1865_s17 }
 0x187   : > { %s2409_s17 = smov %s1983_s30  ;;  %s2410_s18 = smov %s1877_s20 }
 0x188   : > { %s2411_s19 = smov %s1881_s21  ;;  %s2412_s20 = smov %s2415_s24 }
 0x189   : > { %s2413_s21 = smov %s2403_s10  ;;  %12 = sbr.rel (!%p10_p6) target bundleno = 9 (0x9), region = 185 }

// kernel: discriminator_forward.15
= control target key start
LH: loop header
LB: loop body
LE: loop exit
PB: predicated region body
PF: predicated region fallthrough
CT: control target
= control target key end

     0   :  { %s952_s12 = smov 0   ;;  %s954_s13 = smov 0   ;;  %s1035_s0 = inlined_call_operand.vmem [shape: bf16[8,8192], index: 0, kind: input, shape index: {}]   ;;  %s1036_s1 = inlined_call_operand.vmem [shape: bf16[8192,128], index: 1, kind: input, shape index: {}]   ;;  %s1037_s2 = inlined_call_operand.vmem [shape: f32[1,128], index: 2, kind: input, shape index: {}]   ;;  %s1038_s3 = inlined_call_operand.vmem [shape: f32[8,128], index: 3, kind: output, shape index: {}]  }
   0x1   :  { %s956_s14 = smov 0  }
   0x2 LB: > { %s25_s15 = sadd.s32 1, %s925_s13  ;;  %p711_p0 = scmp.ge.s32.totalorder %s929_s14, 1  ;;  %s929_s14 = sphi %s956_s14, %s13_s14   ;;  %s925_s13 = sphi %s954_s13, %s1040_s13   ;;  %s921_s12 = sphi %s952_s12, %s1039_s12  }
   0x3   : > { %p26_p1 = scmp.ge.s32.totalorder %s25_s15, 16  ;;  %p189_p2 = scmp.lt.s32.totalorder %s929_s14, 17 }
   0x5   : > { %s1042_s15 = smov (%p26_p1, %s25_s15), 0  ;;  %p190_p3 = pnand %p711_p0, %p189_p2 }
   0x6   : > { %s712_s16 = sshll.u32 (!%p190_p3), %s921_s12, 2  ;;  %s714_s17 = sshll.u32 (!%p190_p3), %s921_s12, 6 }
   0x7   : > { %193 = sbr.rel (%p190_p3) target bundleno = 205 (0xcd), region = 32  ;;  %p233_p4 = scmp.lt.s32.totalorder (!%p190_p3), %s712_s16, 63 }
   0x8   : > { %p241_p5 = scmp.lt.s32.totalorder (!%p190_p3), %s714_s17, 1023  ;;  %p716_p6 = scmp.ne.s32.totalorder (!%p190_p3), %s921_s12, 0 }
   0xc   : > { %s1044_s16 = smov (!%p233_p4, %s712_s16), 63  ;;  %s1046_s17 = smov (!%p241_p5, %s714_s17), 1023 }
   0xd   : > { %s713_s18 = sshll.u32 %s1044_s16, 2  ;;  %s715_s22 = sshll.u32 %s1046_s17, 2 }
   0xe   : > { %s977_s21 = scalar_lea.vmem %s1035_s0, %s713_s18  ;;  %s982_s25 = scalar_lea.vmem %s1036_s1, %s715_s22 }
   0xf   : > { %262 = sbr.rel (%p716_p6) target bundleno = 22 (0x16), region = 36 }
  0x14   : > { %v931_v0 = vmov 0.0  }
  0x15   : > { %263 = vst [vmem:[#allocation2] sm:$0xff] %v931_v0 }
  0x16 PF: > { %v856_v1 = vld [vmem:[%s982_s25 + $0x38] sm:$0xff]  ;;  %v855_v5 = vld [vmem:[%s982_s25 + $0x30] sm:$0xff]  ;;  %v854_v9 = vld [vmem:[%s982_s25 + $0x28] sm:$0xff]  ;;  %p845_p7 = scmp.ne.s32.totalorder %s921_s12, 15 }
  0x17   : > { %v864_v2 = vld [vmem:[%s982_s25 + $0x78] sm:$0xff]  ;;  %537 = vmatpush.bf16.msra.mxu0 %v856_v1  ;;  %v863_v6 = vld [vmem:[%s982_s25 + $0x70] sm:$0xff]  ;;  %v862_v10 = vld [vmem:[%s982_s25 + $0x68] sm:$0xff] }
  0x18   : > { %v872_v3 = vld [vmem:[%s982_s25 + $0xb8] sm:$0xff]  ;;  %550 = vmatpush.bf16.msra.mxu1 %v864_v2  ;;  %v871_v7 = vld [vmem:[%s982_s25 + $0xb0] sm:$0xff]  ;;  %v870_v11 = vld [vmem:[%s982_s25 + $0xa8] sm:$0xff] }
  0x19   : > { %v880_v4 = vld [vmem:[%s982_s25 + $0xf8] sm:$0xff]  ;;  %563 = vmatpush.bf16.msra.mxu2 %v872_v3  ;;  %v879_v8 = vld [vmem:[%s982_s25 + $0xf0] sm:$0xff]  ;;  %v878_v12 = vld [vmem:[%s982_s25 + $0xe8] sm:$0xff] }
  0x1a   : > { %576 = vmatpush.bf16.msra.mxu3 %v880_v4  ;;  %v853_v13 = vld [vmem:[%s982_s25 + $0x20] sm:$0xff]  ;;  %v852_v17 = vld [vmem:[%s982_s25 + $0x18] sm:$0xff]  ;;  %v851_v21 = vld [vmem:[%s982_s25 + $0x10] sm:$0xff] }
  0x1b   : > { %538 = vmatpush.bf16.msra.mxu0 %v855_v5  ;;  %v861_v14 = vld [vmem:[%s982_s25 + $0x60] sm:$0xff]  ;;  %v860_v18 = vld [vmem:[%s982_s25 + $0x58] sm:$0xff]  ;;  %v859_v22 = vld [vmem:[%s982_s25 + $0x50] sm:$0xff] }
  0x1c   : > { %551 = vmatpush.bf16.msra.mxu1 %v863_v6  ;;  %v869_v15 = vld [vmem:[%s982_s25 + $0xa0] sm:$0xff]  ;;  %v868_v19 = vld [vmem:[%s982_s25 + $0x98] sm:$0xff]  ;;  %v867_v23 = vld [vmem:[%s982_s25 + $0x90] sm:$0xff] }
  0x1d   : > { %564 = vmatpush.bf16.msra.mxu2 %v871_v7  ;;  %v877_v16 = vld [vmem:[%s982_s25 + $0xe0] sm:$0xff]  ;;  %v876_v20 = vld [vmem:[%s982_s25 + $0xd8] sm:$0xff]  ;;  %v875_v24 = vld [vmem:[%s982_s25 + $0xd0] sm:$0xff] }
  0x1e   : > { %577 = vmatpush.bf16.msra.mxu3 %v879_v8  ;;  %v850_v25 = vld [vmem:[%s982_s25 + $0x8] sm:$0xff]  ;;  %v265_v27 = vld [vmem:[%s977_s21] sm:$0xff] }
  0x1f   : > { %539 = vmatpush.bf16.msra.mxu0 %v854_v9  ;;  %v858_v26 = vld [vmem:[%s982_s25 + $0x48] sm:$0xff]  ;;  %v333_v31 = vunpack.c.l.b16 %v265_v27  ;;  %v334_v32 = vunpack.c.h.b16 %v265_v27  ;;  %v849_v33 = vld [vmem:[%s982_s25] sm:$0xff] }
  0x20   : > { %552 = vmatpush.bf16.msra.mxu1 %v862_v10  ;;  %v866_v28 = vld [vmem:[%s982_s25 + $0x88] sm:$0xff]  ;;  %v857_v34 = vld [vmem:[%s982_s25 + $0x40] sm:$0xff] }
  0x21   : > { %565 = vmatpush.bf16.msra.mxu2 %v870_v11  ;;  %v874_v29 = vld [vmem:[%s982_s25 + $0xc8] sm:$0xff]  ;;  %v865_v37 = vld [vmem:[%s982_s25 + $0x80] sm:$0xff]  ;;  %v337_v39 = vpack.c.b16 %v333_v31, %v333_v31  ;;  %v338_v40 = vpack.c.b16 %v334_v32, %v334_v32 }
  0x22   : > { %578 = vmatpush.bf16.msra.mxu3 %v878_v12  ;;  %v266_v30 = vld [vmem:[%s977_s21 + $0x8] sm:$0xff]  ;;  %v873_v38 = vld [vmem:[%s982_s25 + $0xc0] sm:$0xff] }
  0x23   : > { %540 = vmatpush.bf16.msra.mxu0 %v853_v13  ;;  %v335_v35 = vunpack.c.l.b16 %v266_v30  ;;  %v336_v36 = vunpack.c.h.b16 %v266_v30  ;;  %v264_v51 = vld [vmem:[#allocation2] sm:$0xff] }
  0x24   : > { %553 = vmatpush.bf16.msra.mxu1 %v861_v14 }
  0x25   : > { %566 = vmatpush.bf16.msra.mxu2 %v869_v15  ;;  %v339_v41 = vpack.c.b16 %v335_v35, %v335_v35  ;;  %v340_v42 = vpack.c.b16 %v336_v36, %v336_v36 }
  0x26   : > { %579 = vmatpush.bf16.msra.mxu3 %v877_v16 }
  0x27   : > { %541 = vmatpush.bf16.msra.mxu0 %v852_v17 }
  0x28   : > { %554 = vmatpush.bf16.msra.mxu1 %v860_v18 }
  0x29   : > { %567 = vmatpush.bf16.msra.mxu2 %v868_v19 }
  0x2a   : > { %580 = vmatpush.bf16.msra.mxu3 %v876_v20 }
  0x2b   : > { %542 = vmatpush.bf16.msra.mxu0 %v851_v21 }
  0x2c   : > { %555 = vmatpush.bf16.msra.mxu1 %v859_v22 }
  0x2d   : > { %568 = vmatpush.bf16.msra.mxu2 %v867_v23 }
  0x2e   : > { %581 = vmatpush.bf16.msra.mxu3 %v875_v24 }
  0x2f   : > { %543 = vmatpush.bf16.msra.mxu0 %v850_v25 }
  0x30   : > { %556 = vmatpush.bf16.msra.mxu1 %v858_v26 }
  0x31   : > { %569 = vmatpush.bf16.msra.mxu2 %v866_v28 }
  0x32   : > { %582 = vmatpush.bf16.msra.mxu3 %v874_v29 }
  0x33   : > { %544 = vmatpush.bf16.msra.mxu0 %v849_v33 }
  0x34   : > { %557 = vmatpush.bf16.msra.mxu1 %v857_v34 }
  0x35   : > { %570 = vmatpush.bf16.msra.mxu2 %v865_v37 }
  0x36   : > { %583 = vmatpush.bf16.msra.mxu3 %v873_v38  ;;  %545 = vmatmul.bf16.vlgmr.msra.gmra.mxu0 %v337_v39 }
  0x37   : > { %558 = vmatmul.bf16.vlgmr.msra.gmra.mxu1 %v338_v40 }
  0x38   : > { %571 = vmatmul.bf16.vlgmr.msra.gmra.mxu2 %v339_v41 }
  0x39   : > { %584 = vmatmul.bf16.vlgmr.msra.gmra.mxu3 %v340_v42 }
  0xb3   : > { %v546_v43 = vpop.f32.mrf.mxu0 }
  0xb4   : > { %v559_v44 = vpop.f32.mrf.mxu1 }
  0xb5   : > { %v560_v45 = vadd.f32 %v559_v44, %v546_v43 }
  0xbb   : > { %v572_v46 = vpop.f32.mrf.mxu2  ;;  %v548_v49 = vpop.f32.mrf.mxu0 }
  0xbc   : > { %v585_v47 = vpop.f32.mrf.mxu3  ;;  %v573_v48 = vadd.f32 %v572_v46, %v560_v45  ;;  %v561_v50 = vpop.f32.mrf.mxu1 }
  0xbe   : > { %v586_v52 = vadd.f32 %v585_v47, %v573_v48 }
  0xc0   : > { %v589_v53 = vadd.f32 %v586_v52, %v264_v51  ;;  %594 = sbr.rel (%p845_p7) target bundleno = 205 (0xcd), region = 40 }
  0xc2   : > { %590 = vst [vmem:[#allocation2] sm:$0xff] %v589_v53 }
  0xc3   : > { %v574_v54 = vpop.f32.mrf.mxu2 }
  0xc4   : > { %v587_v55 = vpop.f32.mrf.mxu3 }
  0xc5   : > { %v906_v57 = vld [vmem:[%s1037_s2] ss:$0 sm:$0xff] }
  0xc9   : > { %v595_v56 = vld [vmem:[#allocation2] sm:$0xff] }
  0xca   : > { %v600_v58 = vadd.f32 %v906_v57, %v595_v56 }
  0xcc   : > { %601 = vst [vmem:[%s1038_s3] sm:$0xff] %v600_v58 }
  0xcd PF: > { %s13_s14 = sadd.s32 1, %s929_s14   ;;  %s1039_s12 = smov %s925_s13 }
  0xce   : > { %p10_p8 = scmp.ge.s32.totalorder %s13_s14, 18   ;;  %s1040_s13 = smov %s1042_s15 }
  0xd0   :  { %12 = sbr.rel (!%p10_p8) target bundleno = 2 (0x2), region = 76 }

</bundles_post_ra>
